<compile_context>
chip_gen: v7x
topology: tpu7x:2x2x1
jax: 0.10.0
libtpu: 0.0.40
codegen_flags: <defaults>
</compile_context>

<pallas_src>
import functools

import jax
import jax.numpy as jnp
from jax.experimental import pallas as pl
from jax.experimental.pallas import tpu as pltpu


def _round_up(x, m):
    return ((x + m - 1) // m) * m


def _vmem_block_bytes(shape, dtype):
    """Layout-aware VMEM footprint: minor dim -> 128 lanes, second-minor dim ->
    native sublane multiple (8 for f32, 16 for bf16, 32 for int8)."""
    itemsize = jnp.dtype(dtype).itemsize
    sub = max(8, 32 // itemsize)
    if len(shape) == 0:
        return itemsize
    if len(shape) == 1:
        return _round_up(int(shape[0]), 128) * itemsize
    lead = 1
    for d in shape[:-2]:
        lead *= int(d)
    return (lead * _round_up(int(shape[-2]), sub)
            * _round_up(int(shape[-1]), 128) * itemsize)


def _pick_tiles(B, C, H, W, K, x_dtype, out_dtype, batch_tile, channel_tile):
    """Pick (bB, tC) with honest padded-byte accounting against a budget that is
    safe on all generations (<= v7x's 32 MiB scoped default)."""
    L = H * W
    pad = K // 2
    Hp, Wp = H + 2 * pad, W + 2 * pad
    itemsize = jnp.dtype(x_dtype).itemsize
    sub = max(8, 32 // itemsize)          # sublane packing for x blocks
    budget = 24 << 20

    def fixed_bytes(bb):                  # everything except the x block
        return (2 * _vmem_block_bytes((bb, L), jnp.float32)          # sum/max
                + 2 * _vmem_block_bytes((bb, Hp, Wp), jnp.float32)   # padded maps
                + 2 * _vmem_block_bytes((bb, 1, L), out_dtype))      # out, x2 buf

    def x_bytes(bb, tc):                  # x block, double-buffered
        return 2 * _vmem_block_bytes((bb, tc, L), x_dtype)

    # Valid channel tiles: divisors of C that are C itself or sublane multiples
    # (keeps the block's second-minor dim (8,128)-compatible).
    c_tiles = [d for d in range(1, C + 1)
               if C % d == 0 and (d == C or d % sub == 0)]
    tc_min = min(c_tiles)

    if batch_tile is not None:
        assert B % batch_tile == 0
        bB = batch_tile
    else:
        bB = 1
        for d in range(1, B + 1):
            if B % d == 0 and fixed_bytes(d) + x_bytes(d, tc_min) <= budget:
                bB = d
        # Keep a parallel batch axis >= 2 so v7x's second TensorCore gets work.
        if B >= 2 and B // bB < 2:
            halves = [d for d in range(1, B // 2 + 1) if B % d == 0]
            if halves:
                bB = max(halves)

    if channel_tile is not None:
        assert C % channel_tile == 0
        assert channel_tile == C or channel_tile % sub == 0, (
            "channel_tile must be C or a multiple of the sublane packing")
        tC = channel_tile
    else:
        tC = tc_min
        for d in c_tiles:
            if fixed_bytes(bB) + x_bytes(bB, d) <= budget:
                tC = max(tC, d)

    total = fixed_bytes(bB) + x_bytes(bB, tC)
    return bB, tC, total


def _spatial_attn_kernel(x_ref, w_ref, o_ref, sum_s, max_s, psum_s, pmax_s,
                         *, bB, tC, H, W, K):
    # x_ref  : (bB, tC, H*W)      VMEM  lane-dense, un-padded input slab
    # w_ref  : (2*K*K,)           SMEM  flat conv weight (1/C folded into avg taps)
    # o_ref  : (bB, 1, H*W)       VMEM  lane-dense output block
    # sum_s  : (bB, H*W)   f32    VMEM  running channel sum
    # max_s  : (bB, H*W)   f32    VMEM  running channel max
    # psum_s : (bB, Hp, Wp) f32   VMEM  zero-padded sum map (finalize staging)
    # pmax_s : (bB, Hp, Wp) f32   VMEM  zero-padded max map (finalize staging)
    pad = K // 2
    c_idx = pl.program_id(1)

    @pl.when(c_idx == 0)
    def _init():
        sum_s[...] = jnp.zeros(sum_s.shape, jnp.float32)
        max_s[...] = jnp.full(max_s.shape, -jnp.inf, jnp.float32)

    # ---- streamed, lane-dense channel reduction -----------------------------
    CHUNK = 8                                 # sublane-aligned channel chunk
    n_chunks, _ = divmod(tC, CHUNK)
    s = sum_s[...]
    m = max_s[...]
    if n_chunks > 0:
        if n_chunks <= 8:                     # short: fully static (free unroll)
            for ci in range(n_chunks):
                v = x_ref[:, ci * CHUNK:(ci + 1) * CHUNK, :].astype(jnp.float32)
                s = s + jnp.sum(v, axis=1)
                m = jnp.maximum(m, jnp.max(v, axis=1))
        else:                                 # long: bounded-unroll fori_loop
            def body(ci, carry):
                cs, cm = carry
                c0 = pl.multiple_of(ci * CHUNK, CHUNK)
                v = x_ref[:, pl.ds(c0, CHUNK), :].astype(jnp.float32)
                return (cs + jnp.sum(v, axis=1),
                        jnp.maximum(cm, jnp.max(v, axis=1)))
            s, m = jax.lax.fori_loop(0, n_chunks, body, (s, m), unroll=4)
    for c in range(n_chunks * CHUNK, tC):     # static remainder (< 8 slabs)
        v = x_ref[:, c, :].astype(jnp.float32)
        s = s + v
        m = jnp.maximum(m, v)
    sum_s[...] = s
    max_s[...] = m

    # ---- finalize: zero-pad maps, 7x7 conv, sigmoid, lane-dense store -------
    @pl.when(c_idx == pl.num_programs(1) - 1)
    def _finalize():
        # Stage the flat maps row-by-row into zero-padded 2-D maps (ref slices
        # only, no in-kernel reshape).  Halo stays 0 for BOTH maps, matching
        # the reference's zero-padded conv of the mean/max maps.
        psum_s[...] = jnp.zeros(psum_s.shape, jnp.float32)
        pmax_s[...] = jnp.zeros(pmax_s.shape, jnp.float32)
        for i in range(H):
            psum_s[:, pad + i, pad:pad + W] = sum_s[:, i * W:(i + 1) * W]
            pmax_s[:, pad + i, pad:pad + W] = max_s[:, i * W:(i + 1) * W]
        ssum = psum_s[...]                    # (bB, Hp, Wp); 1/C already in w
        smax = pmax_s[...]
        acc = jnp.zeros((bB, H, W), jnp.float32)
        # Hoist the lane (W) shift out of the tap loop: one shifted copy of each
        # map per dj; the inner di loop only takes cheap sublane slices.
        for dj in range(K):
            s_dj = ssum[:, :, dj:dj + W]      # (bB, Hp, W) — 1 lane shift
            m_dj = smax[:, :, dj:dj + W]      # (bB, Hp, W) — 1 lane shift
            for di in range(K):
                w_avg = w_ref[0 * K * K + di * K + dj]
                w_max = w_ref[1 * K * K + di * K + dj]
                acc = (acc
                       + w_avg * s_dj[:, di:di + H, :]
                       + w_max * m_dj[:, di:di + H, :])
        out2d = jax.nn.sigmoid(acc).astype(o_ref.dtype)       # (bB, H, W)
        for i in range(H):                    # row-wise store into flat block
            o_ref[:, 0, i * W:(i + 1) * W] = out2d[:, i, :]


def spatial_attention(x, weight, *, kernel_size=7, batch_tile=None,
                      channel_tile=None):
    """x: (B, C, H, W), weight: (1, 2, K, K) from Conv2d(2,1,K,bias=False)
    -> (B, 1, H, W)."""
    B, C, H, W = x.shape
    K = kernel_size
    pad = K // 2
    Hp, Wp = H + 2 * pad, W + 2 * pad
    L = H * W

    bB, tC, vmem_total = _pick_tiles(B, C, H, W, K, x.dtype, x.dtype,
                                     batch_tile, channel_tile)
    nb, nc = B // bB, C // tC

    # Lane-dense view of x (free reshape of a contiguous NCHW array).
    x_flat = x.reshape(B, C, L)
    # Flat conv weight for SMEM; fold the channel-mean 1/C into the avg taps
    # (the kernel only accumulates a channel SUM).
    w_flat = weight.astype(jnp.float32).reshape(2 * K * K)
    w_flat = w_flat.at[: K * K].multiply(jnp.float32(1.0 / C))

    kernel = functools.partial(_spatial_attn_kernel,
                               bB=bB, tC=tC, H=H, W=W, K=K)

    vmem_limit = int(min(48 << 20, max(32 << 20, int(vmem_total * 1.25))))

    out_flat = pl.pallas_call(
        kernel,
        out_shape=jax.ShapeDtypeStruct((B, 1, L), x.dtype),
        grid=(nb, nc),
        in_specs=[
            pl.BlockSpec((bB, tC, L), lambda b, c: (b, c, 0)),
            pl.BlockSpec(memory_space=pltpu.MemorySpace.SMEM),
        ],
        out_specs=pl.BlockSpec((bB, 1, L), lambda b, c: (b, 0, 0)),
        scratch_shapes=[
            pltpu.VMEM((bB, L), jnp.float32),        # running channel sum (flat)
            pltpu.VMEM((bB, L), jnp.float32),        # running channel max (flat)
            pltpu.VMEM((bB, Hp, Wp), jnp.float32),   # zero-padded sum map
            pltpu.VMEM((bB, Hp, Wp), jnp.float32),   # zero-padded max map
        ],
        compiler_params=pltpu.CompilerParams(
            dimension_semantics=("parallel", "arbitrary"),
            vmem_limit_bytes=vmem_limit),
    )(x_flat, w_flat)
    return out_flat.reshape(B, 1, H, W)


def _reference(x, weight, kernel_size=7):
    """Pure-JAX reference matching the PyTorch forward exactly."""
    avg = jnp.mean(x, axis=1, keepdims=True)
    mx = jnp.max(x, axis=1, keepdims=True)
    combined = jnp.concatenate([avg, mx], axis=1)             # (B, 2, H, W)
    out = jax.lax.conv_general_dilated(
        combined.astype(jnp.float32), weight.astype(jnp.float32),
        window_strides=(1, 1),
        padding=[(kernel_size // 2, kernel_size // 2)] * 2,
        dimension_numbers=("NCHW", "OIHW", "NCHW"))
    return jax.nn.sigmoid(out).astype(x.dtype)


if __name__ == "__main__":
    key = jax.random.PRNGKey(0)
    kx, kw = jax.random.split(key)

    B, C, H, W = 2, 4, 16, 16
    K = 7

    x = jax.random.normal(kx, (B, C, H, W), dtype=jnp.float32)
    # Deterministic conv weight (shape from nn.Conv2d(2, 1, 7, bias=False)).
    weight = jax.random.normal(kw, (1, 2, K, K), dtype=jnp.float32) * 0.1

    ref = jax.block_until_ready(_reference(x, weight, kernel_size=K))
    out = jax.block_until_ready(spatial_attention(x, weight, kernel_size=K))
    assert out.shape == (B, 1, H, W)
    assert jnp.allclose(out, ref, atol=1e-5, rtol=1e-5)

    # Multi-step channel accumulator path (tC < C, sublane-aligned tile):
    # exercises pl.when init / accumulate / finalize across the channel axis.
    x2 = jax.random.normal(jax.random.PRNGKey(1), (2, 16, H, W), dtype=jnp.float32)
    ref2 = _reference(x2, weight, kernel_size=K)
    out2 = jax.block_until_ready(
        spatial_attention(x2, weight, kernel_size=K, batch_tile=1, channel_tile=8))
    assert jnp.allclose(out2, ref2, atol=1e-5, rtol=1e-5)

    # Larger channel count (default tiling): exercises the bounded-unroll
    # fori_loop reduction path.
    x3 = jax.random.normal(jax.random.PRNGKey(2), (2, 128, H, W), dtype=jnp.float32)
    ref3 = _reference(x3, weight, kernel_size=K)
    out3 = jax.block_until_ready(spatial_attention(x3, weight, kernel_size=K))
    assert jnp.allclose(out3, ref3, atol=1e-5, rtol=1e-5)

    print("KERNEL_OK")
</pallas_src>

<mosaic_0001>
module attributes {stable_mosaic.version = 11 : i64} {
  func.func @_spatial_attn_kernel(%arg0: i32, %arg1: i32, %arg2: memref<1x4x256xf32, #tpu.memory_space<vmem>>, %arg3: memref<98xf32, #tpu.memory_space<smem>>, %arg4: memref<1x1x256xf32, #tpu.memory_space<vmem>>, %arg5: memref<1x256xf32, #tpu.memory_space<vmem>>, %arg6: memref<1x256xf32, #tpu.memory_space<vmem>>, %arg7: memref<1x22x22xf32, #tpu.memory_space<vmem>>, %arg8: memref<1x22x22xf32, #tpu.memory_space<vmem>>) attributes {dimension_semantics = [#tpu.dimension_semantics<parallel>, #tpu.dimension_semantics<arbitrary>], iteration_bounds = array<i64: 2, 1>, scalar_prefetch = 0 : i64, scratch_operands = 4 : i64, tpu.core_type = #tpu.core_type<tc>, window_params = [{transform_indices = @transform_0, window_bounds = array<i64: 1, 4, 256>}, {transform_indices = @transform_1, window_bounds = array<i64: 98>}, {transform_indices = @transform_2, window_bounds = array<i64: 1, 1, 256>}]} {
    %c0_i32 = arith.constant 0 : i32
    %0 = arith.cmpi eq, %arg1, %c0_i32 : i32
    %1 = arith.extui %0 : i1 to i32
    %c0_i32_0 = arith.constant 0 : i32
    %2 = arith.cmpi ne, %1, %c0_i32_0 : i32
    scf.if %2 {
      %cst = arith.constant 0.000000e+00 : f32
      %26 = vector.broadcast %cst : f32 to vector<1x256xf32>
      %c0_19 = arith.constant 0 : index
      %c0_20 = arith.constant 0 : index
      %27 = vector.load %arg5[%c0_19, %c0_20] : memref<1x256xf32, #tpu.memory_space<vmem>>, vector<1x256xf32>
      tpu.vector_store %arg5[%c0_19, %c0_20], %26 {strides = array<i32>} : memref<1x256xf32, #tpu.memory_space<vmem>>, vector<1x256xf32>,
      %cst_21 = arith.constant 0xFF800000 : f32
      %28 = vector.broadcast %cst_21 : f32 to vector<1x256xf32>
      %c0_22 = arith.constant 0 : index
      %c0_23 = arith.constant 0 : index
      %29 = vector.load %arg6[%c0_22, %c0_23] : memref<1x256xf32, #tpu.memory_space<vmem>>, vector<1x256xf32>
      tpu.vector_store %arg6[%c0_22, %c0_23], %28 {strides = array<i32>} : memref<1x256xf32, #tpu.memory_space<vmem>>, vector<1x256xf32>,
    } else {
    }
    %c0 = arith.constant 0 : index
    %c0_1 = arith.constant 0 : index
    %3 = vector.load %arg5[%c0, %c0_1] : memref<1x256xf32, #tpu.memory_space<vmem>>, vector<1x256xf32>
    %c0_2 = arith.constant 0 : index
    %c0_3 = arith.constant 0 : index
    %4 = vector.load %arg6[%c0_2, %c0_3] : memref<1x256xf32, #tpu.memory_space<vmem>>, vector<1x256xf32>
    %c0_4 = arith.constant 0 : index
    %c0_5 = arith.constant 0 : index
    %c0_6 = arith.constant 0 : index
    %5 = vector.load %arg2[%c0_4, %c0_5, %c0_6] : memref<1x4x256xf32, #tpu.memory_space<vmem>>, vector<1x1x256xf32>
    %6 = vector.shape_cast %5 : vector<1x1x256xf32> to vector<1x256xf32>
    %7 = arith.addf %3, %6 : vector<1x256xf32>
    %8 = arith.maximumf %4, %6 : vector<1x256xf32>
    %c0_7 = arith.constant 0 : index
    %c1 = arith.constant 1 : index
    %c0_8 = arith.constant 0 : index
    %9 = vector.load %arg2[%c0_7, %c1, %c0_8] : memref<1x4x256xf32, #tpu.memory_space<vmem>>, vector<1x1x256xf32>
    %10 = vector.shape_cast %9 : vector<1x1x256xf32> to vector<1x256xf32>
    %11 = arith.addf %7, %10 : vector<1x256xf32>
    %12 = arith.maximumf %8, %10 : vector<1x256xf32>
    %c0_9 = arith.constant 0 : index
    %c2 = arith.constant 2 : index
    %c0_10 = arith.constant 0 : index
    %13 = vector.load %arg2[%c0_9, %c2, %c0_10] : memref<1x4x256xf32, #tpu.memory_space<vmem>>, vector<1x1x256xf32>
    %14 = vector.shape_cast %13 : vector<1x1x256xf32> to vector<1x256xf32>
    %15 = arith.addf %11, %14 : vector<1x256xf32>
    %16 = arith.maximumf %12, %14 : vector<1x256xf32>
    %c0_11 = arith.constant 0 : index
    %c3 = arith.constant 3 : index
    %c0_12 = arith.constant 0 : index
    %17 = vector.load %arg2[%c0_11, %c3, %c0_12] : memref<1x4x256xf32, #tpu.memory_space<vmem>>, vector<1x1x256xf32>
    %18 = vector.shape_cast %17 : vector<1x1x256xf32> to vector<1x256xf32>
    %19 = arith.addf %15, %18 : vector<1x256xf32>
    %20 = arith.maximumf %16, %18 : vector<1x256xf32>
    %c0_13 = arith.constant 0 : index
    %c0_14 = arith.constant 0 : index
    %21 = vector.load %arg5[%c0_13, %c0_14] : memref<1x256xf32, #tpu.memory_space<vmem>>, vector<1x256xf32>
    tpu.vector_store %arg5[%c0_13, %c0_14], %19 {strides = array<i32>} : memref<1x256xf32, #tpu.memory_space<vmem>>, vector<1x256xf32>,
    %c0_15 = arith.constant 0 : index
    %c0_16 = arith.constant 0 : index
    %22 = vector.load %arg6[%c0_15, %c0_16] : memref<1x256xf32, #tpu.memory_space<vmem>>, vector<1x256xf32>
    tpu.vector_store %arg6[%c0_15, %c0_16], %20 {strides = array<i32>} : memref<1x256xf32, #tpu.memory_space<vmem>>, vector<1x256xf32>,
    %c0_i32_17 = arith.constant 0 : i32
    %23 = arith.cmpi eq, %arg1, %c0_i32_17 : i32
    %24 = arith.extui %23 : i1 to i32
    %c0_i32_18 = arith.constant 0 : i32
    %25 = arith.cmpi ne, %24, %c0_i32_18 : i32
    scf.if %25 {
      %cst = arith.constant 0.000000e+00 : f32
      %26 = vector.broadcast %cst : f32 to vector<1x22x22xf32>
      %c0_19 = arith.constant 0 : index
      %c0_20 = arith.constant 0 : index
      %c0_21 = arith.constant 0 : index
      %27 = vector.load %arg7[%c0_19, %c0_20, %c0_21] : memref<1x22x22xf32, #tpu.memory_space<vmem>>, vector<1x22x22xf32>
      tpu.vector_store %arg7[%c0_19, %c0_20, %c0_21], %26 {strides = array<i32>} : memref<1x22x22xf32, #tpu.memory_space<vmem>>, vector<1x22x22xf32>,
      %cst_22 = arith.constant 0.000000e+00 : f32
      %28 = vector.broadcast %cst_22 : f32 to vector<1x22x22xf32>
      %c0_23 = arith.constant 0 : index
      %c0_24 = arith.constant 0 : index
      %c0_25 = arith.constant 0 : index
      %29 = vector.load %arg8[%c0_23, %c0_24, %c0_25] : memref<1x22x22xf32, #tpu.memory_space<vmem>>, vector<1x22x22xf32>
      tpu.vector_store %arg8[%c0_23, %c0_24, %c0_25], %28 {strides = array<i32>} : memref<1x22x22xf32, #tpu.memory_space<vmem>>, vector<1x22x22xf32>,
      %c0_26 = arith.constant 0 : index
      %c0_27 = arith.constant 0 : index
      %30 = vector.load %arg5[%c0_26, %c0_27] : memref<1x256xf32, #tpu.memory_space<vmem>>, vector<1x16xf32>
      %c0_28 = arith.constant 0 : index
      %c3_29 = arith.constant 3 : index
      %c3_30 = arith.constant 3 : index
      %31 = vector.load %arg7[%c0_28, %c3_29, %c3_30] : memref<1x22x22xf32, #tpu.memory_space<vmem>>, vector<1x1x16xf32>
      %32 = vector.shape_cast %31 : vector<1x1x16xf32> to vector<1x16xf32>
      %33 = vector.shape_cast %30 : vector<1x16xf32> to vector<1x1x16xf32>
      tpu.vector_store %arg7[%c0_28, %c3_29, %c3_30], %33 {strides = array<i32>} : memref<1x22x22xf32, #tpu.memory_space<vmem>>, vector<1x1x16xf32>,
      %c0_31 = arith.constant 0 : index
      %c0_32 = arith.constant 0 : index
      %34 = vector.load %arg6[%c0_31, %c0_32] : memref<1x256xf32, #tpu.memory_space<vmem>>, vector<1x16xf32>
      %c0_33 = arith.constant 0 : index
      %c3_34 = arith.constant 3 : index
      %c3_35 = arith.constant 3 : index
      %35 = vector.load %arg8[%c0_33, %c3_34, %c3_35] : memref<1x22x22xf32, #tpu.memory_space<vmem>>, vector<1x1x16xf32>
      %36 = vector.shape_cast %35 : vector<1x1x16xf32> to vector<1x16xf32>
      %37 = vector.shape_cast %34 : vector<1x16xf32> to vector<1x1x16xf32>
      tpu.vector_store %arg8[%c0_33, %c3_34, %c3_35], %37 {strides = array<i32>} : memref<1x22x22xf32, #tpu.memory_space<vmem>>, vector<1x1x16xf32>,
      %c0_36 = arith.constant 0 : index
      %c16 = arith.constant 16 : index
      %38 = vector.load %arg5[%c0_36, %c16] : memref<1x256xf32, #tpu.memory_space<vmem>>, vector<1x16xf32>
      %c0_37 = arith.constant 0 : index
      %c4 = arith.constant 4 : index
      %c3_38 = arith.constant 3 : index
      %39 = vector.load %arg7[%c0_37, %c4, %c3_38] : memref<1x22x22xf32, #tpu.memory_space<vmem>>, vector<1x1x16xf32>
      %40 = vector.shape_cast %39 : vector<1x1x16xf32> to vector<1x16xf32>
      %41 = vector.shape_cast %38 : vector<1x16xf32> to vector<1x1x16xf32>
      tpu.vector_store %arg7[%c0_37, %c4, %c3_38], %41 {strides = array<i32>} : memref<1x22x22xf32, #tpu.memory_space<vmem>>, vector<1x1x16xf32>,
      %c0_39 = arith.constant 0 : index
      %c16_40 = arith.constant 16 : index
      %42 = vector.load %arg6[%c0_39, %c16_40] : memref<1x256xf32, #tpu.memory_space<vmem>>, vector<1x16xf32>
      %c0_41 = arith.constant 0 : index
      %c4_42 = arith.constant 4 : index
      %c3_43 = arith.constant 3 : index
      %43 = vector.load %arg8[%c0_41, %c4_42, %c3_43] : memref<1x22x22xf32, #tpu.memory_space<vmem>>, vector<1x1x16xf32>
      %44 = vector.shape_cast %43 : vector<1x1x16xf32> to vector<1x16xf32>
      %45 = vector.shape_cast %42 : vector<1x16xf32> to vector<1x1x16xf32>
      tpu.vector_store %arg8[%c0_41, %c4_42, %c3_43], %45 {strides = array<i32>} : memref<1x22x22xf32, #tpu.memory_space<vmem>>, vector<1x1x16xf32>,
      %c0_44 = arith.constant 0 : index
      %c32 = arith.constant 32 : index
      %46 = vector.load %arg5[%c0_44, %c32] : memref<1x256xf32, #tpu.memory_space<vmem>>, vector<1x16xf32>
      %c0_45 = arith.constant 0 : index
      %c5 = arith.constant 5 : index
      %c3_46 = arith.constant 3 : index
      %47 = vector.load %arg7[%c0_45, %c5, %c3_46] : memref<1x22x22xf32, #tpu.memory_space<vmem>>, vector<1x1x16xf32>
      %48 = vector.shape_cast %47 : vector<1x1x16xf32> to vector<1x16xf32>
      %49 = vector.shape_cast %46 : vector<1x16xf32> to vector<1x1x16xf32>
      tpu.vector_store %arg7[%c0_45, %c5, %c3_46], %49 {strides = array<i32>} : memref<1x22x22xf32, #tpu.memory_space<vmem>>, vector<1x1x16xf32>,
      %c0_47 = arith.constant 0 : index
      %c32_48 = arith.constant 32 : index
      %50 = vector.load %arg6[%c0_47, %c32_48] : memref<1x256xf32, #tpu.memory_space<vmem>>, vector<1x16xf32>
      %c0_49 = arith.constant 0 : index
      %c5_50 = arith.constant 5 : index
      %c3_51 = arith.constant 3 : index
      %51 = vector.load %arg8[%c0_49, %c5_50, %c3_51] : memref<1x22x22xf32, #tpu.memory_space<vmem>>, vector<1x1x16xf32>
      %52 = vector.shape_cast %51 : vector<1x1x16xf32> to vector<1x16xf32>
      %53 = vector.shape_cast %50 : vector<1x16xf32> to vector<1x1x16xf32>
      tpu.vector_store %arg8[%c0_49, %c5_50, %c3_51], %53 {strides = array<i32>} : memref<1x22x22xf32, #tpu.memory_space<vmem>>, vector<1x1x16xf32>,
      %c0_52 = arith.constant 0 : index
      %c48 = arith.constant 48 : index
      %54 = vector.load %arg5[%c0_52, %c48] : memref<1x256xf32, #tpu.memory_space<vmem>>, vector<1x16xf32>
      %c0_53 = arith.constant 0 : index
      %c6 = arith.constant 6 : index
      %c3_54 = arith.constant 3 : index
      %55 = vector.load %arg7[%c0_53, %c6, %c3_54] : memref<1x22x22xf32, #tpu.memory_space<vmem>>, vector<1x1x16xf32>
      %56 = vector.shape_cast %55 : vector<1x1x16xf32> to vector<1x16xf32>
      %57 = vector.shape_cast %54 : vector<1x16xf32> to vector<1x1x16xf32>
      tpu.vector_store %arg7[%c0_53, %c6, %c3_54], %57 {strides = array<i32>} : memref<1x22x22xf32, #tpu.memory_space<vmem>>, vector<1x1x16xf32>,
      %c0_55 = arith.constant 0 : index
      %c48_56 = arith.constant 48 : index
      %58 = vector.load %arg6[%c0_55, %c48_56] : memref<1x256xf32, #tpu.memory_space<vmem>>, vector<1x16xf32>
      %c0_57 = arith.constant 0 : index
      %c6_58 = arith.constant 6 : index
      %c3_59 = arith.constant 3 : index
      %59 = vector.load %arg8[%c0_57, %c6_58, %c3_59] : memref<1x22x22xf32, #tpu.memory_space<vmem>>, vector<1x1x16xf32>
      %60 = vector.shape_cast %59 : vector<1x1x16xf32> to vector<1x16xf32>
      %61 = vector.shape_cast %58 : vector<1x16xf32> to vector<1x1x16xf32>
      tpu.vector_store %arg8[%c0_57, %c6_58, %c3_59], %61 {strides = array<i32>} : memref<1x22x22xf32, #tpu.memory_space<vmem>>, vector<1x1x16xf32>,
      %c0_60 = arith.constant 0 : index
      %c64 = arith.constant 64 : index
      %62 = vector.load %arg5[%c0_60, %c64] : memref<1x256xf32, #tpu.memory_space<vmem>>, vector<1x16xf32>
      %c0_61 = arith.constant 0 : index
      %c7 = arith.constant 7 : index
      %c3_62 = arith.constant 3 : index
      %63 = vector.load %arg7[%c0_61, %c7, %c3_62] : memref<1x22x22xf32, #tpu.memory_space<vmem>>, vector<1x1x16xf32>
      %64 = vector.shape_cast %63 : vector<1x1x16xf32> to vector<1x16xf32>
      %65 = vector.shape_cast %62 : vector<1x16xf32> to vector<1x1x16xf32>
      tpu.vector_store %arg7[%c0_61, %c7, %c3_62], %65 {strides = array<i32>} : memref<1x22x22xf32, #tpu.memory_space<vmem>>, vector<1x1x16xf32>,
      %c0_63 = arith.constant 0 : index
      %c64_64 = arith.constant 64 : index
      %66 = vector.load %arg6[%c0_63, %c64_64] : memref<1x256xf32, #tpu.memory_space<vmem>>, vector<1x16xf32>
      %c0_65 = arith.constant 0 : index
      %c7_66 = arith.constant 7 : index
      %c3_67 = arith.constant 3 : index
      %67 = vector.load %arg8[%c0_65, %c7_66, %c3_67] : memref<1x22x22xf32, #tpu.memory_space<vmem>>, vector<1x1x16xf32>
      %68 = vector.shape_cast %67 : vector<1x1x16xf32> to vector<1x16xf32>
      %69 = vector.shape_cast %66 : vector<1x16xf32> to vector<1x1x16xf32>
      tpu.vector_store %arg8[%c0_65, %c7_66, %c3_67], %69 {strides = array<i32>} : memref<1x22x22xf32, #tpu.memory_space<vmem>>, vector<1x1x16xf32>,
      %c0_68 = arith.constant 0 : index
      %c80 = arith.constant 80 : index
      %70 = vector.load %arg5[%c0_68, %c80] : memref<1x256xf32, #tpu.memory_space<vmem>>, vector<1x16xf32>
      %c0_69 = arith.constant 0 : index
      %c8 = arith.constant 8 : index
      %c3_70 = arith.constant 3 : index
      %71 = vector.load %arg7[%c0_69, %c8, %c3_70] : memref<1x22x22xf32, #tpu.memory_space<vmem>>, vector<1x1x16xf32>
      %72 = vector.shape_cast %71 : vector<1x1x16xf32> to vector<1x16xf32>
      %73 = vector.shape_cast %70 : vector<1x16xf32> to vector<1x1x16xf32>
      tpu.vector_store %arg7[%c0_69, %c8, %c3_70], %73 {strides = array<i32>} : memref<1x22x22xf32, #tpu.memory_space<vmem>>, vector<1x1x16xf32>,
      %c0_71 = arith.constant 0 : index
      %c80_72 = arith.constant 80 : index
      %74 = vector.load %arg6[%c0_71, %c80_72] : memref<1x256xf32, #tpu.memory_space<vmem>>, vector<1x16xf32>
      %c0_73 = arith.constant 0 : index
      %c8_74 = arith.constant 8 : index
      %c3_75 = arith.constant 3 : index
      %75 = vector.load %arg8[%c0_73, %c8_74, %c3_75] : memref<1x22x22xf32, #tpu.memory_space<vmem>>, vector<1x1x16xf32>
      %76 = vector.shape_cast %75 : vector<1x1x16xf32> to vector<1x16xf32>
      %77 = vector.shape_cast %74 : vector<1x16xf32> to vector<1x1x16xf32>
      tpu.vector_store %arg8[%c0_73, %c8_74, %c3_75], %77 {strides = array<i32>} : memref<1x22x22xf32, #tpu.memory_space<vmem>>, vector<1x1x16xf32>,
      %c0_76 = arith.constant 0 : index
      %c96 = arith.constant 96 : index
      %78 = vector.load %arg5[%c0_76, %c96] : memref<1x256xf32, #tpu.memory_space<vmem>>, vector<1x16xf32>
      %c0_77 = arith.constant 0 : index
      %c9 = arith.constant 9 : index
      %c3_78 = arith.constant 3 : index
      %79 = vector.load %arg7[%c0_77, %c9, %c3_78] : memref<1x22x22xf32, #tpu.memory_space<vmem>>, vector<1x1x16xf32>
      %80 = vector.shape_cast %79 : vector<1x1x16xf32> to vector<1x16xf32>
      %81 = vector.shape_cast %78 : vector<1x16xf32> to vector<1x1x16xf32>
      tpu.vector_store %arg7[%c0_77, %c9, %c3_78], %81 {strides = array<i32>} : memref<1x22x22xf32, #tpu.memory_space<vmem>>, vector<1x1x16xf32>,
      %c0_79 = arith.constant 0 : index
      %c96_80 = arith.constant 96 : index
      %82 = vector.load %arg6[%c0_79, %c96_80] : memref<1x256xf32, #tpu.memory_space<vmem>>, vector<1x16xf32>
      %c0_81 = arith.constant 0 : index
      %c9_82 = arith.constant 9 : index
      %c3_83 = arith.constant 3 : index
      %83 = vector.load %arg8[%c0_81, %c9_82, %c3_83] : memref<1x22x22xf32, #tpu.memory_space<vmem>>, vector<1x1x16xf32>
      %84 = vector.shape_cast %83 : vector<1x1x16xf32> to vector<1x16xf32>
      %85 = vector.shape_cast %82 : vector<1x16xf32> to vector<1x1x16xf32>
      tpu.vector_store %arg8[%c0_81, %c9_82, %c3_83], %85 {strides = array<i32>} : memref<1x22x22xf32, #tpu.memory_space<vmem>>, vector<1x1x16xf32>,
      %c0_84 = arith.constant 0 : index
      %c112 = arith.constant 112 : index
      %86 = vector.load %arg5[%c0_84, %c112] : memref<1x256xf32, #tpu.memory_space<vmem>>, vector<1x16xf32>
      %c0_85 = arith.constant 0 : index
      %c10 = arith.constant 10 : index
      %c3_86 = arith.constant 3 : index
      %87 = vector.load %arg7[%c0_85, %c10, %c3_86] : memref<1x22x22xf32, #tpu.memory_space<vmem>>, vector<1x1x16xf32>
      %88 = vector.shape_cast %87 : vector<1x1x16xf32> to vector<1x16xf32>
      %89 = vector.shape_cast %86 : vector<1x16xf32> to vector<1x1x16xf32>
      tpu.vector_store %arg7[%c0_85, %c10, %c3_86], %89 {strides = array<i32>} : memref<1x22x22xf32, #tpu.memory_space<vmem>>, vector<1x1x16xf32>,
      %c0_87 = arith.constant 0 : index
      %c112_88 = arith.constant 112 : index
      %90 = vector.load %arg6[%c0_87, %c112_88] : memref<1x256xf32, #tpu.memory_space<vmem>>, vector<1x16xf32>
      %c0_89 = arith.constant 0 : index
      %c10_90 = arith.constant 10 : index
      %c3_91 = arith.constant 3 : index
      %91 = vector.load %arg8[%c0_89, %c10_90, %c3_91] : memref<1x22x22xf32, #tpu.memory_space<vmem>>, vector<1x1x16xf32>
      %92 = vector.shape_cast %91 : vector<1x1x16xf32> to vector<1x16xf32>
      %93 = vector.shape_cast %90 : vector<1x16xf32> to vector<1x1x16xf32>
      tpu.vector_store %arg8[%c0_89, %c10_90, %c3_91], %93 {strides = array<i32>} : memref<1x22x22xf32, #tpu.memory_space<vmem>>, vector<1x1x16xf32>,
      %c0_92 = arith.constant 0 : index
      %c128 = arith.constant 128 : index
      %94 = vector.load %arg5[%c0_92, %c128] : memref<1x256xf32, #tpu.memory_space<vmem>>, vector<1x16xf32>
      %c0_93 = arith.constant 0 : index
      %c11 = arith.constant 11 : index
      %c3_94 = arith.constant 3 : index
      %95 = vector.load %arg7[%c0_93, %c11, %c3_94] : memref<1x22x22xf32, #tpu.memory_space<vmem>>, vector<1x1x16xf32>
      %96 = vector.shape_cast %95 : vector<1x1x16xf32> to vector<1x16xf32>
      %97 = vector.shape_cast %94 : vector<1x16xf32> to vector<1x1x16xf32>
      tpu.vector_store %arg7[%c0_93, %c11, %c3_94], %97 {strides = array<i32>} : memref<1x22x22xf32, #tpu.memory_space<vmem>>, vector<1x1x16xf32>,
      %c0_95 = arith.constant 0 : index
      %c128_96 = arith.constant 128 : index
      %98 = vector.load %arg6[%c0_95, %c128_96] : memref<1x256xf32, #tpu.memory_space<vmem>>, vector<1x16xf32>
      %c0_97 = arith.constant 0 : index
      %c11_98 = arith.constant 11 : index
      %c3_99 = arith.constant 3 : index
      %99 = vector.load %arg8[%c0_97, %c11_98, %c3_99] : memref<1x22x22xf32, #tpu.memory_space<vmem>>, vector<1x1x16xf32>
      %100 = vector.shape_cast %99 : vector<1x1x16xf32> to vector<1x16xf32>
      %101 = vector.shape_cast %98 : vector<1x16xf32> to vector<1x1x16xf32>
      tpu.vector_store %arg8[%c0_97, %c11_98, %c3_99], %101 {strides = array<i32>} : memref<1x22x22xf32, #tpu.memory_space<vmem>>, vector<1x1x16xf32>,
      %c0_100 = arith.constant 0 : index
      %c144 = arith.constant 144 : index
      %102 = vector.load %arg5[%c0_100, %c144] : memref<1x256xf32, #tpu.memory_space<vmem>>, vector<1x16xf32>
      %c0_101 = arith.constant 0 : index
      %c12 = arith.constant 12 : index
      %c3_102 = arith.constant 3 : index
      %103 = vector.load %arg7[%c0_101, %c12, %c3_102] : memref<1x22x22xf32, #tpu.memory_space<vmem>>, vector<1x1x16xf32>
      %104 = vector.shape_cast %103 : vector<1x1x16xf32> to vector<1x16xf32>
      %105 = vector.shape_cast %102 : vector<1x16xf32> to vector<1x1x16xf32>
      tpu.vector_store %arg7[%c0_101, %c12, %c3_102], %105 {strides = array<i32>} : memref<1x22x22xf32, #tpu.memory_space<vmem>>, vector<1x1x16xf32>,
      %c0_103 = arith.constant 0 : index
      %c144_104 = arith.constant 144 : index
      %106 = vector.load %arg6[%c0_103, %c144_104] : memref<1x256xf32, #tpu.memory_space<vmem>>, vector<1x16xf32>
      %c0_105 = arith.constant 0 : index
      %c12_106 = arith.constant 12 : index
      %c3_107 = arith.constant 3 : index
      %107 = vector.load %arg8[%c0_105, %c12_106, %c3_107] : memref<1x22x22xf32, #tpu.memory_space<vmem>>, vector<1x1x16xf32>
      %108 = vector.shape_cast %107 : vector<1x1x16xf32> to vector<1x16xf32>
      %109 = vector.shape_cast %106 : vector<1x16xf32> to vector<1x1x16xf32>
      tpu.vector_store %arg8[%c0_105, %c12_106, %c3_107], %109 {strides = array<i32>} : memref<1x22x22xf32, #tpu.memory_space<vmem>>, vector<1x1x16xf32>,
      %c0_108 = arith.constant 0 : index
      %c160 = arith.constant 160 : index
      %110 = vector.load %arg5[%c0_108, %c160] : memref<1x256xf32, #tpu.memory_space<vmem>>, vector<1x16xf32>
      %c0_109 = arith.constant 0 : index
      %c13 = arith.constant 13 : index
      %c3_110 = arith.constant 3 : index
      %111 = vector.load %arg7[%c0_109, %c13, %c3_110] : memref<1x22x22xf32, #tpu.memory_space<vmem>>, vector<1x1x16xf32>
      %112 = vector.shape_cast %111 : vector<1x1x16xf32> to vector<1x16xf32>
      %113 = vector.shape_cast %110 : vector<1x16xf32> to vector<1x1x16xf32>
      tpu.vector_store %arg7[%c0_109, %c13, %c3_110], %113 {strides = array<i32>} : memref<1x22x22xf32, #tpu.memory_space<vmem>>, vector<1x1x16xf32>,
      %c0_111 = arith.constant 0 : index
      %c160_112 = arith.constant 160 : index
      %114 = vector.load %arg6[%c0_111, %c160_112] : memref<1x256xf32, #tpu.memory_space<vmem>>, vector<1x16xf32>
      %c0_113 = arith.constant 0 : index
      %c13_114 = arith.constant 13 : index
      %c3_115 = arith.constant 3 : index
      %115 = vector.load %arg8[%c0_113, %c13_114, %c3_115] : memref<1x22x22xf32, #tpu.memory_space<vmem>>, vector<1x1x16xf32>
      %116 = vector.shape_cast %115 : vector<1x1x16xf32> to vector<1x16xf32>
      %117 = vector.shape_cast %114 : vector<1x16xf32> to vector<1x1x16xf32>
      tpu.vector_store %arg8[%c0_113, %c13_114, %c3_115], %117 {strides = array<i32>} : memref<1x22x22xf32, #tpu.memory_space<vmem>>, vector<1x1x16xf32>,
      %c0_116 = arith.constant 0 : index
      %c176 = arith.constant 176 : index
      %118 = vector.load %arg5[%c0_116, %c176] : memref<1x256xf32, #tpu.memory_space<vmem>>, vector<1x16xf32>
      %c0_117 = arith.constant 0 : index
      %c14 = arith.constant 14 : index
      %c3_118 = arith.constant 3 : index
      %119 = vector.load %arg7[%c0_117, %c14, %c3_118] : memref<1x22x22xf32, #tpu.memory_space<vmem>>, vector<1x1x16xf32>
      %120 = vector.shape_cast %119 : vector<1x1x16xf32> to vector<1x16xf32>
      %121 = vector.shape_cast %118 : vector<1x16xf32> to vector<1x1x16xf32>
      tpu.vector_store %arg7[%c0_117, %c14, %c3_118], %121 {strides = array<i32>} : memref<1x22x22xf32, #tpu.memory_space<vmem>>, vector<1x1x16xf32>,
      %c0_119 = arith.constant 0 : index
      %c176_120 = arith.constant 176 : index
      %122 = vector.load %arg6[%c0_119, %c176_120] : memref<1x256xf32, #tpu.memory_space<vmem>>, vector<1x16xf32>
      %c0_121 = arith.constant 0 : index
      %c14_122 = arith.constant 14 : index
      %c3_123 = arith.constant 3 : index
      %123 = vector.load %arg8[%c0_121, %c14_122, %c3_123] : memref<1x22x22xf32, #tpu.memory_space<vmem>>, vector<1x1x16xf32>
      %124 = vector.shape_cast %123 : vector<1x1x16xf32> to vector<1x16xf32>
      %125 = vector.shape_cast %122 : vector<1x16xf32> to vector<1x1x16xf32>
      tpu.vector_store %arg8[%c0_121, %c14_122, %c3_123], %125 {strides = array<i32>} : memref<1x22x22xf32, #tpu.memory_space<vmem>>, vector<1x1x16xf32>,
      %c0_124 = arith.constant 0 : index
      %c192 = arith.constant 192 : index
      %126 = vector.load %arg5[%c0_124, %c192] : memref<1x256xf32, #tpu.memory_space<vmem>>, vector<1x16xf32>
      %c0_125 = arith.constant 0 : index
      %c15 = arith.constant 15 : index
      %c3_126 = arith.constant 3 : index
      %127 = vector.load %arg7[%c0_125, %c15, %c3_126] : memref<1x22x22xf32, #tpu.memory_space<vmem>>, vector<1x1x16xf32>
      %128 = vector.shape_cast %127 : vector<1x1x16xf32> to vector<1x16xf32>
      %129 = vector.shape_cast %126 : vector<1x16xf32> to vector<1x1x16xf32>
      tpu.vector_store %arg7[%c0_125, %c15, %c3_126], %129 {strides = array<i32>} : memref<1x22x22xf32, #tpu.memory_space<vmem>>, vector<1x1x16xf32>,
      %c0_127 = arith.constant 0 : index
      %c192_128 = arith.constant 192 : index
      %130 = vector.load %arg6[%c0_127, %c192_128] : memref<1x256xf32, #tpu.memory_space<vmem>>, vector<1x16xf32>
      %c0_129 = arith.constant 0 : index
      %c15_130 = arith.constant 15 : index
      %c3_131 = arith.constant 3 : index
      %131 = vector.load %arg8[%c0_129, %c15_130, %c3_131] : memref<1x22x22xf32, #tpu.memory_space<vmem>>, vector<1x1x16xf32>
      %132 = vector.shape_cast %131 : vector<1x1x16xf32> to vector<1x16xf32>
      %133 = vector.shape_cast %130 : vector<1x16xf32> to vector<1x1x16xf32>
      tpu.vector_store %arg8[%c0_129, %c15_130, %c3_131], %133 {strides = array<i32>} : memref<1x22x22xf32, #tpu.memory_space<vmem>>, vector<1x1x16xf32>,
      %c0_132 = arith.constant 0 : index
      %c208 = arith.constant 208 : index
      %134 = vector.load %arg5[%c0_132, %c208] : memref<1x256xf32, #tpu.memory_space<vmem>>, vector<1x16xf32>
      %c0_133 = arith.constant 0 : index
      %c16_134 = arith.constant 16 : index
      %c3_135 = arith.constant 3 : index
      %135 = vector.load %arg7[%c0_133, %c16_134, %c3_135] : memref<1x22x22xf32, #tpu.memory_space<vmem>>, vector<1x1x16xf32>
      %136 = vector.shape_cast %135 : vector<1x1x16xf32> to vector<1x16xf32>
      %137 = vector.shape_cast %134 : vector<1x16xf32> to vector<1x1x16xf32>
      tpu.vector_store %arg7[%c0_133, %c16_134, %c3_135], %137 {strides = array<i32>} : memref<1x22x22xf32, #tpu.memory_space<vmem>>, vector<1x1x16xf32>,
      %c0_136 = arith.constant 0 : index
      %c208_137 = arith.constant 208 : index
      %138 = vector.load %arg6[%c0_136, %c208_137] : memref<1x256xf32, #tpu.memory_space<vmem>>, vector<1x16xf32>
      %c0_138 = arith.constant 0 : index
      %c16_139 = arith.constant 16 : index
      %c3_140 = arith.constant 3 : index
      %139 = vector.load %arg8[%c0_138, %c16_139, %c3_140] : memref<1x22x22xf32, #tpu.memory_space<vmem>>, vector<1x1x16xf32>
      %140 = vector.shape_cast %139 : vector<1x1x16xf32> to vector<1x16xf32>
      %141 = vector.shape_cast %138 : vector<1x16xf32> to vector<1x1x16xf32>
      tpu.vector_store %arg8[%c0_138, %c16_139, %c3_140], %141 {strides = array<i32>} : memref<1x22x22xf32, #tpu.memory_space<vmem>>, vector<1x1x16xf32>,
      %c0_141 = arith.constant 0 : index
      %c224 = arith.constant 224 : index
      %142 = vector.load %arg5[%c0_141, %c224] : memref<1x256xf32, #tpu.memory_space<vmem>>, vector<1x16xf32>
      %c0_142 = arith.constant 0 : index
      %c17 = arith.constant 17 : index
      %c3_143 = arith.constant 3 : index
      %143 = vector.load %arg7[%c0_142, %c17, %c3_143] : memref<1x22x22xf32, #tpu.memory_space<vmem>>, vector<1x1x16xf32>
      %144 = vector.shape_cast %143 : vector<1x1x16xf32> to vector<1x16xf32>
      %145 = vector.shape_cast %142 : vector<1x16xf32> to vector<1x1x16xf32>
      tpu.vector_store %arg7[%c0_142, %c17, %c3_143], %145 {strides = array<i32>} : memref<1x22x22xf32, #tpu.memory_space<vmem>>, vector<1x1x16xf32>,
      %c0_144 = arith.constant 0 : index
      %c224_145 = arith.constant 224 : index
      %146 = vector.load %arg6[%c0_144, %c224_145] : memref<1x256xf32, #tpu.memory_space<vmem>>, vector<1x16xf32>
      %c0_146 = arith.constant 0 : index
      %c17_147 = arith.constant 17 : index
      %c3_148 = arith.constant 3 : index
      %147 = vector.load %arg8[%c0_146, %c17_147, %c3_148] : memref<1x22x22xf32, #tpu.memory_space<vmem>>, vector<1x1x16xf32>
      %148 = vector.shape_cast %147 : vector<1x1x16xf32> to vector<1x16xf32>
      %149 = vector.shape_cast %146 : vector<1x16xf32> to vector<1x1x16xf32>
      tpu.vector_store %arg8[%c0_146, %c17_147, %c3_148], %149 {strides = array<i32>} : memref<1x22x22xf32, #tpu.memory_space<vmem>>, vector<1x1x16xf32>,
      %c0_149 = arith.constant 0 : index
      %c240 = arith.constant 240 : index
      %150 = vector.load %arg5[%c0_149, %c240] : memref<1x256xf32, #tpu.memory_space<vmem>>, vector<1x16xf32>
      %c0_150 = arith.constant 0 : index
      %c18 = arith.constant 18 : index
      %c3_151 = arith.constant 3 : index
      %151 = vector.load %arg7[%c0_150, %c18, %c3_151] : memref<1x22x22xf32, #tpu.memory_space<vmem>>, vector<1x1x16xf32>
      %152 = vector.shape_cast %151 : vector<1x1x16xf32> to vector<1x16xf32>
      %153 = vector.shape_cast %150 : vector<1x16xf32> to vector<1x1x16xf32>
      tpu.vector_store %arg7[%c0_150, %c18, %c3_151], %153 {strides = array<i32>} : memref<1x22x22xf32, #tpu.memory_space<vmem>>, vector<1x1x16xf32>,
      %c0_152 = arith.constant 0 : index
      %c240_153 = arith.constant 240 : index
      %154 = vector.load %arg6[%c0_152, %c240_153] : memref<1x256xf32, #tpu.memory_space<vmem>>, vector<1x16xf32>
      %c0_154 = arith.constant 0 : index
      %c18_155 = arith.constant 18 : index
      %c3_156 = arith.constant 3 : index
      %155 = vector.load %arg8[%c0_154, %c18_155, %c3_156] : memref<1x22x22xf32, #tpu.memory_space<vmem>>, vector<1x1x16xf32>
      %156 = vector.shape_cast %155 : vector<1x1x16xf32> to vector<1x16xf32>
      %157 = vector.shape_cast %154 : vector<1x16xf32> to vector<1x1x16xf32>
      tpu.vector_store %arg8[%c0_154, %c18_155, %c3_156], %157 {strides = array<i32>} : memref<1x22x22xf32, #tpu.memory_space<vmem>>, vector<1x1x16xf32>,
      %c0_157 = arith.constant 0 : index
      %c0_158 = arith.constant 0 : index
      %c0_159 = arith.constant 0 : index
      %158 = vector.load %arg7[%c0_157, %c0_158, %c0_159] : memref<1x22x22xf32, #tpu.memory_space<vmem>>, vector<1x22x22xf32>
      %c0_160 = arith.constant 0 : index
      %c0_161 = arith.constant 0 : index
      %c0_162 = arith.constant 0 : index
      %159 = vector.load %arg8[%c0_160, %c0_161, %c0_162] : memref<1x22x22xf32, #tpu.memory_space<vmem>>, vector<1x22x22xf32>
      %cst_163 = arith.constant 0.000000e+00 : f32
      %160 = vector.broadcast %cst_163 : f32 to vector<1x16x16xf32>
      %161 = vector.extract_strided_slice %158 {offsets = [0, 0, 0], sizes = [1, 22, 16], strides = [1, 1, 1]} : vector<1x22x22xf32> to vector<1x22x16xf32>
      %162 = vector.extract_strided_slice %159 {offsets = [0, 0, 0], sizes = [1, 22, 16], strides = [1, 1, 1]} : vector<1x22x22xf32> to vector<1x22x16xf32>
      %c0_164 = arith.constant 0 : index
      %163 = memref.load %arg3[%c0_164] : memref<98xf32, #tpu.memory_space<smem>>
      %c49 = arith.constant 49 : index
      %164 = memref.load %arg3[%c49] : memref<98xf32, #tpu.memory_space<smem>>
      %165 = vector.extract_strided_slice %161 {offsets = [0, 0, 0], sizes = [1, 16, 16], strides = [1, 1, 1]} : vector<1x22x16xf32> to vector<1x16x16xf32>
      %166 = vector.broadcast %163 : f32 to vector<1x16x16xf32>
      %167 = arith.mulf %166, %165 : vector<1x16x16xf32>
      %168 = arith.addf %160, %167 : vector<1x16x16xf32>
      %169 = vector.extract_strided_slice %162 {offsets = [0, 0, 0], sizes = [1, 16, 16], strides = [1, 1, 1]} : vector<1x22x16xf32> to vector<1x16x16xf32>
      %170 = vector.broadcast %164 : f32 to vector<1x16x16xf32>
      %171 = arith.mulf %170, %169 : vector<1x16x16xf32>
      %172 = arith.addf %168, %171 : vector<1x16x16xf32>
      %c7_165 = arith.constant 7 : index
      %173 = memref.load %arg3[%c7_165] : memref<98xf32, #tpu.memory_space<smem>>
      %c56 = arith.constant 56 : index
      %174 = memref.load %arg3[%c56] : memref<98xf32, #tpu.memory_space<smem>>
      %175 = vector.extract_strided_slice %161 {offsets = [0, 1, 0], sizes = [1, 16, 16], strides = [1, 1, 1]} : vector<1x22x16xf32> to vector<1x16x16xf32>
      %176 = vector.broadcast %173 : f32 to vector<1x16x16xf32>
      %177 = arith.mulf %176, %175 : vector<1x16x16xf32>
      %178 = arith.addf %172, %177 : vector<1x16x16xf32>
      %179 = vector.extract_strided_slice %162 {offsets = [0, 1, 0], sizes = [1, 16, 16], strides = [1, 1, 1]} : vector<1x22x16xf32> to vector<1x16x16xf32>
      %180 = vector.broadcast %174 : f32 to vector<1x16x16xf32>
      %181 = arith.mulf %180, %179 : vector<1x16x16xf32>
      %182 = arith.addf %178, %181 : vector<1x16x16xf32>
      %c14_166 = arith.constant 14 : index
      %183 = memref.load %arg3[%c14_166] : memref<98xf32, #tpu.memory_space<smem>>
      %c63 = arith.constant 63 : index
      %184 = memref.load %arg3[%c63] : memref<98xf32, #tpu.memory_space<smem>>
      %185 = vector.extract_strided_slice %161 {offsets = [0, 2, 0], sizes = [1, 16, 16], strides = [1, 1, 1]} : vector<1x22x16xf32> to vector<1x16x16xf32>
      %186 = vector.broadcast %183 : f32 to vector<1x16x16xf32>
      %187 = arith.mulf %186, %185 : vector<1x16x16xf32>
      %188 = arith.addf %182, %187 : vector<1x16x16xf32>
      %189 = vector.extract_strided_slice %162 {offsets = [0, 2, 0], sizes = [1, 16, 16], strides = [1, 1, 1]} : vector<1x22x16xf32> to vector<1x16x16xf32>
      %190 = vector.broadcast %184 : f32 to vector<1x16x16xf32>
      %191 = arith.mulf %190, %189 : vector<1x16x16xf32>
      %192 = arith.addf %188, %191 : vector<1x16x16xf32>
      %c21 = arith.constant 21 : index
      %193 = memref.load %arg3[%c21] : memref<98xf32, #tpu.memory_space<smem>>
      %c70 = arith.constant 70 : index
      %194 = memref.load %arg3[%c70] : memref<98xf32, #tpu.memory_space<smem>>
      %195 = vector.extract_strided_slice %161 {offsets = [0, 3, 0], sizes = [1, 16, 16], strides = [1, 1, 1]} : vector<1x22x16xf32> to vector<1x16x16xf32>
      %196 = vector.broadcast %193 : f32 to vector<1x16x16xf32>
      %197 = arith.mulf %196, %195 : vector<1x16x16xf32>
      %198 = arith.addf %192, %197 : vector<1x16x16xf32>
      %199 = vector.extract_strided_slice %162 {offsets = [0, 3, 0], sizes = [1, 16, 16], strides = [1, 1, 1]} : vector<1x22x16xf32> to vector<1x16x16xf32>
      %200 = vector.broadcast %194 : f32 to vector<1x16x16xf32>
      %201 = arith.mulf %200, %199 : vector<1x16x16xf32>
      %202 = arith.addf %198, %201 : vector<1x16x16xf32>
      %c28 = arith.constant 28 : index
      %203 = memref.load %arg3[%c28] : memref<98xf32, #tpu.memory_space<smem>>
      %c77 = arith.constant 77 : index
      %204 = memref.load %arg3[%c77] : memref<98xf32, #tpu.memory_space<smem>>
      %205 = vector.extract_strided_slice %161 {offsets = [0, 4, 0], sizes = [1, 16, 16], strides = [1, 1, 1]} : vector<1x22x16xf32> to vector<1x16x16xf32>
      %206 = vector.broadcast %203 : f32 to vector<1x16x16xf32>
      %207 = arith.mulf %206, %205 : vector<1x16x16xf32>
      %208 = arith.addf %202, %207 : vector<1x16x16xf32>
      %209 = vector.extract_strided_slice %162 {offsets = [0, 4, 0], sizes = [1, 16, 16], strides = [1, 1, 1]} : vector<1x22x16xf32> to vector<1x16x16xf32>
      %210 = vector.broadcast %204 : f32 to vector<1x16x16xf32>
      %211 = arith.mulf %210, %209 : vector<1x16x16xf32>
      %212 = arith.addf %208, %211 : vector<1x16x16xf32>
      %c35 = arith.constant 35 : index
      %213 = memref.load %arg3[%c35] : memref<98xf32, #tpu.memory_space<smem>>
      %c84 = arith.constant 84 : index
      %214 = memref.load %arg3[%c84] : memref<98xf32, #tpu.memory_space<smem>>
      %215 = vector.extract_strided_slice %161 {offsets = [0, 5, 0], sizes = [1, 16, 16], strides = [1, 1, 1]} : vector<1x22x16xf32> to vector<1x16x16xf32>
      %216 = vector.broadcast %213 : f32 to vector<1x16x16xf32>
      %217 = arith.mulf %216, %215 : vector<1x16x16xf32>
      %218 = arith.addf %212, %217 : vector<1x16x16xf32>
      %219 = vector.extract_strided_slice %162 {offsets = [0, 5, 0], sizes = [1, 16, 16], strides = [1, 1, 1]} : vector<1x22x16xf32> to vector<1x16x16xf32>
      %220 = vector.broadcast %214 : f32 to vector<1x16x16xf32>
      %221 = arith.mulf %220, %219 : vector<1x16x16xf32>
      %222 = arith.addf %218, %221 : vector<1x16x16xf32>
      %c42 = arith.constant 42 : index
      %223 = memref.load %arg3[%c42] : memref<98xf32, #tpu.memory_space<smem>>
      %c91 = arith.constant 91 : index
      %224 = memref.load %arg3[%c91] : memref<98xf32, #tpu.memory_space<smem>>
      %225 = vector.extract_strided_slice %161 {offsets = [0, 6, 0], sizes = [1, 16, 16], strides = [1, 1, 1]} : vector<1x22x16xf32> to vector<1x16x16xf32>
      %226 = vector.broadcast %223 : f32 to vector<1x16x16xf32>
      %227 = arith.mulf %226, %225 : vector<1x16x16xf32>
      %228 = arith.addf %222, %227 : vector<1x16x16xf32>
      %229 = vector.extract_strided_slice %162 {offsets = [0, 6, 0], sizes = [1, 16, 16], strides = [1, 1, 1]} : vector<1x22x16xf32> to vector<1x16x16xf32>
      %230 = vector.broadcast %224 : f32 to vector<1x16x16xf32>
      %231 = arith.mulf %230, %229 : vector<1x16x16xf32>
      %232 = arith.addf %228, %231 : vector<1x16x16xf32>
      %233 = vector.extract_strided_slice %158 {offsets = [0, 0, 1], sizes = [1, 22, 16], strides = [1, 1, 1]} : vector<1x22x22xf32> to vector<1x22x16xf32>
      %234 = vector.extract_strided_slice %159 {offsets = [0, 0, 1], sizes = [1, 22, 16], strides = [1, 1, 1]} : vector<1x22x22xf32> to vector<1x22x16xf32>
      %c1_167 = arith.constant 1 : index
      %235 = memref.load %arg3[%c1_167] : memref<98xf32, #tpu.memory_space<smem>>
      %c50 = arith.constant 50 : index
      %236 = memref.load %arg3[%c50] : memref<98xf32, #tpu.memory_space<smem>>
      %237 = vector.extract_strided_slice %233 {offsets = [0, 0, 0], sizes = [1, 16, 16], strides = [1, 1, 1]} : vector<1x22x16xf32> to vector<1x16x16xf32>
      %238 = vector.broadcast %235 : f32 to vector<1x16x16xf32>
      %239 = arith.mulf %238, %237 : vector<1x16x16xf32>
      %240 = arith.addf %232, %239 : vector<1x16x16xf32>
      %241 = vector.extract_strided_slice %234 {offsets = [0, 0, 0], sizes = [1, 16, 16], strides = [1, 1, 1]} : vector<1x22x16xf32> to vector<1x16x16xf32>
      %242 = vector.broadcast %236 : f32 to vector<1x16x16xf32>
      %243 = arith.mulf %242, %241 : vector<1x16x16xf32>
      %244 = arith.addf %240, %243 : vector<1x16x16xf32>
      %c8_168 = arith.constant 8 : index
      %245 = memref.load %arg3[%c8_168] : memref<98xf32, #tpu.memory_space<smem>>
      %c57 = arith.constant 57 : index
      %246 = memref.load %arg3[%c57] : memref<98xf32, #tpu.memory_space<smem>>
      %247 = vector.extract_strided_slice %233 {offsets = [0, 1, 0], sizes = [1, 16, 16], strides = [1, 1, 1]} : vector<1x22x16xf32> to vector<1x16x16xf32>
      %248 = vector.broadcast %245 : f32 to vector<1x16x16xf32>
      %249 = arith.mulf %248, %247 : vector<1x16x16xf32>
      %250 = arith.addf %244, %249 : vector<1x16x16xf32>
      %251 = vector.extract_strided_slice %234 {offsets = [0, 1, 0], sizes = [1, 16, 16], strides = [1, 1, 1]} : vector<1x22x16xf32> to vector<1x16x16xf32>
      %252 = vector.broadcast %246 : f32 to vector<1x16x16xf32>
      %253 = arith.mulf %252, %251 : vector<1x16x16xf32>
      %254 = arith.addf %250, %253 : vector<1x16x16xf32>
      %c15_169 = arith.constant 15 : index
      %255 = memref.load %arg3[%c15_169] : memref<98xf32, #tpu.memory_space<smem>>
      %c64_170 = arith.constant 64 : index
      %256 = memref.load %arg3[%c64_170] : memref<98xf32, #tpu.memory_space<smem>>
      %257 = vector.extract_strided_slice %233 {offsets = [0, 2, 0], sizes = [1, 16, 16], strides = [1, 1, 1]} : vector<1x22x16xf32> to vector<1x16x16xf32>
      %258 = vector.broadcast %255 : f32 to vector<1x16x16xf32>
      %259 = arith.mulf %258, %257 : vector<1x16x16xf32>
      %260 = arith.addf %254, %259 : vector<1x16x16xf32>
      %261 = vector.extract_strided_slice %234 {offsets = [0, 2, 0], sizes = [1, 16, 16], strides = [1, 1, 1]} : vector<1x22x16xf32> to vector<1x16x16xf32>
      %262 = vector.broadcast %256 : f32 to vector<1x16x16xf32>
      %263 = arith.mulf %262, %261 : vector<1x16x16xf32>
      %264 = arith.addf %260, %263 : vector<1x16x16xf32>
      %c22 = arith.constant 22 : index
      %265 = memref.load %arg3[%c22] : memref<98xf32, #tpu.memory_space<smem>>
      %c71 = arith.constant 71 : index
      %266 = memref.load %arg3[%c71] : memref<98xf32, #tpu.memory_space<smem>>
      %267 = vector.extract_strided_slice %233 {offsets = [0, 3, 0], sizes = [1, 16, 16], strides = [1, 1, 1]} : vector<1x22x16xf32> to vector<1x16x16xf32>
      %268 = vector.broadcast %265 : f32 to vector<1x16x16xf32>
      %269 = arith.mulf %268, %267 : vector<1x16x16xf32>
      %270 = arith.addf %264, %269 : vector<1x16x16xf32>
      %271 = vector.extract_strided_slice %234 {offsets = [0, 3, 0], sizes = [1, 16, 16], strides = [1, 1, 1]} : vector<1x22x16xf32> to vector<1x16x16xf32>
      %272 = vector.broadcast %266 : f32 to vector<1x16x16xf32>
      %273 = arith.mulf %272, %271 : vector<1x16x16xf32>
      %274 = arith.addf %270, %273 : vector<1x16x16xf32>
      %c29 = arith.constant 29 : index
      %275 = memref.load %arg3[%c29] : memref<98xf32, #tpu.memory_space<smem>>
      %c78 = arith.constant 78 : index
      %276 = memref.load %arg3[%c78] : memref<98xf32, #tpu.memory_space<smem>>
      %277 = vector.extract_strided_slice %233 {offsets = [0, 4, 0], sizes = [1, 16, 16], strides = [1, 1, 1]} : vector<1x22x16xf32> to vector<1x16x16xf32>
      %278 = vector.broadcast %275 : f32 to vector<1x16x16xf32>
      %279 = arith.mulf %278, %277 : vector<1x16x16xf32>
      %280 = arith.addf %274, %279 : vector<1x16x16xf32>
      %281 = vector.extract_strided_slice %234 {offsets = [0, 4, 0], sizes = [1, 16, 16], strides = [1, 1, 1]} : vector<1x22x16xf32> to vector<1x16x16xf32>
      %282 = vector.broadcast %276 : f32 to vector<1x16x16xf32>
      %283 = arith.mulf %282, %281 : vector<1x16x16xf32>
      %284 = arith.addf %280, %283 : vector<1x16x16xf32>
      %c36 = arith.constant 36 : index
      %285 = memref.load %arg3[%c36] : memref<98xf32, #tpu.memory_space<smem>>
      %c85 = arith.constant 85 : index
      %286 = memref.load %arg3[%c85] : memref<98xf32, #tpu.memory_space<smem>>
      %287 = vector.extract_strided_slice %233 {offsets = [0, 5, 0], sizes = [1, 16, 16], strides = [1, 1, 1]} : vector<1x22x16xf32> to vector<1x16x16xf32>
      %288 = vector.broadcast %285 : f32 to vector<1x16x16xf32>
      %289 = arith.mulf %288, %287 : vector<1x16x16xf32>
      %290 = arith.addf %284, %289 : vector<1x16x16xf32>
      %291 = vector.extract_strided_slice %234 {offsets = [0, 5, 0], sizes = [1, 16, 16], strides = [1, 1, 1]} : vector<1x22x16xf32> to vector<1x16x16xf32>
      %292 = vector.broadcast %286 : f32 to vector<1x16x16xf32>
      %293 = arith.mulf %292, %291 : vector<1x16x16xf32>
      %294 = arith.addf %290, %293 : vector<1x16x16xf32>
      %c43 = arith.constant 43 : index
      %295 = memref.load %arg3[%c43] : memref<98xf32, #tpu.memory_space<smem>>
      %c92 = arith.constant 92 : index
      %296 = memref.load %arg3[%c92] : memref<98xf32, #tpu.memory_space<smem>>
      %297 = vector.extract_strided_slice %233 {offsets = [0, 6, 0], sizes = [1, 16, 16], strides = [1, 1, 1]} : vector<1x22x16xf32> to vector<1x16x16xf32>
      %298 = vector.broadcast %295 : f32 to vector<1x16x16xf32>
      %299 = arith.mulf %298, %297 : vector<1x16x16xf32>
      %300 = arith.addf %294, %299 : vector<1x16x16xf32>
      %301 = vector.extract_strided_slice %234 {offsets = [0, 6, 0], sizes = [1, 16, 16], strides = [1, 1, 1]} : vector<1x22x16xf32> to vector<1x16x16xf32>
      %302 = vector.broadcast %296 : f32 to vector<1x16x16xf32>
      %303 = arith.mulf %302, %301 : vector<1x16x16xf32>
      %304 = arith.addf %300, %303 : vector<1x16x16xf32>
      %305 = vector.extract_strided_slice %158 {offsets = [0, 0, 2], sizes = [1, 22, 16], strides = [1, 1, 1]} : vector<1x22x22xf32> to vector<1x22x16xf32>
      %306 = vector.extract_strided_slice %159 {offsets = [0, 0, 2], sizes = [1, 22, 16], strides = [1, 1, 1]} : vector<1x22x22xf32> to vector<1x22x16xf32>
      %c2_171 = arith.constant 2 : index
      %307 = memref.load %arg3[%c2_171] : memref<98xf32, #tpu.memory_space<smem>>
      %c51 = arith.constant 51 : index
      %308 = memref.load %arg3[%c51] : memref<98xf32, #tpu.memory_space<smem>>
      %309 = vector.extract_strided_slice %305 {offsets = [0, 0, 0], sizes = [1, 16, 16], strides = [1, 1, 1]} : vector<1x22x16xf32> to vector<1x16x16xf32>
      %310 = vector.broadcast %307 : f32 to vector<1x16x16xf32>
      %311 = arith.mulf %310, %309 : vector<1x16x16xf32>
      %312 = arith.addf %304, %311 : vector<1x16x16xf32>
      %313 = vector.extract_strided_slice %306 {offsets = [0, 0, 0], sizes = [1, 16, 16], strides = [1, 1, 1]} : vector<1x22x16xf32> to vector<1x16x16xf32>
      %314 = vector.broadcast %308 : f32 to vector<1x16x16xf32>
      %315 = arith.mulf %314, %313 : vector<1x16x16xf32>
      %316 = arith.addf %312, %315 : vector<1x16x16xf32>
      %c9_172 = arith.constant 9 : index
      %317 = memref.load %arg3[%c9_172] : memref<98xf32, #tpu.memory_space<smem>>
      %c58 = arith.constant 58 : index
      %318 = memref.load %arg3[%c58] : memref<98xf32, #tpu.memory_space<smem>>
      %319 = vector.extract_strided_slice %305 {offsets = [0, 1, 0], sizes = [1, 16, 16], strides = [1, 1, 1]} : vector<1x22x16xf32> to vector<1x16x16xf32>
      %320 = vector.broadcast %317 : f32 to vector<1x16x16xf32>
      %321 = arith.mulf %320, %319 : vector<1x16x16xf32>
      %322 = arith.addf %316, %321 : vector<1x16x16xf32>
      %323 = vector.extract_strided_slice %306 {offsets = [0, 1, 0], sizes = [1, 16, 16], strides = [1, 1, 1]} : vector<1x22x16xf32> to vector<1x16x16xf32>
      %324 = vector.broadcast %318 : f32 to vector<1x16x16xf32>
      %325 = arith.mulf %324, %323 : vector<1x16x16xf32>
      %326 = arith.addf %322, %325 : vector<1x16x16xf32>
      %c16_173 = arith.constant 16 : index
      %327 = memref.load %arg3[%c16_173] : memref<98xf32, #tpu.memory_space<smem>>
      %c65 = arith.constant 65 : index
      %328 = memref.load %arg3[%c65] : memref<98xf32, #tpu.memory_space<smem>>
      %329 = vector.extract_strided_slice %305 {offsets = [0, 2, 0], sizes = [1, 16, 16], strides = [1, 1, 1]} : vector<1x22x16xf32> to vector<1x16x16xf32>
      %330 = vector.broadcast %327 : f32 to vector<1x16x16xf32>
      %331 = arith.mulf %330, %329 : vector<1x16x16xf32>
      %332 = arith.addf %326, %331 : vector<1x16x16xf32>
      %333 = vector.extract_strided_slice %306 {offsets = [0, 2, 0], sizes = [1, 16, 16], strides = [1, 1, 1]} : vector<1x22x16xf32> to vector<1x16x16xf32>
      %334 = vector.broadcast %328 : f32 to vector<1x16x16xf32>
      %335 = arith.mulf %334, %333 : vector<1x16x16xf32>
      %336 = arith.addf %332, %335 : vector<1x16x16xf32>
      %c23 = arith.constant 23 : index
      %337 = memref.load %arg3[%c23] : memref<98xf32, #tpu.memory_space<smem>>
      %c72 = arith.constant 72 : index
      %338 = memref.load %arg3[%c72] : memref<98xf32, #tpu.memory_space<smem>>
      %339 = vector.extract_strided_slice %305 {offsets = [0, 3, 0], sizes = [1, 16, 16], strides = [1, 1, 1]} : vector<1x22x16xf32> to vector<1x16x16xf32>
      %340 = vector.broadcast %337 : f32 to vector<1x16x16xf32>
      %341 = arith.mulf %340, %339 : vector<1x16x16xf32>
      %342 = arith.addf %336, %341 : vector<1x16x16xf32>
      %343 = vector.extract_strided_slice %306 {offsets = [0, 3, 0], sizes = [1, 16, 16], strides = [1, 1, 1]} : vector<1x22x16xf32> to vector<1x16x16xf32>
      %344 = vector.broadcast %338 : f32 to vector<1x16x16xf32>
      %345 = arith.mulf %344, %343 : vector<1x16x16xf32>
      %346 = arith.addf %342, %345 : vector<1x16x16xf32>
      %c30 = arith.constant 30 : index
      %347 = memref.load %arg3[%c30] : memref<98xf32, #tpu.memory_space<smem>>
      %c79 = arith.constant 79 : index
      %348 = memref.load %arg3[%c79] : memref<98xf32, #tpu.memory_space<smem>>
      %349 = vector.extract_strided_slice %305 {offsets = [0, 4, 0], sizes = [1, 16, 16], strides = [1, 1, 1]} : vector<1x22x16xf32> to vector<1x16x16xf32>
      %350 = vector.broadcast %347 : f32 to vector<1x16x16xf32>
      %351 = arith.mulf %350, %349 : vector<1x16x16xf32>
      %352 = arith.addf %346, %351 : vector<1x16x16xf32>
      %353 = vector.extract_strided_slice %306 {offsets = [0, 4, 0], sizes = [1, 16, 16], strides = [1, 1, 1]} : vector<1x22x16xf32> to vector<1x16x16xf32>
      %354 = vector.broadcast %348 : f32 to vector<1x16x16xf32>
      %355 = arith.mulf %354, %353 : vector<1x16x16xf32>
      %356 = arith.addf %352, %355 : vector<1x16x16xf32>
      %c37 = arith.constant 37 : index
      %357 = memref.load %arg3[%c37] : memref<98xf32, #tpu.memory_space<smem>>
      %c86 = arith.constant 86 : index
      %358 = memref.load %arg3[%c86] : memref<98xf32, #tpu.memory_space<smem>>
      %359 = vector.extract_strided_slice %305 {offsets = [0, 5, 0], sizes = [1, 16, 16], strides = [1, 1, 1]} : vector<1x22x16xf32> to vector<1x16x16xf32>
      %360 = vector.broadcast %357 : f32 to vector<1x16x16xf32>
      %361 = arith.mulf %360, %359 : vector<1x16x16xf32>
      %362 = arith.addf %356, %361 : vector<1x16x16xf32>
      %363 = vector.extract_strided_slice %306 {offsets = [0, 5, 0], sizes = [1, 16, 16], strides = [1, 1, 1]} : vector<1x22x16xf32> to vector<1x16x16xf32>
      %364 = vector.broadcast %358 : f32 to vector<1x16x16xf32>
      %365 = arith.mulf %364, %363 : vector<1x16x16xf32>
      %366 = arith.addf %362, %365 : vector<1x16x16xf32>
      %c44 = arith.constant 44 : index
      %367 = memref.load %arg3[%c44] : memref<98xf32, #tpu.memory_space<smem>>
      %c93 = arith.constant 93 : index
      %368 = memref.load %arg3[%c93] : memref<98xf32, #tpu.memory_space<smem>>
      %369 = vector.extract_strided_slice %305 {offsets = [0, 6, 0], sizes = [1, 16, 16], strides = [1, 1, 1]} : vector<1x22x16xf32> to vector<1x16x16xf32>
      %370 = vector.broadcast %367 : f32 to vector<1x16x16xf32>
      %371 = arith.mulf %370, %369 : vector<1x16x16xf32>
      %372 = arith.addf %366, %371 : vector<1x16x16xf32>
      %373 = vector.extract_strided_slice %306 {offsets = [0, 6, 0], sizes = [1, 16, 16], strides = [1, 1, 1]} : vector<1x22x16xf32> to vector<1x16x16xf32>
      %374 = vector.broadcast %368 : f32 to vector<1x16x16xf32>
      %375 = arith.mulf %374, %373 : vector<1x16x16xf32>
      %376 = arith.addf %372, %375 : vector<1x16x16xf32>
      %377 = vector.extract_strided_slice %158 {offsets = [0, 0, 3], sizes = [1, 22, 16], strides = [1, 1, 1]} : vector<1x22x22xf32> to vector<1x22x16xf32>
      %378 = vector.extract_strided_slice %159 {offsets = [0, 0, 3], sizes = [1, 22, 16], strides = [1, 1, 1]} : vector<1x22x22xf32> to vector<1x22x16xf32>
      %c3_174 = arith.constant 3 : index
      %379 = memref.load %arg3[%c3_174] : memref<98xf32, #tpu.memory_space<smem>>
      %c52 = arith.constant 52 : index
      %380 = memref.load %arg3[%c52] : memref<98xf32, #tpu.memory_space<smem>>
      %381 = vector.extract_strided_slice %377 {offsets = [0, 0, 0], sizes = [1, 16, 16], strides = [1, 1, 1]} : vector<1x22x16xf32> to vector<1x16x16xf32>
      %382 = vector.broadcast %379 : f32 to vector<1x16x16xf32>
      %383 = arith.mulf %382, %381 : vector<1x16x16xf32>
      %384 = arith.addf %376, %383 : vector<1x16x16xf32>
      %385 = vector.extract_strided_slice %378 {offsets = [0, 0, 0], sizes = [1, 16, 16], strides = [1, 1, 1]} : vector<1x22x16xf32> to vector<1x16x16xf32>
      %386 = vector.broadcast %380 : f32 to vector<1x16x16xf32>
      %387 = arith.mulf %386, %385 : vector<1x16x16xf32>
      %388 = arith.addf %384, %387 : vector<1x16x16xf32>
      %c10_175 = arith.constant 10 : index
      %389 = memref.load %arg3[%c10_175] : memref<98xf32, #tpu.memory_space<smem>>
      %c59 = arith.constant 59 : index
      %390 = memref.load %arg3[%c59] : memref<98xf32, #tpu.memory_space<smem>>
      %391 = vector.extract_strided_slice %377 {offsets = [0, 1, 0], sizes = [1, 16, 16], strides = [1, 1, 1]} : vector<1x22x16xf32> to vector<1x16x16xf32>
      %392 = vector.broadcast %389 : f32 to vector<1x16x16xf32>
      %393 = arith.mulf %392, %391 : vector<1x16x16xf32>
      %394 = arith.addf %388, %393 : vector<1x16x16xf32>
      %395 = vector.extract_strided_slice %378 {offsets = [0, 1, 0], sizes = [1, 16, 16], strides = [1, 1, 1]} : vector<1x22x16xf32> to vector<1x16x16xf32>
      %396 = vector.broadcast %390 : f32 to vector<1x16x16xf32>
      %397 = arith.mulf %396, %395 : vector<1x16x16xf32>
      %398 = arith.addf %394, %397 : vector<1x16x16xf32>
      %c17_176 = arith.constant 17 : index
      %399 = memref.load %arg3[%c17_176] : memref<98xf32, #tpu.memory_space<smem>>
      %c66 = arith.constant 66 : index
      %400 = memref.load %arg3[%c66] : memref<98xf32, #tpu.memory_space<smem>>
      %401 = vector.extract_strided_slice %377 {offsets = [0, 2, 0], sizes = [1, 16, 16], strides = [1, 1, 1]} : vector<1x22x16xf32> to vector<1x16x16xf32>
      %402 = vector.broadcast %399 : f32 to vector<1x16x16xf32>
      %403 = arith.mulf %402, %401 : vector<1x16x16xf32>
      %404 = arith.addf %398, %403 : vector<1x16x16xf32>
      %405 = vector.extract_strided_slice %378 {offsets = [0, 2, 0], sizes = [1, 16, 16], strides = [1, 1, 1]} : vector<1x22x16xf32> to vector<1x16x16xf32>
      %406 = vector.broadcast %400 : f32 to vector<1x16x16xf32>
      %407 = arith.mulf %406, %405 : vector<1x16x16xf32>
      %408 = arith.addf %404, %407 : vector<1x16x16xf32>
      %c24 = arith.constant 24 : index
      %409 = memref.load %arg3[%c24] : memref<98xf32, #tpu.memory_space<smem>>
      %c73 = arith.constant 73 : index
      %410 = memref.load %arg3[%c73] : memref<98xf32, #tpu.memory_space<smem>>
      %411 = vector.extract_strided_slice %377 {offsets = [0, 3, 0], sizes = [1, 16, 16], strides = [1, 1, 1]} : vector<1x22x16xf32> to vector<1x16x16xf32>
      %412 = vector.broadcast %409 : f32 to vector<1x16x16xf32>
      %413 = arith.mulf %412, %411 : vector<1x16x16xf32>
      %414 = arith.addf %408, %413 : vector<1x16x16xf32>
      %415 = vector.extract_strided_slice %378 {offsets = [0, 3, 0], sizes = [1, 16, 16], strides = [1, 1, 1]} : vector<1x22x16xf32> to vector<1x16x16xf32>
      %416 = vector.broadcast %410 : f32 to vector<1x16x16xf32>
      %417 = arith.mulf %416, %415 : vector<1x16x16xf32>
      %418 = arith.addf %414, %417 : vector<1x16x16xf32>
      %c31 = arith.constant 31 : index
      %419 = memref.load %arg3[%c31] : memref<98xf32, #tpu.memory_space<smem>>
      %c80_177 = arith.constant 80 : index
      %420 = memref.load %arg3[%c80_177] : memref<98xf32, #tpu.memory_space<smem>>
      %421 = vector.extract_strided_slice %377 {offsets = [0, 4, 0], sizes = [1, 16, 16], strides = [1, 1, 1]} : vector<1x22x16xf32> to vector<1x16x16xf32>
      %422 = vector.broadcast %419 : f32 to vector<1x16x16xf32>
      %423 = arith.mulf %422, %421 : vector<1x16x16xf32>
      %424 = arith.addf %418, %423 : vector<1x16x16xf32>
      %425 = vector.extract_strided_slice %378 {offsets = [0, 4, 0], sizes = [1, 16, 16], strides = [1, 1, 1]} : vector<1x22x16xf32> to vector<1x16x16xf32>
      %426 = vector.broadcast %420 : f32 to vector<1x16x16xf32>
      %427 = arith.mulf %426, %425 : vector<1x16x16xf32>
      %428 = arith.addf %424, %427 : vector<1x16x16xf32>
      %c38 = arith.constant 38 : index
      %429 = memref.load %arg3[%c38] : memref<98xf32, #tpu.memory_space<smem>>
      %c87 = arith.constant 87 : index
      %430 = memref.load %arg3[%c87] : memref<98xf32, #tpu.memory_space<smem>>
      %431 = vector.extract_strided_slice %377 {offsets = [0, 5, 0], sizes = [1, 16, 16], strides = [1, 1, 1]} : vector<1x22x16xf32> to vector<1x16x16xf32>
      %432 = vector.broadcast %429 : f32 to vector<1x16x16xf32>
      %433 = arith.mulf %432, %431 : vector<1x16x16xf32>
      %434 = arith.addf %428, %433 : vector<1x16x16xf32>
      %435 = vector.extract_strided_slice %378 {offsets = [0, 5, 0], sizes = [1, 16, 16], strides = [1, 1, 1]} : vector<1x22x16xf32> to vector<1x16x16xf32>
      %436 = vector.broadcast %430 : f32 to vector<1x16x16xf32>
      %437 = arith.mulf %436, %435 : vector<1x16x16xf32>
      %438 = arith.addf %434, %437 : vector<1x16x16xf32>
      %c45 = arith.constant 45 : index
      %439 = memref.load %arg3[%c45] : memref<98xf32, #tpu.memory_space<smem>>
      %c94 = arith.constant 94 : index
      %440 = memref.load %arg3[%c94] : memref<98xf32, #tpu.memory_space<smem>>
      %441 = vector.extract_strided_slice %377 {offsets = [0, 6, 0], sizes = [1, 16, 16], strides = [1, 1, 1]} : vector<1x22x16xf32> to vector<1x16x16xf32>
      %442 = vector.broadcast %439 : f32 to vector<1x16x16xf32>
      %443 = arith.mulf %442, %441 : vector<1x16x16xf32>
      %444 = arith.addf %438, %443 : vector<1x16x16xf32>
      %445 = vector.extract_strided_slice %378 {offsets = [0, 6, 0], sizes = [1, 16, 16], strides = [1, 1, 1]} : vector<1x22x16xf32> to vector<1x16x16xf32>
      %446 = vector.broadcast %440 : f32 to vector<1x16x16xf32>
      %447 = arith.mulf %446, %445 : vector<1x16x16xf32>
      %448 = arith.addf %444, %447 : vector<1x16x16xf32>
      %449 = vector.extract_strided_slice %158 {offsets = [0, 0, 4], sizes = [1, 22, 16], strides = [1, 1, 1]} : vector<1x22x22xf32> to vector<1x22x16xf32>
      %450 = vector.extract_strided_slice %159 {offsets = [0, 0, 4], sizes = [1, 22, 16], strides = [1, 1, 1]} : vector<1x22x22xf32> to vector<1x22x16xf32>
      %c4_178 = arith.constant 4 : index
      %451 = memref.load %arg3[%c4_178] : memref<98xf32, #tpu.memory_space<smem>>
      %c53 = arith.constant 53 : index
      %452 = memref.load %arg3[%c53] : memref<98xf32, #tpu.memory_space<smem>>
      %453 = vector.extract_strided_slice %449 {offsets = [0, 0, 0], sizes = [1, 16, 16], strides = [1, 1, 1]} : vector<1x22x16xf32> to vector<1x16x16xf32>
      %454 = vector.broadcast %451 : f32 to vector<1x16x16xf32>
      %455 = arith.mulf %454, %453 : vector<1x16x16xf32>
      %456 = arith.addf %448, %455 : vector<1x16x16xf32>
      %457 = vector.extract_strided_slice %450 {offsets = [0, 0, 0], sizes = [1, 16, 16], strides = [1, 1, 1]} : vector<1x22x16xf32> to vector<1x16x16xf32>
      %458 = vector.broadcast %452 : f32 to vector<1x16x16xf32>
      %459 = arith.mulf %458, %457 : vector<1x16x16xf32>
      %460 = arith.addf %456, %459 : vector<1x16x16xf32>
      %c11_179 = arith.constant 11 : index
      %461 = memref.load %arg3[%c11_179] : memref<98xf32, #tpu.memory_space<smem>>
      %c60 = arith.constant 60 : index
      %462 = memref.load %arg3[%c60] : memref<98xf32, #tpu.memory_space<smem>>
      %463 = vector.extract_strided_slice %449 {offsets = [0, 1, 0], sizes = [1, 16, 16], strides = [1, 1, 1]} : vector<1x22x16xf32> to vector<1x16x16xf32>
      %464 = vector.broadcast %461 : f32 to vector<1x16x16xf32>
      %465 = arith.mulf %464, %463 : vector<1x16x16xf32>
      %466 = arith.addf %460, %465 : vector<1x16x16xf32>
      %467 = vector.extract_strided_slice %450 {offsets = [0, 1, 0], sizes = [1, 16, 16], strides = [1, 1, 1]} : vector<1x22x16xf32> to vector<1x16x16xf32>
      %468 = vector.broadcast %462 : f32 to vector<1x16x16xf32>
      %469 = arith.mulf %468, %467 : vector<1x16x16xf32>
      %470 = arith.addf %466, %469 : vector<1x16x16xf32>
      %c18_180 = arith.constant 18 : index
      %471 = memref.load %arg3[%c18_180] : memref<98xf32, #tpu.memory_space<smem>>
      %c67 = arith.constant 67 : index
      %472 = memref.load %arg3[%c67] : memref<98xf32, #tpu.memory_space<smem>>
      %473 = vector.extract_strided_slice %449 {offsets = [0, 2, 0], sizes = [1, 16, 16], strides = [1, 1, 1]} : vector<1x22x16xf32> to vector<1x16x16xf32>
      %474 = vector.broadcast %471 : f32 to vector<1x16x16xf32>
      %475 = arith.mulf %474, %473 : vector<1x16x16xf32>
      %476 = arith.addf %470, %475 : vector<1x16x16xf32>
      %477 = vector.extract_strided_slice %450 {offsets = [0, 2, 0], sizes = [1, 16, 16], strides = [1, 1, 1]} : vector<1x22x16xf32> to vector<1x16x16xf32>
      %478 = vector.broadcast %472 : f32 to vector<1x16x16xf32>
      %479 = arith.mulf %478, %477 : vector<1x16x16xf32>
      %480 = arith.addf %476, %479 : vector<1x16x16xf32>
      %c25 = arith.constant 25 : index
      %481 = memref.load %arg3[%c25] : memref<98xf32, #tpu.memory_space<smem>>
      %c74 = arith.constant 74 : index
      %482 = memref.load %arg3[%c74] : memref<98xf32, #tpu.memory_space<smem>>
      %483 = vector.extract_strided_slice %449 {offsets = [0, 3, 0], sizes = [1, 16, 16], strides = [1, 1, 1]} : vector<1x22x16xf32> to vector<1x16x16xf32>
      %484 = vector.broadcast %481 : f32 to vector<1x16x16xf32>
      %485 = arith.mulf %484, %483 : vector<1x16x16xf32>
      %486 = arith.addf %480, %485 : vector<1x16x16xf32>
      %487 = vector.extract_strided_slice %450 {offsets = [0, 3, 0], sizes = [1, 16, 16], strides = [1, 1, 1]} : vector<1x22x16xf32> to vector<1x16x16xf32>
      %488 = vector.broadcast %482 : f32 to vector<1x16x16xf32>
      %489 = arith.mulf %488, %487 : vector<1x16x16xf32>
      %490 = arith.addf %486, %489 : vector<1x16x16xf32>
      %c32_181 = arith.constant 32 : index
      %491 = memref.load %arg3[%c32_181] : memref<98xf32, #tpu.memory_space<smem>>
      %c81 = arith.constant 81 : index
      %492 = memref.load %arg3[%c81] : memref<98xf32, #tpu.memory_space<smem>>
      %493 = vector.extract_strided_slice %449 {offsets = [0, 4, 0], sizes = [1, 16, 16], strides = [1, 1, 1]} : vector<1x22x16xf32> to vector<1x16x16xf32>
      %494 = vector.broadcast %491 : f32 to vector<1x16x16xf32>
      %495 = arith.mulf %494, %493 : vector<1x16x16xf32>
      %496 = arith.addf %490, %495 : vector<1x16x16xf32>
      %497 = vector.extract_strided_slice %450 {offsets = [0, 4, 0], sizes = [1, 16, 16], strides = [1, 1, 1]} : vector<1x22x16xf32> to vector<1x16x16xf32>
      %498 = vector.broadcast %492 : f32 to vector<1x16x16xf32>
      %499 = arith.mulf %498, %497 : vector<1x16x16xf32>
      %500 = arith.addf %496, %499 : vector<1x16x16xf32>
      %c39 = arith.constant 39 : index
      %501 = memref.load %arg3[%c39] : memref<98xf32, #tpu.memory_space<smem>>
      %c88 = arith.constant 88 : index
      %502 = memref.load %arg3[%c88] : memref<98xf32, #tpu.memory_space<smem>>
      %503 = vector.extract_strided_slice %449 {offsets = [0, 5, 0], sizes = [1, 16, 16], strides = [1, 1, 1]} : vector<1x22x16xf32> to vector<1x16x16xf32>
      %504 = vector.broadcast %501 : f32 to vector<1x16x16xf32>
      %505 = arith.mulf %504, %503 : vector<1x16x16xf32>
      %506 = arith.addf %500, %505 : vector<1x16x16xf32>
      %507 = vector.extract_strided_slice %450 {offsets = [0, 5, 0], sizes = [1, 16, 16], strides = [1, 1, 1]} : vector<1x22x16xf32> to vector<1x16x16xf32>
      %508 = vector.broadcast %502 : f32 to vector<1x16x16xf32>
      %509 = arith.mulf %508, %507 : vector<1x16x16xf32>
      %510 = arith.addf %506, %509 : vector<1x16x16xf32>
      %c46 = arith.constant 46 : index
      %511 = memref.load %arg3[%c46] : memref<98xf32, #tpu.memory_space<smem>>
      %c95 = arith.constant 95 : index
      %512 = memref.load %arg3[%c95] : memref<98xf32, #tpu.memory_space<smem>>
      %513 = vector.extract_strided_slice %449 {offsets = [0, 6, 0], sizes = [1, 16, 16], strides = [1, 1, 1]} : vector<1x22x16xf32> to vector<1x16x16xf32>
      %514 = vector.broadcast %511 : f32 to vector<1x16x16xf32>
      %515 = arith.mulf %514, %513 : vector<1x16x16xf32>
      %516 = arith.addf %510, %515 : vector<1x16x16xf32>
      %517 = vector.extract_strided_slice %450 {offsets = [0, 6, 0], sizes = [1, 16, 16], strides = [1, 1, 1]} : vector<1x22x16xf32> to vector<1x16x16xf32>
      %518 = vector.broadcast %512 : f32 to vector<1x16x16xf32>
      %519 = arith.mulf %518, %517 : vector<1x16x16xf32>
      %520 = arith.addf %516, %519 : vector<1x16x16xf32>
      %521 = vector.extract_strided_slice %158 {offsets = [0, 0, 5], sizes = [1, 22, 16], strides = [1, 1, 1]} : vector<1x22x22xf32> to vector<1x22x16xf32>
      %522 = vector.extract_strided_slice %159 {offsets = [0, 0, 5], sizes = [1, 22, 16], strides = [1, 1, 1]} : vector<1x22x22xf32> to vector<1x22x16xf32>
      %c5_182 = arith.constant 5 : index
      %523 = memref.load %arg3[%c5_182] : memref<98xf32, #tpu.memory_space<smem>>
      %c54 = arith.constant 54 : index
      %524 = memref.load %arg3[%c54] : memref<98xf32, #tpu.memory_space<smem>>
      %525 = vector.extract_strided_slice %521 {offsets = [0, 0, 0], sizes = [1, 16, 16], strides = [1, 1, 1]} : vector<1x22x16xf32> to vector<1x16x16xf32>
      %526 = vector.broadcast %523 : f32 to vector<1x16x16xf32>
      %527 = arith.mulf %526, %525 : vector<1x16x16xf32>
      %528 = arith.addf %520, %527 : vector<1x16x16xf32>
      %529 = vector.extract_strided_slice %522 {offsets = [0, 0, 0], sizes = [1, 16, 16], strides = [1, 1, 1]} : vector<1x22x16xf32> to vector<1x16x16xf32>
      %530 = vector.broadcast %524 : f32 to vector<1x16x16xf32>
      %531 = arith.mulf %530, %529 : vector<1x16x16xf32>
      %532 = arith.addf %528, %531 : vector<1x16x16xf32>
      %c12_183 = arith.constant 12 : index
      %533 = memref.load %arg3[%c12_183] : memref<98xf32, #tpu.memory_space<smem>>
      %c61 = arith.constant 61 : index
      %534 = memref.load %arg3[%c61] : memref<98xf32, #tpu.memory_space<smem>>
      %535 = vector.extract_strided_slice %521 {offsets = [0, 1, 0], sizes = [1, 16, 16], strides = [1, 1, 1]} : vector<1x22x16xf32> to vector<1x16x16xf32>
      %536 = vector.broadcast %533 : f32 to vector<1x16x16xf32>
      %537 = arith.mulf %536, %535 : vector<1x16x16xf32>
      %538 = arith.addf %532, %537 : vector<1x16x16xf32>
      %539 = vector.extract_strided_slice %522 {offsets = [0, 1, 0], sizes = [1, 16, 16], strides = [1, 1, 1]} : vector<1x22x16xf32> to vector<1x16x16xf32>
      %540 = vector.broadcast %534 : f32 to vector<1x16x16xf32>
      %541 = arith.mulf %540, %539 : vector<1x16x16xf32>
      %542 = arith.addf %538, %541 : vector<1x16x16xf32>
      %c19 = arith.constant 19 : index
      %543 = memref.load %arg3[%c19] : memref<98xf32, #tpu.memory_space<smem>>
      %c68 = arith.constant 68 : index
      %544 = memref.load %arg3[%c68] : memref<98xf32, #tpu.memory_space<smem>>
      %545 = vector.extract_strided_slice %521 {offsets = [0, 2, 0], sizes = [1, 16, 16], strides = [1, 1, 1]} : vector<1x22x16xf32> to vector<1x16x16xf32>
      %546 = vector.broadcast %543 : f32 to vector<1x16x16xf32>
      %547 = arith.mulf %546, %545 : vector<1x16x16xf32>
      %548 = arith.addf %542, %547 : vector<1x16x16xf32>
      %549 = vector.extract_strided_slice %522 {offsets = [0, 2, 0], sizes = [1, 16, 16], strides = [1, 1, 1]} : vector<1x22x16xf32> to vector<1x16x16xf32>
      %550 = vector.broadcast %544 : f32 to vector<1x16x16xf32>
      %551 = arith.mulf %550, %549 : vector<1x16x16xf32>
      %552 = arith.addf %548, %551 : vector<1x16x16xf32>
      %c26 = arith.constant 26 : index
      %553 = memref.load %arg3[%c26] : memref<98xf32, #tpu.memory_space<smem>>
      %c75 = arith.constant 75 : index
      %554 = memref.load %arg3[%c75] : memref<98xf32, #tpu.memory_space<smem>>
      %555 = vector.extract_strided_slice %521 {offsets = [0, 3, 0], sizes = [1, 16, 16], strides = [1, 1, 1]} : vector<1x22x16xf32> to vector<1x16x16xf32>
      %556 = vector.broadcast %553 : f32 to vector<1x16x16xf32>
      %557 = arith.mulf %556, %555 : vector<1x16x16xf32>
      %558 = arith.addf %552, %557 : vector<1x16x16xf32>
      %559 = vector.extract_strided_slice %522 {offsets = [0, 3, 0], sizes = [1, 16, 16], strides = [1, 1, 1]} : vector<1x22x16xf32> to vector<1x16x16xf32>
      %560 = vector.broadcast %554 : f32 to vector<1x16x16xf32>
      %561 = arith.mulf %560, %559 : vector<1x16x16xf32>
      %562 = arith.addf %558, %561 : vector<1x16x16xf32>
      %c33 = arith.constant 33 : index
      %563 = memref.load %arg3[%c33] : memref<98xf32, #tpu.memory_space<smem>>
      %c82 = arith.constant 82 : index
      %564 = memref.load %arg3[%c82] : memref<98xf32, #tpu.memory_space<smem>>
      %565 = vector.extract_strided_slice %521 {offsets = [0, 4, 0], sizes = [1, 16, 16], strides = [1, 1, 1]} : vector<1x22x16xf32> to vector<1x16x16xf32>
      %566 = vector.broadcast %563 : f32 to vector<1x16x16xf32>
      %567 = arith.mulf %566, %565 : vector<1x16x16xf32>
      %568 = arith.addf %562, %567 : vector<1x16x16xf32>
      %569 = vector.extract_strided_slice %522 {offsets = [0, 4, 0], sizes = [1, 16, 16], strides = [1, 1, 1]} : vector<1x22x16xf32> to vector<1x16x16xf32>
      %570 = vector.broadcast %564 : f32 to vector<1x16x16xf32>
      %571 = arith.mulf %570, %569 : vector<1x16x16xf32>
      %572 = arith.addf %568, %571 : vector<1x16x16xf32>
      %c40 = arith.constant 40 : index
      %573 = memref.load %arg3[%c40] : memref<98xf32, #tpu.memory_space<smem>>
      %c89 = arith.constant 89 : index
      %574 = memref.load %arg3[%c89] : memref<98xf32, #tpu.memory_space<smem>>
      %575 = vector.extract_strided_slice %521 {offsets = [0, 5, 0], sizes = [1, 16, 16], strides = [1, 1, 1]} : vector<1x22x16xf32> to vector<1x16x16xf32>
      %576 = vector.broadcast %573 : f32 to vector<1x16x16xf32>
      %577 = arith.mulf %576, %575 : vector<1x16x16xf32>
      %578 = arith.addf %572, %577 : vector<1x16x16xf32>
      %579 = vector.extract_strided_slice %522 {offsets = [0, 5, 0], sizes = [1, 16, 16], strides = [1, 1, 1]} : vector<1x22x16xf32> to vector<1x16x16xf32>
      %580 = vector.broadcast %574 : f32 to vector<1x16x16xf32>
      %581 = arith.mulf %580, %579 : vector<1x16x16xf32>
      %582 = arith.addf %578, %581 : vector<1x16x16xf32>
      %c47 = arith.constant 47 : index
      %583 = memref.load %arg3[%c47] : memref<98xf32, #tpu.memory_space<smem>>
      %c96_184 = arith.constant 96 : index
      %584 = memref.load %arg3[%c96_184] : memref<98xf32, #tpu.memory_space<smem>>
      %585 = vector.extract_strided_slice %521 {offsets = [0, 6, 0], sizes = [1, 16, 16], strides = [1, 1, 1]} : vector<1x22x16xf32> to vector<1x16x16xf32>
      %586 = vector.broadcast %583 : f32 to vector<1x16x16xf32>
      %587 = arith.mulf %586, %585 : vector<1x16x16xf32>
      %588 = arith.addf %582, %587 : vector<1x16x16xf32>
      %589 = vector.extract_strided_slice %522 {offsets = [0, 6, 0], sizes = [1, 16, 16], strides = [1, 1, 1]} : vector<1x22x16xf32> to vector<1x16x16xf32>
      %590 = vector.broadcast %584 : f32 to vector<1x16x16xf32>
      %591 = arith.mulf %590, %589 : vector<1x16x16xf32>
      %592 = arith.addf %588, %591 : vector<1x16x16xf32>
      %593 = vector.extract_strided_slice %158 {offsets = [0, 0, 6], sizes = [1, 22, 16], strides = [1, 1, 1]} : vector<1x22x22xf32> to vector<1x22x16xf32>
      %594 = vector.extract_strided_slice %159 {offsets = [0, 0, 6], sizes = [1, 22, 16], strides = [1, 1, 1]} : vector<1x22x22xf32> to vector<1x22x16xf32>
      %c6_185 = arith.constant 6 : index
      %595 = memref.load %arg3[%c6_185] : memref<98xf32, #tpu.memory_space<smem>>
      %c55 = arith.constant 55 : index
      %596 = memref.load %arg3[%c55] : memref<98xf32, #tpu.memory_space<smem>>
      %597 = vector.extract_strided_slice %593 {offsets = [0, 0, 0], sizes = [1, 16, 16], strides = [1, 1, 1]} : vector<1x22x16xf32> to vector<1x16x16xf32>
      %598 = vector.broadcast %595 : f32 to vector<1x16x16xf32>
      %599 = arith.mulf %598, %597 : vector<1x16x16xf32>
      %600 = arith.addf %592, %599 : vector<1x16x16xf32>
      %601 = vector.extract_strided_slice %594 {offsets = [0, 0, 0], sizes = [1, 16, 16], strides = [1, 1, 1]} : vector<1x22x16xf32> to vector<1x16x16xf32>
      %602 = vector.broadcast %596 : f32 to vector<1x16x16xf32>
      %603 = arith.mulf %602, %601 : vector<1x16x16xf32>
      %604 = arith.addf %600, %603 : vector<1x16x16xf32>
      %c13_186 = arith.constant 13 : index
      %605 = memref.load %arg3[%c13_186] : memref<98xf32, #tpu.memory_space<smem>>
      %c62 = arith.constant 62 : index
      %606 = memref.load %arg3[%c62] : memref<98xf32, #tpu.memory_space<smem>>
      %607 = vector.extract_strided_slice %593 {offsets = [0, 1, 0], sizes = [1, 16, 16], strides = [1, 1, 1]} : vector<1x22x16xf32> to vector<1x16x16xf32>
      %608 = vector.broadcast %605 : f32 to vector<1x16x16xf32>
      %609 = arith.mulf %608, %607 : vector<1x16x16xf32>
      %610 = arith.addf %604, %609 : vector<1x16x16xf32>
      %611 = vector.extract_strided_slice %594 {offsets = [0, 1, 0], sizes = [1, 16, 16], strides = [1, 1, 1]} : vector<1x22x16xf32> to vector<1x16x16xf32>
      %612 = vector.broadcast %606 : f32 to vector<1x16x16xf32>
      %613 = arith.mulf %612, %611 : vector<1x16x16xf32>
      %614 = arith.addf %610, %613 : vector<1x16x16xf32>
      %c20 = arith.constant 20 : index
      %615 = memref.load %arg3[%c20] : memref<98xf32, #tpu.memory_space<smem>>
      %c69 = arith.constant 69 : index
      %616 = memref.load %arg3[%c69] : memref<98xf32, #tpu.memory_space<smem>>
      %617 = vector.extract_strided_slice %593 {offsets = [0, 2, 0], sizes = [1, 16, 16], strides = [1, 1, 1]} : vector<1x22x16xf32> to vector<1x16x16xf32>
      %618 = vector.broadcast %615 : f32 to vector<1x16x16xf32>
      %619 = arith.mulf %618, %617 : vector<1x16x16xf32>
      %620 = arith.addf %614, %619 : vector<1x16x16xf32>
      %621 = vector.extract_strided_slice %594 {offsets = [0, 2, 0], sizes = [1, 16, 16], strides = [1, 1, 1]} : vector<1x22x16xf32> to vector<1x16x16xf32>
      %622 = vector.broadcast %616 : f32 to vector<1x16x16xf32>
      %623 = arith.mulf %622, %621 : vector<1x16x16xf32>
      %624 = arith.addf %620, %623 : vector<1x16x16xf32>
      %c27 = arith.constant 27 : index
      %625 = memref.load %arg3[%c27] : memref<98xf32, #tpu.memory_space<smem>>
      %c76 = arith.constant 76 : index
      %626 = memref.load %arg3[%c76] : memref<98xf32, #tpu.memory_space<smem>>
      %627 = vector.extract_strided_slice %593 {offsets = [0, 3, 0], sizes = [1, 16, 16], strides = [1, 1, 1]} : vector<1x22x16xf32> to vector<1x16x16xf32>
      %628 = vector.broadcast %625 : f32 to vector<1x16x16xf32>
      %629 = arith.mulf %628, %627 : vector<1x16x16xf32>
      %630 = arith.addf %624, %629 : vector<1x16x16xf32>
      %631 = vector.extract_strided_slice %594 {offsets = [0, 3, 0], sizes = [1, 16, 16], strides = [1, 1, 1]} : vector<1x22x16xf32> to vector<1x16x16xf32>
      %632 = vector.broadcast %626 : f32 to vector<1x16x16xf32>
      %633 = arith.mulf %632, %631 : vector<1x16x16xf32>
      %634 = arith.addf %630, %633 : vector<1x16x16xf32>
      %c34 = arith.constant 34 : index
      %635 = memref.load %arg3[%c34] : memref<98xf32, #tpu.memory_space<smem>>
      %c83 = arith.constant 83 : index
      %636 = memref.load %arg3[%c83] : memref<98xf32, #tpu.memory_space<smem>>
      %637 = vector.extract_strided_slice %593 {offsets = [0, 4, 0], sizes = [1, 16, 16], strides = [1, 1, 1]} : vector<1x22x16xf32> to vector<1x16x16xf32>
      %638 = vector.broadcast %635 : f32 to vector<1x16x16xf32>
      %639 = arith.mulf %638, %637 : vector<1x16x16xf32>
      %640 = arith.addf %634, %639 : vector<1x16x16xf32>
      %641 = vector.extract_strided_slice %594 {offsets = [0, 4, 0], sizes = [1, 16, 16], strides = [1, 1, 1]} : vector<1x22x16xf32> to vector<1x16x16xf32>
      %642 = vector.broadcast %636 : f32 to vector<1x16x16xf32>
      %643 = arith.mulf %642, %641 : vector<1x16x16xf32>
      %644 = arith.addf %640, %643 : vector<1x16x16xf32>
      %c41 = arith.constant 41 : index
      %645 = memref.load %arg3[%c41] : memref<98xf32, #tpu.memory_space<smem>>
      %c90 = arith.constant 90 : index
      %646 = memref.load %arg3[%c90] : memref<98xf32, #tpu.memory_space<smem>>
      %647 = vector.extract_strided_slice %593 {offsets = [0, 5, 0], sizes = [1, 16, 16], strides = [1, 1, 1]} : vector<1x22x16xf32> to vector<1x16x16xf32>
      %648 = vector.broadcast %645 : f32 to vector<1x16x16xf32>
      %649 = arith.mulf %648, %647 : vector<1x16x16xf32>
      %650 = arith.addf %644, %649 : vector<1x16x16xf32>
      %651 = vector.extract_strided_slice %594 {offsets = [0, 5, 0], sizes = [1, 16, 16], strides = [1, 1, 1]} : vector<1x22x16xf32> to vector<1x16x16xf32>
      %652 = vector.broadcast %646 : f32 to vector<1x16x16xf32>
      %653 = arith.mulf %652, %651 : vector<1x16x16xf32>
      %654 = arith.addf %650, %653 : vector<1x16x16xf32>
      %c48_187 = arith.constant 48 : index
      %655 = memref.load %arg3[%c48_187] : memref<98xf32, #tpu.memory_space<smem>>
      %c97 = arith.constant 97 : index
      %656 = memref.load %arg3[%c97] : memref<98xf32, #tpu.memory_space<smem>>
      %657 = vector.extract_strided_slice %593 {offsets = [0, 6, 0], sizes = [1, 16, 16], strides = [1, 1, 1]} : vector<1x22x16xf32> to vector<1x16x16xf32>
      %658 = vector.broadcast %655 : f32 to vector<1x16x16xf32>
      %659 = arith.mulf %658, %657 : vector<1x16x16xf32>
      %660 = arith.addf %654, %659 : vector<1x16x16xf32>
      %661 = vector.extract_strided_slice %594 {offsets = [0, 6, 0], sizes = [1, 16, 16], strides = [1, 1, 1]} : vector<1x22x16xf32> to vector<1x16x16xf32>
      %662 = vector.broadcast %656 : f32 to vector<1x16x16xf32>
      %663 = arith.mulf %662, %661 : vector<1x16x16xf32>
      %664 = arith.addf %660, %663 : vector<1x16x16xf32>
      %665 = arith.negf %664 : vector<1x16x16xf32>
      %666 = math.exp %665 : vector<1x16x16xf32>
      %cst_188 = arith.constant 1.000000e+00 : f32
      %667 = vector.broadcast %cst_188 : f32 to vector<1x16x16xf32>
      %668 = arith.addf %667, %666 : vector<1x16x16xf32>
      %669 = arith.divf %667, %668 : vector<1x16x16xf32>
      %670 = vector.extract_strided_slice %669 {offsets = [0, 0, 0], sizes = [1, 1, 16], strides = [1, 1, 1]} : vector<1x16x16xf32> to vector<1x1x16xf32>
      %671 = vector.shape_cast %670 : vector<1x1x16xf32> to vector<1x16xf32>
      %c0_189 = arith.constant 0 : index
      %c0_190 = arith.constant 0 : index
      %c0_191 = arith.constant 0 : index
      %672 = vector.load %arg4[%c0_189, %c0_190, %c0_191] : memref<1x1x256xf32, #tpu.memory_space<vmem>>, vector<1x1x16xf32>
      %673 = vector.shape_cast %672 : vector<1x1x16xf32> to vector<1x16xf32>
      %674 = vector.shape_cast %671 : vector<1x16xf32> to vector<1x1x16xf32>
      tpu.vector_store %arg4[%c0_189, %c0_190, %c0_191], %674 {strides = array<i32>} : memref<1x1x256xf32, #tpu.memory_space<vmem>>, vector<1x1x16xf32>,
      %675 = vector.extract_strided_slice %669 {offsets = [0, 1, 0], sizes = [1, 1, 16], strides = [1, 1, 1]} : vector<1x16x16xf32> to vector<1x1x16xf32>
      %676 = vector.shape_cast %675 : vector<1x1x16xf32> to vector<1x16xf32>
      %c0_192 = arith.constant 0 : index
      %c0_193 = arith.constant 0 : index
      %c16_194 = arith.constant 16 : index
      %677 = vector.load %arg4[%c0_192, %c0_193, %c16_194] : memref<1x1x256xf32, #tpu.memory_space<vmem>>, vector<1x1x16xf32>
      %678 = vector.shape_cast %677 : vector<1x1x16xf32> to vector<1x16xf32>
      %679 = vector.shape_cast %676 : vector<1x16xf32> to vector<1x1x16xf32>
      tpu.vector_store %arg4[%c0_192, %c0_193, %c16_194], %679 {strides = array<i32>} : memref<1x1x256xf32, #tpu.memory_space<vmem>>, vector<1x1x16xf32>,
      %680 = vector.extract_strided_slice %669 {offsets = [0, 2, 0], sizes = [1, 1, 16], strides = [1, 1, 1]} : vector<1x16x16xf32> to vector<1x1x16xf32>
      %681 = vector.shape_cast %680 : vector<1x1x16xf32> to vector<1x16xf32>
      %c0_195 = arith.constant 0 : index
      %c0_196 = arith.constant 0 : index
      %c32_197 = arith.constant 32 : index
      %682 = vector.load %arg4[%c0_195, %c0_196, %c32_197] : memref<1x1x256xf32, #tpu.memory_space<vmem>>, vector<1x1x16xf32>
      %683 = vector.shape_cast %682 : vector<1x1x16xf32> to vector<1x16xf32>
      %684 = vector.shape_cast %681 : vector<1x16xf32> to vector<1x1x16xf32>
      tpu.vector_store %arg4[%c0_195, %c0_196, %c32_197], %684 {strides = array<i32>} : memref<1x1x256xf32, #tpu.memory_space<vmem>>, vector<1x1x16xf32>,
      %685 = vector.extract_strided_slice %669 {offsets = [0, 3, 0], sizes = [1, 1, 16], strides = [1, 1, 1]} : vector<1x16x16xf32> to vector<1x1x16xf32>
      %686 = vector.shape_cast %685 : vector<1x1x16xf32> to vector<1x16xf32>
      %c0_198 = arith.constant 0 : index
      %c0_199 = arith.constant 0 : index
      %c48_200 = arith.constant 48 : index
      %687 = vector.load %arg4[%c0_198, %c0_199, %c48_200] : memref<1x1x256xf32, #tpu.memory_space<vmem>>, vector<1x1x16xf32>
      %688 = vector.shape_cast %687 : vector<1x1x16xf32> to vector<1x16xf32>
      %689 = vector.shape_cast %686 : vector<1x16xf32> to vector<1x1x16xf32>
      tpu.vector_store %arg4[%c0_198, %c0_199, %c48_200], %689 {strides = array<i32>} : memref<1x1x256xf32, #tpu.memory_space<vmem>>, vector<1x1x16xf32>,
      %690 = vector.extract_strided_slice %669 {offsets = [0, 4, 0], sizes = [1, 1, 16], strides = [1, 1, 1]} : vector<1x16x16xf32> to vector<1x1x16xf32>
      %691 = vector.shape_cast %690 : vector<1x1x16xf32> to vector<1x16xf32>
      %c0_201 = arith.constant 0 : index
      %c0_202 = arith.constant 0 : index
      %c64_203 = arith.constant 64 : index
      %692 = vector.load %arg4[%c0_201, %c0_202, %c64_203] : memref<1x1x256xf32, #tpu.memory_space<vmem>>, vector<1x1x16xf32>
      %693 = vector.shape_cast %692 : vector<1x1x16xf32> to vector<1x16xf32>
      %694 = vector.shape_cast %691 : vector<1x16xf32> to vector<1x1x16xf32>
      tpu.vector_store %arg4[%c0_201, %c0_202, %c64_203], %694 {strides = array<i32>} : memref<1x1x256xf32, #tpu.memory_space<vmem>>, vector<1x1x16xf32>,
      %695 = vector.extract_strided_slice %669 {offsets = [0, 5, 0], sizes = [1, 1, 16], strides = [1, 1, 1]} : vector<1x16x16xf32> to vector<1x1x16xf32>
      %696 = vector.shape_cast %695 : vector<1x1x16xf32> to vector<1x16xf32>
      %c0_204 = arith.constant 0 : index
      %c0_205 = arith.constant 0 : index
      %c80_206 = arith.constant 80 : index
      %697 = vector.load %arg4[%c0_204, %c0_205, %c80_206] : memref<1x1x256xf32, #tpu.memory_space<vmem>>, vector<1x1x16xf32>
      %698 = vector.shape_cast %697 : vector<1x1x16xf32> to vector<1x16xf32>
      %699 = vector.shape_cast %696 : vector<1x16xf32> to vector<1x1x16xf32>
      tpu.vector_store %arg4[%c0_204, %c0_205, %c80_206], %699 {strides = array<i32>} : memref<1x1x256xf32, #tpu.memory_space<vmem>>, vector<1x1x16xf32>,
      %700 = vector.extract_strided_slice %669 {offsets = [0, 6, 0], sizes = [1, 1, 16], strides = [1, 1, 1]} : vector<1x16x16xf32> to vector<1x1x16xf32>
      %701 = vector.shape_cast %700 : vector<1x1x16xf32> to vector<1x16xf32>
      %c0_207 = arith.constant 0 : index
      %c0_208 = arith.constant 0 : index
      %c96_209 = arith.constant 96 : index
      %702 = vector.load %arg4[%c0_207, %c0_208, %c96_209] : memref<1x1x256xf32, #tpu.memory_space<vmem>>, vector<1x1x16xf32>
      %703 = vector.shape_cast %702 : vector<1x1x16xf32> to vector<1x16xf32>
      %704 = vector.shape_cast %701 : vector<1x16xf32> to vector<1x1x16xf32>
      tpu.vector_store %arg4[%c0_207, %c0_208, %c96_209], %704 {strides = array<i32>} : memref<1x1x256xf32, #tpu.memory_space<vmem>>, vector<1x1x16xf32>,
      %705 = vector.extract_strided_slice %669 {offsets = [0, 7, 0], sizes = [1, 1, 16], strides = [1, 1, 1]} : vector<1x16x16xf32> to vector<1x1x16xf32>
      %706 = vector.shape_cast %705 : vector<1x1x16xf32> to vector<1x16xf32>
      %c0_210 = arith.constant 0 : index
      %c0_211 = arith.constant 0 : index
      %c112_212 = arith.constant 112 : index
      %707 = vector.load %arg4[%c0_210, %c0_211, %c112_212] : memref<1x1x256xf32, #tpu.memory_space<vmem>>, vector<1x1x16xf32>
      %708 = vector.shape_cast %707 : vector<1x1x16xf32> to vector<1x16xf32>
      %709 = vector.shape_cast %706 : vector<1x16xf32> to vector<1x1x16xf32>
      tpu.vector_store %arg4[%c0_210, %c0_211, %c112_212], %709 {strides = array<i32>} : memref<1x1x256xf32, #tpu.memory_space<vmem>>, vector<1x1x16xf32>,
      %710 = vector.extract_strided_slice %669 {offsets = [0, 8, 0], sizes = [1, 1, 16], strides = [1, 1, 1]} : vector<1x16x16xf32> to vector<1x1x16xf32>
      %711 = vector.shape_cast %710 : vector<1x1x16xf32> to vector<1x16xf32>
      %c0_213 = arith.constant 0 : index
      %c0_214 = arith.constant 0 : index
      %c128_215 = arith.constant 128 : index
      %712 = vector.load %arg4[%c0_213, %c0_214, %c128_215] : memref<1x1x256xf32, #tpu.memory_space<vmem>>, vector<1x1x16xf32>
      %713 = vector.shape_cast %712 : vector<1x1x16xf32> to vector<1x16xf32>
      %714 = vector.shape_cast %711 : vector<1x16xf32> to vector<1x1x16xf32>
      tpu.vector_store %arg4[%c0_213, %c0_214, %c128_215], %714 {strides = array<i32>} : memref<1x1x256xf32, #tpu.memory_space<vmem>>, vector<1x1x16xf32>,
      %715 = vector.extract_strided_slice %669 {offsets = [0, 9, 0], sizes = [1, 1, 16], strides = [1, 1, 1]} : vector<1x16x16xf32> to vector<1x1x16xf32>
      %716 = vector.shape_cast %715 : vector<1x1x16xf32> to vector<1x16xf32>
      %c0_216 = arith.constant 0 : index
      %c0_217 = arith.constant 0 : index
      %c144_218 = arith.constant 144 : index
      %717 = vector.load %arg4[%c0_216, %c0_217, %c144_218] : memref<1x1x256xf32, #tpu.memory_space<vmem>>, vector<1x1x16xf32>
      %718 = vector.shape_cast %717 : vector<1x1x16xf32> to vector<1x16xf32>
      %719 = vector.shape_cast %716 : vector<1x16xf32> to vector<1x1x16xf32>
      tpu.vector_store %arg4[%c0_216, %c0_217, %c144_218], %719 {strides = array<i32>} : memref<1x1x256xf32, #tpu.memory_space<vmem>>, vector<1x1x16xf32>,
      %720 = vector.extract_strided_slice %669 {offsets = [0, 10, 0], sizes = [1, 1, 16], strides = [1, 1, 1]} : vector<1x16x16xf32> to vector<1x1x16xf32>
      %721 = vector.shape_cast %720 : vector<1x1x16xf32> to vector<1x16xf32>
      %c0_219 = arith.constant 0 : index
      %c0_220 = arith.constant 0 : index
      %c160_221 = arith.constant 160 : index
      %722 = vector.load %arg4[%c0_219, %c0_220, %c160_221] : memref<1x1x256xf32, #tpu.memory_space<vmem>>, vector<1x1x16xf32>
      %723 = vector.shape_cast %722 : vector<1x1x16xf32> to vector<1x16xf32>
      %724 = vector.shape_cast %721 : vector<1x16xf32> to vector<1x1x16xf32>
      tpu.vector_store %arg4[%c0_219, %c0_220, %c160_221], %724 {strides = array<i32>} : memref<1x1x256xf32, #tpu.memory_space<vmem>>, vector<1x1x16xf32>,
      %725 = vector.extract_strided_slice %669 {offsets = [0, 11, 0], sizes = [1, 1, 16], strides = [1, 1, 1]} : vector<1x16x16xf32> to vector<1x1x16xf32>
      %726 = vector.shape_cast %725 : vector<1x1x16xf32> to vector<1x16xf32>
      %c0_222 = arith.constant 0 : index
      %c0_223 = arith.constant 0 : index
      %c176_224 = arith.constant 176 : index
      %727 = vector.load %arg4[%c0_222, %c0_223, %c176_224] : memref<1x1x256xf32, #tpu.memory_space<vmem>>, vector<1x1x16xf32>
      %728 = vector.shape_cast %727 : vector<1x1x16xf32> to vector<1x16xf32>
      %729 = vector.shape_cast %726 : vector<1x16xf32> to vector<1x1x16xf32>
      tpu.vector_store %arg4[%c0_222, %c0_223, %c176_224], %729 {strides = array<i32>} : memref<1x1x256xf32, #tpu.memory_space<vmem>>, vector<1x1x16xf32>,
      %730 = vector.extract_strided_slice %669 {offsets = [0, 12, 0], sizes = [1, 1, 16], strides = [1, 1, 1]} : vector<1x16x16xf32> to vector<1x1x16xf32>
      %731 = vector.shape_cast %730 : vector<1x1x16xf32> to vector<1x16xf32>
      %c0_225 = arith.constant 0 : index
      %c0_226 = arith.constant 0 : index
      %c192_227 = arith.constant 192 : index
      %732 = vector.load %arg4[%c0_225, %c0_226, %c192_227] : memref<1x1x256xf32, #tpu.memory_space<vmem>>, vector<1x1x16xf32>
      %733 = vector.shape_cast %732 : vector<1x1x16xf32> to vector<1x16xf32>
      %734 = vector.shape_cast %731 : vector<1x16xf32> to vector<1x1x16xf32>
      tpu.vector_store %arg4[%c0_225, %c0_226, %c192_227], %734 {strides = array<i32>} : memref<1x1x256xf32, #tpu.memory_space<vmem>>, vector<1x1x16xf32>,
      %735 = vector.extract_strided_slice %669 {offsets = [0, 13, 0], sizes = [1, 1, 16], strides = [1, 1, 1]} : vector<1x16x16xf32> to vector<1x1x16xf32>
      %736 = vector.shape_cast %735 : vector<1x1x16xf32> to vector<1x16xf32>
      %c0_228 = arith.constant 0 : index
      %c0_229 = arith.constant 0 : index
      %c208_230 = arith.constant 208 : index
      %737 = vector.load %arg4[%c0_228, %c0_229, %c208_230] : memref<1x1x256xf32, #tpu.memory_space<vmem>>, vector<1x1x16xf32>
      %738 = vector.shape_cast %737 : vector<1x1x16xf32> to vector<1x16xf32>
      %739 = vector.shape_cast %736 : vector<1x16xf32> to vector<1x1x16xf32>
      tpu.vector_store %arg4[%c0_228, %c0_229, %c208_230], %739 {strides = array<i32>} : memref<1x1x256xf32, #tpu.memory_space<vmem>>, vector<1x1x16xf32>,
      %740 = vector.extract_strided_slice %669 {offsets = [0, 14, 0], sizes = [1, 1, 16], strides = [1, 1, 1]} : vector<1x16x16xf32> to vector<1x1x16xf32>
      %741 = vector.shape_cast %740 : vector<1x1x16xf32> to vector<1x16xf32>
      %c0_231 = arith.constant 0 : index
      %c0_232 = arith.constant 0 : index
      %c224_233 = arith.constant 224 : index
      %742 = vector.load %arg4[%c0_231, %c0_232, %c224_233] : memref<1x1x256xf32, #tpu.memory_space<vmem>>, vector<1x1x16xf32>
      %743 = vector.shape_cast %742 : vector<1x1x16xf32> to vector<1x16xf32>
      %744 = vector.shape_cast %741 : vector<1x16xf32> to vector<1x1x16xf32>
      tpu.vector_store %arg4[%c0_231, %c0_232, %c224_233], %744 {strides = array<i32>} : memref<1x1x256xf32, #tpu.memory_space<vmem>>, vector<1x1x16xf32>,
      %745 = vector.extract_strided_slice %669 {offsets = [0, 15, 0], sizes = [1, 1, 16], strides = [1, 1, 1]} : vector<1x16x16xf32> to vector<1x1x16xf32>
      %746 = vector.shape_cast %745 : vector<1x1x16xf32> to vector<1x16xf32>
      %c0_234 = arith.constant 0 : index
      %c0_235 = arith.constant 0 : index
      %c240_236 = arith.constant 240 : index
      %747 = vector.load %arg4[%c0_234, %c0_235, %c240_236] : memref<1x1x256xf32, #tpu.memory_space<vmem>>, vector<1x1x16xf32>
      %748 = vector.shape_cast %747 : vector<1x1x16xf32> to vector<1x16xf32>
      %749 = vector.shape_cast %746 : vector<1x16xf32> to vector<1x1x16xf32>
      tpu.vector_store %arg4[%c0_234, %c0_235, %c240_236], %749 {strides = array<i32>} : memref<1x1x256xf32, #tpu.memory_space<vmem>>, vector<1x1x16xf32>,
    } else {
    }
    return
  }
  func.func @transform_0(%arg0: i32, %arg1: i32) -> (i32, i32, i32) {
    %c0_i32 = arith.constant 0 : i32
    %c0_i32_0 = arith.constant 0 : i32
    return %arg0, %arg1, %c0_i32 : i32, i32, i32
  }
  func.func @transform_1(%arg0: i32, %arg1: i32) -> i32 {
    %c0_i32 = arith.constant 0 : i32
    %c0_i32_0 = arith.constant 0 : i32
    return %c0_i32 : i32
  }
  func.func @transform_2(%arg0: i32, %arg1: i32) -> (i32, i32, i32) {
    %c0_i32 = arith.constant 0 : i32
    %c0_i32_0 = arith.constant 0 : i32
    %c0_i32_1 = arith.constant 0 : i32
    return %arg0, %c0_i32, %c0_i32_0 : i32, i32, i32
  }
}

</mosaic_0001>

<bundles_post_ra>
// kernel: tpu_custom_call.1
= control target key start
LH: loop header
LB: loop body
LE: loop exit
PB: predicated region body
PF: predicated region fallthrough
CT: control target
= control target key end

     0   :  { %s5444_s0 = inlined_call_operand.hbm [shape: f32[2,4,256], index: 0, kind: input, shape index: {}]   ;;  %s5445_s1 = inlined_call_operand.vmem [shape: f32[98], index: 1, kind: input, shape index: {}]   ;;  %s5446_s2 = inlined_call_operand.hbm [shape: f32[2,1,256], index: 2, kind: output, shape index: {}]  }
   0x1   :  { %5475 = sst [smem:[#allocation33_spill]] %s5444_s0 }
   0x2   :  { %5476 = sst [smem:[#allocation34_spill]] %s5445_s1 }
   0x3   :  { %7 = vsyncpa [#allocation7], 0 }
   0x4   :  { %9 = vsyncpa [#allocation7 + $0x1], 0 }
   0x5   :  { %10 = vsyncpa [#allocation9], 0 }
   0x6   :  { %11 = vsyncpa [#allocation8], 0 }
   0x7   :  { %13 = vsyncpa [#allocation8 + $0x1], 0  ;;  %s3209_s9 = smov 0   ;;  %s3211_s10 = smov 0  }
   0x8   :  { %s3213_s11 = smov 0   ;;  %s3215_s12 = smov 0  }
   0x9   :  { %s3217_s13 = smov 0   ;;  %s3219_s14 = smov 0  }
   0xa LB: > { %5477 = sst [smem:[#allocation15_spill]] %s3149_s10  ;;  %s2764_s15 = sadd.s32 4294967295, %s3165_s14   ;;  %s3165_s14 = sphi %s3219_s14, %s19_s14   ;;  %s3161_s13 = sphi %s3217_s13, %s5603_s13   ;;  %s3157_s12 = sphi %s3215_s12, %s5602_s12   ;;  %s3153_s11 = sphi %s3213_s11, %s5601_s11   ;;  %s3149_s10 = sphi %s3211_s10, %s5600_s10   ;;  %s3145_s9 = sphi %s3209_s9, %s5599_s9  }
   0xb   : > { %5478 = sst [smem:[#allocation16_spill]] %s3153_s11  ;;  %s2765_s16 = sadd.s32 4294967294, %s3165_s14  }
   0xc   : > { %5479 = sst [smem:[#allocation17_spill]] %s3161_s13  ;;  %p53_p0 = scmp.ne.s32.totalorder %s3149_s10, %s3145_s9 }
   0xd   : > { %p3243_p1 = scmp.eq.s32.totalorder %s2764_s15, 0  ;;  %p3247_p2 = scmp.eq.s32.totalorder %s2764_s15, 1 }
   0xe   : > { %p104_p3 = scmp.eq.s32.totalorder %s2765_s16, 1  ;;  %p2766_p5 = scmp.ge.s32.totalorder %s3165_s14, 1 }
   0xf   : > { %s5480_s17 = scalar_select %p3243_p1, 1, 0 }
  0x10   : > { %p3253_p4 = por %p3243_p1, %p53_p0  ;;  %p3258_p6 = por %p104_p3, %p53_p0 }
  0x11   : > { %p111_p7 = scmp.lt.s32.totalorder %s3165_s14, 3  ;;  %s5484_s1 = sld [smem:[#allocation34_spill]] }
  0x12   : > { %s5482_s19 = scalar_select %p3253_p4, 1, 0 }
  0x13   : > { %s5483_s20 = scalar_select %p3258_p6, 1, 0 }
  0x14   : > { %p3266_p8 = pnand %p2766_p5, %p111_p7  ;;  %s31_s26 = sadd.s32 1, %s3161_s13 }
  0x15   : > { %s40_s27 = sadd.s32 1, %s3153_s11  ;;  %p33_p12 = scmp.ge.s32.totalorder %s31_s26, 2 }
  0x16   : > { %p2925_p10 = pneg %p3266_p8 }
  0x17   : > { %s124_s23 = sshll.u32 %s5484_s1, 4  ;;  %s125_s23 = int_to_ptr.vmem [resolvable:$true] %s124_s23 }
  0x18   : > { %p3275_p11 = pnand %p2925_p10, %p3243_p1  ;;  %s3034_s28 = scalar_lea.vmem %s125_s23, 16 }
  0x19   : > { %p3035_p13 = scmp.ne.s32.totalorder %s125_s23, %s3034_s28  ;;  %p3042_p7 = scmp.lt.s32.totalorder %s125_s23, %s125_s23 }
  0x1a   : > { %p3036_p0 = pneg %p3275_p11  ;;  %p3043_p6 = scmp.lt.s32.totalorder %s3034_s28, %s3034_s28 }
  0x1c   : > { %p3037_p3 = pnand %p3036_p0, %p3035_p13  ;;  %p3044_p9 = por %p3043_p6, %p3042_p7 }
  0x1e   : > { %p3038_p5 = pneg %p3037_p3 }
  0x20   : > { %p3045_p4 = pnand %p3044_p9, %p3038_p5 }
  0x22   : > { %3048 = shalt.err (!%p3045_p4)
}
  0x23   : > { %s3167_s29 = smov [#allocation10]   ;;  %s5605_s26 = smov (%p33_p12, %s31_s26), 0 }
  0x24   : > { %2928 = dma.vmem_to_smem (!%p3275_p11), %s125_s23, 16, %s3167_s29, [#allocation9]  }
  0x25   : > { %5487 = sst [smem:[#allocation18_spill]] %s5605_s26  ;;  %p47_p10 = scmp.ne.s32.totalorder %s3153_s11, %s3149_s10 }
  0x26   : > { %p48_p6 = scmp.eq.s32.totalorder %s3165_s14, 0  ;;  %s35_s30 = ssub.s32 %s3161_s13, %s5605_s26 }
  0x27   : > { %p2938_p4 = scmp.lt.s32.totalorder %s3165_s14, 2  ;;  %p38_p9 = scmp.eq.s32.totalorder %s35_s30, 0 }
  0x28   : > { %p49_p13 = por %p48_p6, %p47_p10  ;;  %p3295_p0 = por %p3247_p2, %p47_p10 }
  0x29   : > { %s135_s4 = sand.u32 1, %s3153_s11   ;;  %s2915_s7 = sshll.u32 %s3161_s13, 7 }
  0x2a   : > { %s5488_s3 = scalar_select %p3295_p0, 1, 0 }
  0x2b   : > { %s3301_s5 = scalar_select %p38_p9, %s3153_s11, %s40_s27  }
  0x2c   : > { %s2769_s6 = sshll.u32 %s135_s4, 3  ;;  %s5490_s0 = sld [smem:[#allocation33_spill]] }
  0x2d   : > { %5489 = sst [smem:[#allocation19_spill]] %s3301_s5  ;;  %s139_s21 = scalar_lea.vmem [#allocation6], %s2769_s6 }
  0x2e   : > { %s149_s18 = sshll.u32 %s139_s21, 4  ;;  %p3311_p2 = pnand %p2938_p4, %p49_p13  ;;  %s3309_s18 = int_to_ptr.vmem [resolvable:$true] %s149_s18 }
  0x2f   : > { %s136_s23 = scalar_lea.sflag [#allocation7], %s135_s4 }
  0x30   : > { %p3051_p12 = pneg %p3311_p2 }
  0x32   : > { %s3307_s16 = scalar_lea.hbm %s5490_s0, %s2915_s7  ;;  %s3054_s29 = scalar_lea.hbm %s5490_s0, 256 }
  0x33   : > { %s3049_s25 = scalar_lea.hbm %s3307_s16, 128  ;;  %p3055_p7 = scmp.lt.u32.totalorder %s3307_s16, %s5490_s0 }
  0x34   : > { %p3050_p11 = scmp.ne.s32.totalorder %s3307_s16, %s3049_s25  ;;  %p3056_p10 = scmp.lt.u32.totalorder %s3054_s29, %s3049_s25 }
  0x35   : > { %p3058_p4 = scmp.lt.u32.totalorder %s3049_s25, %s3307_s16 }
  0x36   : > { %p3052_p3 = pnand %p3051_p12, %p3050_p11  ;;  %p3057_p6 = por %p3056_p10, %p3055_p7 }
  0x38   : > { %p3053_p5 = pneg %p3052_p3  ;;  %p3059_p9 = por %p3058_p4, %p3057_p6 }
  0x3a   : > { %p3060_p13 = pnand %p3059_p9, %p3053_p5 }
  0x3c   : > { %3063 = shalt.err (!%p3060_p13)
}
  0x3d   : > { %s3064_s4 = scalar_lea.vmem %s3309_s18, 128  ;;  %s3168_s7 = smov [#allocation6]  }
  0x3e   : > { %p3065_p11 = scmp.ne.s32.totalorder %s3309_s18, %s3064_s4  ;;  %s3069_s8 = sshll.u32 %s3168_s7, 4  ;;  %s3070_s8 = int_to_ptr.vmem [resolvable:$false] %s3069_s8 }
  0x3f   : > { %s3071_s15 = scalar_lea.vmem %s3070_s8, 256  ;;  %p3072_p1 = scmp.lt.s32.totalorder %s3309_s18, %s3070_s8 }
  0x40   : > { %p3067_p3 = pnand %p3065_p11, %p3051_p12  ;;  %p3073_p7 = scmp.lt.s32.totalorder %s3071_s15, %s3064_s4 }
  0x42   : > { %p3068_p0 = pneg %p3067_p3  ;;  %p3074_p10 = por %p3073_p7, %p3072_p1 }
  0x44   : > { %p3075_p6 = pnand %p3074_p10, %p3068_p0 }
  0x46   : > { %3078 = shalt.err (!%p3075_p6)
}
  0x47   : > { %2932 = dma.hbm_to_vmem [thread:$0]  (!%p3311_p2), %s3307_s16, 128, %s3309_s18, %s136_s23  }
  0x48   : > { %158 = sbr.rel (%p3266_p8) target bundleno = 932 (0x3a4), region = 28 }
  0x4f   : > { %s3343_s21 = sand.u32 1, %s3149_s10   ;;  %p5492_p1 = scmp.ne.s32.totalorder %s5482_s19, 0 }
  0x50   : > { %s2773_s25 = sshll.u32 %s3343_s21, 3  ;;  %s161_s27 = scalar_lea.sflag [#allocation7], %s3343_s21 }
  0x51   : > { %s164_s28 = scalar_lea.vmem [#allocation6], %s2773_s25 }
  0x52   : > { %3132 = dma.done.wait (%p5492_p1), %s161_s27, 128  }
  0x53   : > { %3134 = vsyncadd (%p5492_p1), %s161_s27, 4294967168  ;;  %p5493_p0 = scmp.ne.s32.totalorder %s5480_s17, 0 }
  0x55   : > { %3136 = dma.done.wait (%p5493_p0), [#allocation9], 16  }
  0x56   : > { %3138 = vsyncadd (%p5493_p0), [#allocation9], 4294967280 }
  0x57   : > { %173 = sfence }
  0x58   : > { %v5457_v0 = vlaneseq  ;;  %v3169_v2 = vmov 0.0   ;;  %v3170_v3 = vmov -inf   ;;  %vm226_vm1 = vcmask 179200   ;;  %v202_v4 = vld [vmem:[%s164_s28] ss:$4 sm:$0x3] }
  0x59   : > { %227 = vst.msk [vmem:[#allocation4] sm:$0xff] %vm226_vm1, %v3169_v2  ;;  %228 = vst.msk [vmem:[#allocation4 + $0x8] sm:$0xff] %vm226_vm1, %v3169_v2  ;;  %v2776_v5 = vld [vmem:[%s164_s28 + $0x1] ss:$4 sm:$0x3]  ;;  %s3171_s17 = smov 115  }
  0x5a   : > { %vm3356_vm0 = vcmp.lt.s32.totalorder %v5457_v0, 256  ;;  %231 = vst.msk [vmem:[#allocation5] sm:$0xff] %vm226_vm1, %v3169_v2  ;;  %232 = vst.msk [vmem:[#allocation5 + $0x8] sm:$0xff] %vm226_vm1, %v3169_v2  ;;  %v2777_v10 = vld [vmem:[%s164_s28 + $0x2] ss:$4 sm:$0x3] }
  0x5b   : > { %198 = vst.msk [vmem:[#allocation2] sm:$0x3] %vm3356_vm0, %v3169_v2  ;;  %199 = vst.msk [vmem:[#allocation3] sm:$0x3] %vm3356_vm0, %v3170_v3  ;;  %s3172_s19 = smov 3   ;;  %s3173_s24 = smov 99  }
  0x5c   : > { %v2778_v13 = vld [vmem:[%s164_s28 + $0x3] ss:$4 sm:$0x3]  ;;  %s3174_s16 = smov 83   ;;  %s3175_s18 = smov 67   ;;  %vm229_vm2 = vcmask 177152  }
  0x5d   : > { %s3176_s22 = smov 51   ;;  %s3177_s23 = smov 35   ;;  %230 = vst.msk [vmem:[#allocation4 + $0x10] sm:$0x3f] %vm229_vm2, %v3169_v2  ;;  %233 = vst.msk [vmem:[#allocation5 + $0x10] sm:$0x3f] %vm229_vm2, %v3169_v2 }
  0x5e   : > { %s3178_s29 = smov 19   ;;  %vm243_vm3 = vcmask 147480   ;;  %s3392_s30 = sld [smem:[#allocation10 + $0x1]]  ;;  %vm582_vm4 = vcmask 1046528   ;;  %vm617_vm5 = vcmask 1045504   ;;  %vm652_vm6 = vcmask 1044480  }
  0x5f   : > { %s3396_s6 = sld [smem:[#allocation10 + $0x32]]  ;;  %s3411_s7 = sld [smem:[#allocation10 + $0x33]]  ;;  %vm687_vm7 = vcmask 1043456   ;;  %vm722_vm8 = vcmask 1042432   ;;  %vm757_vm9 = vcmask 1041408  }
  0x60   : > { %s3401_s4 = sld [smem:[#allocation10 + $0x2]]  ;;  %s3179_s8 = smov 127  }
  0x61   : > { %s3180_s15 = smov 126   ;;  %s2826_s25 = sld [smem:[#allocation10 + $0x8]] }
  0x62   : > { %v200_v6 = vld [vmem:[#allocation2] sm:$0x3]  ;;  %v201_v7 = vld [vmem:[#allocation3] sm:$0x3]  ;;  %s2827_s27 = sld [smem:[#allocation10 + $0x39]]  ;;  %s2828_s28 = sld [smem:[#allocation10 + $0xf]] }
  0x63   : > { %v203_v8 = vadd.f32 %v202_v4, %v200_v6  ;;  %v204_v9 = vmax.f32 %v201_v7, %v202_v4  ;;  %s3772_s0 = sld [smem:[#allocation10 + $0x2a]]  ;;  %s3779_s1 = sld [smem:[#allocation10 + $0x5b]] }
  0x64   : > { %v785_v34 = vstv %s3392_s30  ;;  %s2837_s30 = sld [smem:[#allocation10 + $0x5c]]  ;;  %s3795_s26 = sld [smem:[#allocation10 + $0x50]] }
  0x65   : > { %v207_v11 = vadd.f32 %v2776_v5, %v203_v8  ;;  %v208_v12 = vmax.f32 %v204_v9, %v2776_v5  ;;  %v798_v40 = vstv %s3396_s6  ;;  %v1078_v48 = vstv %s3411_s7  ;;  %s2840_s6 = sld [smem:[#allocation10 + $0x9]]  ;;  %s2842_s7 = sld [smem:[#allocation10 + $0x10]] }
  0x66   : > { %v1065_v44 = vstv %s3401_s4  ;;  %s2841_s4 = sld [smem:[#allocation10 + $0x3a]]  ;;  %s3797_s13 = sld [smem:[#allocation10 + $0x26]] }
  0x67   : > { %v211_v14 = vadd.f32 %v2777_v10, %v207_v11  ;;  %v212_v15 = vmax.f32 %v208_v12, %v2777_v10  ;;  %v813_v56 = vstv %s2826_s25  ;;  %s2843_s25 = sld [smem:[#allocation10 + $0x41]]  ;;  %s3806_s5 = sld [smem:[#allocation10 + $0x57]] }
  0x68   : > { %v833_v9 = vstv %s2827_s27  ;;  %v855_v12 = vstv %s2828_s28  ;;  %s2844_s27 = sld [smem:[#allocation10 + $0x17]]  ;;  %s2845_s28 = sld [smem:[#allocation10 + $0x48]] }
  0x69   : > { %v215_v16 = vadd.f32 %v2778_v13, %v211_v14  ;;  %v216_v17 = vmax.f32 %v212_v15, %v2778_v13  ;;  %s3808_s11 = sld [smem:[#allocation10 + $0x2d]]  ;;  %s3826_s10 = sld [smem:[#allocation10 + $0x4]] }
  0x6a   : > { %p5596_p2 = scmp.ne.s32.totalorder %s5488_s3, 0 }
  0x6b   : > { %221 = vst.msk [vmem:[#allocation2] sm:$0x3] %vm3356_vm0, %v215_v16  ;;  %222 = vst.msk [vmem:[#allocation3] sm:$0x3] %vm3356_vm0, %v216_v17 }
  0x72   : > { %v2781_v18 = vld [vmem:[#allocation2] ss:$0 sm:$0xff]  ;;  %v2782_v19 = vld [vmem:[#allocation3] ss:$0 sm:$0xff]  ;;  %v2796_v20 = vld [vmem:[#allocation3 + $0x1] ss:$0 sm:$0xff] }
  0x73   : > { %261 = vrot.lane.b32.xlu1 %v2781_v18, %s3171_s17  ;;  %240 = vrot.lane.b32.xlu0 %v2781_v18, %s3172_s19  ;;  %v2795_v21 = vld [vmem:[#allocation2 + $0x1] ss:$0 sm:$0xff] }
  0x77   : > { %271 = vrot.lane.b32.xlu1 %v2782_v19, %s3171_s17  ;;  %251 = vrot.lane.b32.xlu0 %v2782_v19, %s3172_s19 }
  0x7b   : > { %291 = vrot.lane.b32.xlu1 %v2782_v19, %s3173_s24  ;;  %281 = vrot.lane.b32.xlu0 %v2781_v18, %s3173_s24 }
  0x7f   : > { %311 = vrot.lane.b32.xlu1 %v2782_v19, %s3174_s16  ;;  %301 = vrot.lane.b32.xlu0 %v2781_v18, %s3174_s16 }
  0x83   : > { %331 = vrot.lane.b32.xlu1 %v2782_v19, %s3175_s18  ;;  %321 = vrot.lane.b32.xlu0 %v2781_v18, %s3175_s18 }
  0x87   : > { %351 = vrot.lane.b32.xlu1 %v2782_v19, %s3176_s22  ;;  %341 = vrot.lane.b32.xlu0 %v2781_v18, %s3176_s22 }
  0x8b   : > { %371 = vrot.lane.b32.xlu1 %v2782_v19, %s3177_s23  ;;  %361 = vrot.lane.b32.xlu0 %v2781_v18, %s3177_s23 }
  0x8f   : > { %391 = vrot.lane.b32.xlu1 %v2782_v19, %s3178_s29  ;;  %381 = vrot.lane.b32.xlu0 %v2781_v18, %s3178_s29 }
  0x93   : > { %411 = vrot.lane.b32.xlu1 %v2796_v20, %s3172_s19  ;;  %401 = vrot.lane.b32.xlu0 %v2795_v21, %s3172_s19  ;;  %s2830_s19 = sld [smem:[#allocation10 + $0x16]] }
  0x97   : > { %441 = vrot.lane.b32.xlu1 %v2795_v21, %s3173_s24  ;;  %421 = vrot.lane.b32.xlu0 %v2795_v21, %s3171_s17 }
  0x9b   : > { %481 = vrot.lane.b32.xlu1 %v2795_v21, %s3175_s18  ;;  %461 = vrot.lane.b32.xlu0 %v2795_v21, %s3174_s16 }
  0x9f   : > { %521 = vrot.lane.b32.xlu1 %v2795_v21, %s3177_s23  ;;  %501 = vrot.lane.b32.xlu0 %v2795_v21, %s3176_s22 }
  0xa3   : > { %431 = vrot.lane.b32.xlu1 %v2796_v20, %s3171_s17  ;;  %541 = vrot.lane.b32.xlu0 %v2795_v21, %s3178_s29  ;;  %s2829_s17 = sld [smem:[#allocation10 + $0x40]] }
  0xa7   : > { %471 = vrot.lane.b32.xlu1 %v2796_v20, %s3174_s16  ;;  %451 = vrot.lane.b32.xlu0 %v2796_v20, %s3173_s24  ;;  %s2831_s24 = sld [smem:[#allocation10 + $0x47]]  ;;  %s2832_s16 = sld [smem:[#allocation10 + $0x1d]] }
  0xab   : > { %511 = vrot.lane.b32.xlu1 %v2796_v20, %s3176_s22  ;;  %491 = vrot.lane.b32.xlu0 %v2796_v20, %s3175_s18  ;;  %s2833_s18 = sld [smem:[#allocation10 + $0x4e]]  ;;  %s2834_s22 = sld [smem:[#allocation10 + $0x24]] }
  0xaf   : > { %551 = vrot.lane.b32.xlu1 %v2796_v20, %s3178_s29  ;;  %531 = vrot.lane.b32.xlu0 %v2796_v20, %s3177_s23  ;;  %v875_v20 = vstv %s2829_s17  ;;  %s2835_s23 = sld [smem:[#allocation10 + $0x55]]  ;;  %s2836_s29 = sld [smem:[#allocation10 + $0x2b]] }
  0xb0   : > { %s2846_s17 = sld [smem:[#allocation10 + $0x1e]] }
  0xe5   : > { %v262_v22 = vpop.permute.xlu1 %261  ;;  %v241_v23 = vpop.permute.xlu0 %240 }
  0xe6   : > { %264 = vst.msk [vmem:[#allocation4 + $0x4] sm:$0x1] %vm243_vm3, %v262_v22  ;;  %244 = vst.msk [vmem:[#allocation4 + $0x3] sm:$0x1] %vm243_vm3, %v241_v23 }
  0xe9   : > { %v272_v24 = vpop.permute.xlu1 %271  ;;  %v252_v25 = vpop.permute.xlu0 %251 }
  0xea   : > { %274 = vst.msk [vmem:[#allocation5 + $0x4] sm:$0x1] %vm243_vm3, %v272_v24  ;;  %254 = vst.msk [vmem:[#allocation5 + $0x3] sm:$0x1] %vm243_vm3, %v252_v25 }
  0xed   : > { %v292_v26 = vpop.permute.xlu1 %291  ;;  %v282_v27 = vpop.permute.xlu0 %281 }
  0xee   : > { %294 = vst.msk [vmem:[#allocation5 + $0x5] sm:$0x1] %vm243_vm3, %v292_v26  ;;  %284 = vst.msk [vmem:[#allocation4 + $0x5] sm:$0x1] %vm243_vm3, %v282_v27 }
  0xf1   : > { %v312_v28 = vpop.permute.xlu1 %311  ;;  %v302_v29 = vpop.permute.xlu0 %301 }
  0xf2   : > { %314 = vst.msk [vmem:[#allocation5 + $0x6] sm:$0x1] %vm243_vm3, %v312_v28  ;;  %304 = vst.msk [vmem:[#allocation4 + $0x6] sm:$0x1] %vm243_vm3, %v302_v29  ;;  %v897_v29 = vstv %s2830_s19  ;;  %s2847_s19 = sld [smem:[#allocation10 + $0x4f]] }
  0xf5   : > { %v332_v30 = vpop.permute.xlu1 %331  ;;  %v322_v31 = vpop.permute.xlu0 %321 }
  0xf6   : > { %334 = vst.msk [vmem:[#allocation5 + $0x7] sm:$0x1] %vm243_vm3, %v332_v30  ;;  %324 = vst.msk [vmem:[#allocation4 + $0x7] sm:$0x1] %vm243_vm3, %v322_v31 }
  0xf9   : > { %v352_v32 = vpop.permute.xlu1 %351  ;;  %v342_v33 = vpop.permute.xlu0 %341 }
  0xfa   : > { %354 = vst.msk [vmem:[#allocation5 + $0x8] sm:$0x1] %vm243_vm3, %v352_v32  ;;  %344 = vst.msk [vmem:[#allocation4 + $0x8] sm:$0x1] %vm243_vm3, %v342_v33 }
  0xfd   : > { %v3403_v35 = vld [vmem:[#allocation4] sm:$0xff]  ;;  %v372_v36 = vpop.permute.xlu1 %371  ;;  %v362_v37 = vpop.permute.xlu0 %361  ;;  %v3408_v39 = vld [vmem:[#allocation5] sm:$0xff] }
  0xfe   : > { %374 = vst.msk [vmem:[#allocation5 + $0x9] sm:$0x1] %vm243_vm3, %v372_v36  ;;  %364 = vst.msk [vmem:[#allocation4 + $0x9] sm:$0x1] %vm243_vm3, %v362_v37  ;;  %v786_v38 = vmul.f32 %v785_v34, %v3403_v35  ;;  %v799_v43 = vmul.f32 %v798_v40, %v3408_v39  ;;  %v1066_v47 = vmul.f32 %v1065_v44, %v3403_v35 }
  0xff   : > { %v1079_v51 = vmul.f32 %v1078_v48, %v3408_v39  ;;  %v814_v57 = vmul.f32 %v813_v56, %v3403_v35  ;;  %v834_v10 = vmul.f32 %v833_v9, %v3408_v39  ;;  %v856_v19 = vmul.f32 %v855_v12, %v3403_v35 }
 0x100   : > { %790 = vrot.lane.b32.xlu0 %v786_v38, %s3179_s8  ;;  %v876_v28 = vmul.f32 %v875_v20, %v3408_v39  ;;  %v898_v38 = vmul.f32 %v897_v29, %v3403_v35 }
 0x101   : > { %v392_v41 = vpop.permute.xlu1 %391  ;;  %v382_v42 = vpop.permute.xlu0 %381  ;;  %v820_v63 = vrot.slane %v814_v57, 1  ;;  %v840_v17 = vrot.slane %v834_v10, 1  ;;  %v862_v27 = vrot.slane %v856_v19, 2 }
 0x102   : > { %394 = vst.msk [vmem:[#allocation5 + $0xa] sm:$0x1] %vm243_vm3, %v392_v41  ;;  %384 = vst.msk [vmem:[#allocation4 + $0xa] sm:$0x1] %vm243_vm3, %v382_v42  ;;  %v882_v37 = vrot.slane %v876_v28, 2 }
 0x104   : > { %803 = vrot.lane.b32.xlu0 %v799_v43, %s3179_s8 }
 0x105   : > { %v412_v45 = vpop.permute.xlu1 %411  ;;  %v402_v46 = vpop.permute.xlu0 %401 }
 0x106   : > { %414 = vst.msk [vmem:[#allocation5 + $0xb] sm:$0x1] %vm243_vm3, %v412_v45  ;;  %404 = vst.msk [vmem:[#allocation4 + $0xb] sm:$0x1] %vm243_vm3, %v402_v46 }
 0x108   : > { %1070 = vrot.lane.b32.xlu0 %v1066_v47, %s3180_s15  ;;  %v904_v47 = vrot.slane %v898_v38, 3 }
 0x109   : > { %v442_v49 = vpop.permute.xlu1 %441  ;;  %v422_v50 = vpop.permute.xlu0 %421 }
 0x10a   : > { %444 = vst.msk [vmem:[#allocation4 + $0xd] sm:$0x1] %vm243_vm3, %v442_v49  ;;  %424 = vst.msk [vmem:[#allocation4 + $0xc] sm:$0x1] %vm243_vm3, %v422_v50  ;;  %v939_v49 = vstv %s2832_s16  ;;  %s2850_s16 = sld [smem:[#allocation10 + $0x2c]] }
 0x10b   : > { %v940_v57 = vmul.f32 %v939_v49, %v3403_v35 }
 0x10c   : > { %1083 = vrot.lane.b32.xlu0 %v1079_v51, %s3180_s15 }
 0x10d   : > { %v482_v52 = vpop.permute.xlu1 %481  ;;  %v462_v53 = vpop.permute.xlu0 %461 }
 0x10e   : > { %484 = vst.msk [vmem:[#allocation4 + $0xf] sm:$0x1] %vm243_vm3, %v482_v52  ;;  %464 = vst.msk [vmem:[#allocation4 + $0xe] sm:$0x1] %vm243_vm3, %v462_v53 }
 0x111   : > { %v522_v54 = vpop.permute.xlu1 %521  ;;  %v502_v55 = vpop.permute.xlu0 %501 }
 0x112   : > { %524 = vst.msk [vmem:[#allocation4 + $0x11] sm:$0x1] %vm243_vm3, %v522_v54  ;;  %504 = vst.msk [vmem:[#allocation4 + $0x10] sm:$0x1] %vm243_vm3, %v502_v55 }
 0x115   : > { %v3439_v58 = vld [vmem:[#allocation4 + $0x8] sm:$0xff]  ;;  %v432_v59 = vpop.permute.xlu1 %431  ;;  %v542_v60 = vpop.permute.xlu0 %541 }
 0x116   : > { %434 = vst.msk [vmem:[#allocation5 + $0xc] sm:$0x1] %vm243_vm3, %v432_v59  ;;  %544 = vst.msk [vmem:[#allocation4 + $0x12] sm:$0x1] %vm243_vm3, %v542_v60  ;;  %v787_v61 = vmul.f32 %v785_v34, %v3439_v58  ;;  %v3445_v62 = vmul.f32 %v813_v56, %v3439_v58  ;;  %v3467_v15 = vmul.f32 %v855_v12, %v3439_v58  ;;  %v959_v59 = vstv %s2833_s18  ;;  %s2851_s18 = sld [smem:[#allocation10 + $0x5d]] }
 0x117   : > { %v1067_v22 = vmul.f32 %v1065_v44, %v3439_v58  ;;  %v3493_v33 = vmul.f32 %v897_v29, %v3439_v58  ;;  %v3514_v52 = vmul.f32 %v939_v49, %v3439_v58 }
 0x118   : > { %792 = vrot.lane.b32.xlu1 %v787_v61, %s3179_s8  ;;  %v821_v1 = vrot.slane %v3445_v62, 1  ;;  %v863_v23 = vrot.slane %v3467_v15, 2  ;;  %v1001_v15 = vstv %s2835_s23  ;;  %s2854_s23 = sld [smem:[#allocation10 + $0xa]] }
 0x119   : > { %v472_v2 = vpop.permute.xlu1 %471  ;;  %v452_v3 = vpop.permute.xlu0 %451  ;;  %v905_v42 = vrot.slane %v3493_v33, 3  ;;  %v947_v61 = vrot.slane %v3514_v52, 4 }
 0x11a   : > { %474 = vst.msk [vmem:[#allocation5 + $0xe] sm:$0x1] %vm243_vm3, %v472_v2  ;;  %454 = vst.msk [vmem:[#allocation5 + $0xd] sm:$0x1] %vm243_vm3, %v452_v3  ;;  %v822_v4 = vsel %vm582_vm4, %v820_v63, %v821_v1  ;;  %v864_v30 = vsel %vm617_vm5, %v862_v27, %v863_v23  ;;  %v946_v3 = vrot.slane %v940_v57, 4 }
 0x11b   : > { %825 = vrot.lane.b32.xlu0 %v822_v4, %s3179_s8  ;;  %v906_v50 = vsel %vm652_vm6, %v904_v47, %v905_v42  ;;  %v960_v4 = vmul.f32 %v959_v59, %v3408_v39 }
 0x11d   : > { %v512_v5 = vpop.permute.xlu1 %511  ;;  %v492_v6 = vpop.permute.xlu0 %491  ;;  %v3469_v16 = vld [vmem:[#allocation4 + $0x10] sm:$0x3f] }
 0x11e   : > { %514 = vst.msk [vmem:[#allocation5 + $0x10] sm:$0x1] %vm243_vm3, %v512_v5  ;;  %494 = vst.msk [vmem:[#allocation5 + $0xf] sm:$0x1] %vm243_vm3, %v492_v6  ;;  %v816_v25 = vmul.f32 %v813_v56, %v3469_v16  ;;  %v858_v46 = vmul.f32 %v855_v12, %v3469_v16  ;;  %v900_v2 = vmul.f32 %v897_v29, %v3469_v16  ;;  %v981_v5 = vstv %s2834_s22  ;;  %s3677_s22 = sld [smem:[#allocation10 + $0x3]] }
 0x11f   : > { %v948_v6 = vsel %vm687_vm7, %v946_v3, %v947_v61 }
 0x120   : > { %v823_v34 = vrot.slane %v816_v25, 1  ;;  %v865_v54 = vrot.slane %v858_v46, 2  ;;  %v907_v10 = vrot.slane %v900_v2, 3  ;;  %v1023_v25 = vstv %s2836_s29  ;;  %s3686_s29 = sld [smem:[#allocation10 + $0x34]] }
 0x121   : > { %v552_v7 = vpop.permute.xlu1 %551  ;;  %v532_v8 = vpop.permute.xlu0 %531  ;;  %v3554_v29 = vmul.f32 %v1023_v25, %v3439_v58  ;;  %v1093_v46 = vstv %s2840_s6  ;;  %v1135_v2 = vstv %s2842_s7  ;;  %s2856_s6 = sld [smem:[#allocation10 + $0x11]]  ;;  %s3717_s7 = sld [smem:[#allocation10 + $0x42]] }
 0x122   : > { %554 = vst.msk [vmem:[#allocation5 + $0x12] sm:$0x1] %vm243_vm3, %v552_v7  ;;  %534 = vst.msk [vmem:[#allocation5 + $0x11] sm:$0x1] %vm243_vm3, %v532_v8  ;;  %v824_v44 = vsel %vm582_vm4, %v821_v1, %v823_v34  ;;  %v866_v63 = vsel %vm617_vm5, %v863_v23, %v865_v54  ;;  %v3534_v8 = vmul.f32 %v981_v5, %v3439_v58 }
 0x123   : > { %v1024_v34 = vmul.f32 %v1023_v25, %v3403_v35  ;;  %v1031_v38 = vrot.slane %v3554_v29, 6  ;;  %v1094_v54 = vmul.f32 %v1093_v46, %v3403_v35 }
 0x125   : > { %v3460_v11 = vld [vmem:[#allocation5 + $0x8] sm:$0xff] }
 0x126   : > { %v800_v13 = vmul.f32 %v798_v40, %v3460_v11  ;;  %v835_v14 = vmul.f32 %v833_v9, %v3460_v11  ;;  %v3479_v24 = vmul.f32 %v875_v20, %v3460_v11  ;;  %v1080_v31 = vmul.f32 %v1078_v48, %v3460_v11 }
 0x127   : > { %v917_v40 = vstv %s2831_s24  ;;  %v3524_v62 = vmul.f32 %v959_v59, %v3460_v11  ;;  %v3544_v19 = vmul.f32 %v1001_v15, %v3460_v11  ;;  %s2849_s24 = sld [smem:[#allocation10 + $0x56]] }
 0x128   : > { %805 = vrot.lane.b32.xlu1 %v800_v13, %s3179_s8  ;;  %v841_v18 = vrot.slane %v835_v14, 1  ;;  %v883_v32 = vrot.slane %v3479_v24, 2  ;;  %v3502_v43 = vmul.f32 %v917_v40, %v3460_v11  ;;  %v918_v48 = vmul.f32 %v917_v40, %v3408_v39 }
 0x129   : > { %v3483_v26 = vld [vmem:[#allocation5 + $0x10] sm:$0x3f]  ;;  %v967_v7 = vrot.slane %v3524_v62, 4  ;;  %v966_v13 = vrot.slane %v960_v4, 4  ;;  %v982_v14 = vmul.f32 %v981_v5, %v3403_v35  ;;  %v1002_v24 = vmul.f32 %v1001_v15, %v3408_v39 }
 0x12a   : > { %v842_v21 = vsel %vm582_vm4, %v840_v17, %v841_v18  ;;  %v836_v36 = vmul.f32 %v833_v9, %v3483_v26  ;;  %v884_v41 = vsel %vm617_vm5, %v882_v37, %v883_v32  ;;  %v925_v51 = vrot.slane %v3502_v43, 3 }
 0x12b   : > { %845 = vrot.lane.b32.xlu0 %v842_v21, %s3179_s8  ;;  %v878_v55 = vmul.f32 %v875_v20, %v3483_v26  ;;  %v924_v56 = vrot.slane %v918_v48, 3  ;;  %v920_v12 = vmul.f32 %v917_v40, %v3483_v26  ;;  %v968_v17 = vsel %vm687_vm7, %v966_v13, %v967_v7 }
 0x12c   : > { %1072 = vrot.lane.b32.xlu1 %v1067_v22, %s3180_s15  ;;  %v843_v45 = vrot.slane %v836_v36, 1  ;;  %v908_v20 = vsel %vm652_vm6, %v905_v42, %v907_v10  ;;  %v942_v22 = vmul.f32 %v939_v49, %v3469_v16  ;;  %v988_v23 = vrot.slane %v982_v14, 5 }
 0x12d   : > { %v926_v60 = vsel %vm652_vm6, %v924_v56, %v925_v51  ;;  %v885_v1 = vrot.slane %v878_v55, 2  ;;  %v927_v21 = vrot.slane %v920_v12, 3  ;;  %v1009_v28 = vrot.slane %v3544_v19, 5 }
 0x12e   : > { %v844_v53 = vsel %vm582_vm4, %v841_v18, %v843_v45  ;;  %v989_v18 = vrot.slane %v3534_v8, 5  ;;  %v1008_v33 = vrot.slane %v1002_v24, 5  ;;  %v1043_v36 = vstv %s2837_s30  ;;  %s2855_s30 = sld [smem:[#allocation10 + $0x3b]] }
 0x12f   : > { %867 = vrot.lane.b32.xlu0 %v864_v30, %s3179_s8  ;;  %v886_v9 = vsel %vm617_vm5, %v883_v32, %v885_v1  ;;  %v928_v30 = vsel %vm652_vm6, %v925_v51, %v927_v21  ;;  %v962_v32 = vmul.f32 %v959_v59, %v3483_v26  ;;  %v3564_v40 = vmul.f32 %v1043_v36, %v3460_v11 }
 0x130   : > { %1085 = vrot.lane.b32.xlu1 %v1080_v31, %s3180_s15  ;;  %v990_v27 = vsel %vm722_vm8, %v988_v23, %v989_v18  ;;  %v949_v31 = vrot.slane %v942_v22, 4  ;;  %v1010_v37 = vsel %vm722_vm8, %v1008_v33, %v1009_v28  ;;  %v984_v43 = vmul.f32 %v981_v5, %v3469_v16 }
 0x131   : > { %v969_v42 = vrot.slane %v962_v32, 4  ;;  %v1044_v45 = vmul.f32 %v1043_v36, %v3408_v39  ;;  %v1051_v48 = vrot.slane %v3564_v40, 6  ;;  %v3574_v49 = vmul.f32 %v1093_v46, %v3439_v58 }
 0x132   : > { %v991_v51 = vrot.slane %v984_v43, 5  ;;  %v1004_v52 = vmul.f32 %v1001_v15, %v3483_v26  ;;  %v1113_v55 = vstv %s2841_s4  ;;  %v1026_v62 = vmul.f32 %v1023_v25, %v3469_v16  ;;  %s5451_s4 = smov 125  }
 0x133   : > { %887 = vrot.lane.b32.xlu0 %v884_v41, %s3179_s8  ;;  %v950_v41 = vsel %vm687_vm7, %v947_v61, %v949_v31  ;;  %v1101_v57 = vrot.slane %v3574_v49, 1  ;;  %v3584_v59 = vmul.f32 %v1113_v55, %v3460_v11  ;;  %v1114_v1 = vmul.f32 %v1113_v55, %v3408_v39 }
 0x134   : > { %827 = vrot.lane.b32.xlu1 %v824_v44, %s3179_s8  ;;  %v1030_v44 = vrot.slane %v1024_v34, 6  ;;  %v1011_v61 = vrot.slane %v1004_v52, 5  ;;  %v3594_v5 = vmul.f32 %v1135_v2, %v3439_v58  ;;  %v1046_v8 = vmul.f32 %v1043_v36, %v3483_v26 }
 0x135   : > { %v1121_v4 = vrot.slane %v3584_v59, 1  ;;  %v1136_v10 = vmul.f32 %v1135_v2, %v3403_v35  ;;  %v1155_v12 = vstv %s2843_s25  ;;  %v1096_v19 = vmul.f32 %v1093_v46, %v3469_v16  ;;  %s3719_s25 = sld [smem:[#allocation10]] }
 0x136   : > { %v1032_v47 = vsel %vm757_vm9, %v1030_v44, %v1031_v38  ;;  %v1143_v14 = vrot.slane %v3594_v5, 2  ;;  %v3604_v15 = vmul.f32 %v1155_v12, %v3460_v11  ;;  %v1156_v21 = vmul.f32 %v1155_v12, %v3408_v39 }
 0x137   : > { %909 = vrot.lane.b32.xlu0 %v906_v50, %s3179_s8  ;;  %v970_v50 = vsel %vm687_vm7, %v967_v7, %v969_v42  ;;  %v1033_v7 = vrot.slane %v1026_v62, 6  ;;  %v1177_v22 = vstv %s2844_s27  ;;  %v1116_v29 = vmul.f32 %v1113_v55, %v3483_v26  ;;  %s3726_s27 = sld [smem:[#allocation10 + $0x31]] }
 0x138   : > { %847 = vrot.lane.b32.xlu1 %v844_v53, %s3179_s8  ;;  %v1050_v53 = vrot.slane %v1044_v45, 6  ;;  %v1163_v24 = vrot.slane %v3604_v15, 2  ;;  %v3614_v25 = vmul.f32 %v1177_v22, %v3439_v58  ;;  %v1178_v31 = vmul.f32 %v1177_v22, %v3403_v35 }
 0x139   : > { %v1197_v32 = vstv %s2845_s28  ;;  %v1138_v40 = vmul.f32 %v1135_v2, %v3469_v16  ;;  %v1219_v43 = vstv %s2846_s17  ;;  %v1158_v49 = vmul.f32 %v1155_v12, %v3483_v26  ;;  %s3728_s28 = sld [smem:[#allocation10 + $0x7]]  ;;  %s3732_s17 = sld [smem:[#allocation10 + $0x38]] }
 0x13a   : > { %v1052_v56 = vsel %vm757_vm9, %v1050_v53, %v1051_v48  ;;  %v1185_v34 = vrot.slane %v3614_v25, 3  ;;  %v3624_v36 = vmul.f32 %v1197_v32, %v3460_v11  ;;  %v1198_v42 = vmul.f32 %v1197_v32, %v3408_v39 }
 0x13b   : > { %929 = vrot.lane.b32.xlu0 %v926_v60, %s3179_s8  ;;  %v992_v60 = vsel %vm722_vm8, %v989_v18, %v991_v51  ;;  %v1053_v18 = vrot.slane %v1046_v8, 6  ;;  %v3634_v46 = vmul.f32 %v1219_v43, %v3439_v58  ;;  %v1220_v51 = vmul.f32 %v1219_v43, %v3403_v35 }
 0x13c   : > { %869 = vrot.lane.b32.xlu1 %v866_v63, %s3179_s8  ;;  %v1100_v63 = vrot.slane %v1094_v54, 1  ;;  %v1205_v45 = vrot.slane %v3624_v36, 3  ;;  %v1239_v52 = vstv %s2847_s19  ;;  %v1180_v59 = vmul.f32 %v1177_v22, %v3469_v16  ;;  %s3734_s19 = sld [smem:[#allocation10 + $0xe]] }
 0x13d   : > { %v1227_v54 = vrot.slane %v3634_v46, 4  ;;  %v1241_v55 = vmul.f32 %v1239_v52, %v3460_v11  ;;  %v1200_v5 = vmul.f32 %v1197_v32, %v3483_v26  ;;  %v1281_v8 = vstv %s2849_s24  ;;  %s3743_s24 = sld [smem:[#allocation10 + $0x18]] }
 0x13e   : > { %v1102_v3 = vsel %vm582_vm4, %v1100_v63, %v1101_v57  ;;  %v1283_v12 = vmul.f32 %v1281_v8, %v3460_v11  ;;  %v1222_v15 = vmul.f32 %v1219_v43, %v3469_v16  ;;  %v1242_v25 = vmul.f32 %v1239_v52, %v3483_v26 }
 0x13f   : > { %951 = vrot.lane.b32.xlu0 %v948_v6, %s3179_s8  ;;  %v1012_v6 = vsel %vm722_vm8, %v1009_v28, %v1011_v61  ;;  %v1103_v28 = vrot.slane %v1096_v19, 1  ;;  %v1240_v61 = vmul.f32 %v1239_v52, %v3408_v39  ;;  %v1303_v19 = vstv %s2850_s16  ;;  %s3745_s16 = sld [smem:[#allocation10 + $0x15]] }
 0x140   : > { %889 = vrot.lane.b32.xlu1 %v886_v9, %s3179_s8  ;;  %v1120_v9 = vrot.slane %v1114_v1, 1  ;;  %v1247_v1 = vrot.slane %v1241_v55, 4  ;;  %v3665_v22 = vmul.f32 %v1303_v19, %v3439_v58 }
 0x142   : > { %v1122_v13 = vsel %vm582_vm4, %v1120_v9, %v1121_v4 }
 0x143   : > { %971 = vrot.lane.b32.xlu0 %v968_v17, %s3179_s8  ;;  %v1034_v17 = vsel %vm757_vm9, %v1031_v38, %v1033_v7  ;;  %v1123_v38 = vrot.slane %v1116_v29, 1  ;;  %v1323_v29 = vstv %s2851_s18  ;;  %s3747_s18 = sld [smem:[#allocation10 + $0x46]] }
 0x144   : > { %911 = vrot.lane.b32.xlu1 %v908_v20, %s3179_s8  ;;  %v1142_v20 = vrot.slane %v1136_v10, 2  ;;  %v3675_v32 = vmul.f32 %v1323_v29, %v3460_v11 }
 0x146   : > { %v1144_v23 = vsel %vm617_vm5, %v1142_v20, %v1143_v14 }
 0x147   : > { %993 = vrot.lane.b32.xlu0 %v990_v27, %s3179_s8  ;;  %v1054_v27 = vsel %vm757_vm9, %v1051_v48, %v1053_v18  ;;  %v1145_v48 = vrot.slane %v1138_v40, 2  ;;  %v1282_v18 = vmul.f32 %v1281_v8, %v3408_v39 }
 0x148   : > { %931 = vrot.lane.b32.xlu1 %v928_v30, %s3179_s8  ;;  %v1162_v30 = vrot.slane %v1156_v21, 2  ;;  %v1289_v21 = vrot.slane %v1283_v12, 5 }
 0x14a   : > { %v1164_v33 = vsel %vm617_vm5, %v1162_v30, %v1163_v24 }
 0x14b   : > { %1013 = vrot.lane.b32.xlu0 %v1010_v37, %s3179_s8  ;;  %v1104_v37 = vsel %vm582_vm4, %v1101_v57, %v1103_v28  ;;  %v1165_v57 = vrot.slane %v1158_v49, 2  ;;  %v1304_v28 = vmul.f32 %v1303_v19, %v3403_v35 }
 0x14c   : > { %953 = vrot.lane.b32.xlu1 %v950_v41, %s3179_s8  ;;  %v1184_v41 = vrot.slane %v1178_v31, 3  ;;  %v1311_v31 = vrot.slane %v3665_v22, 6  ;;  %v5462_v22 = vstv %s3719_s25 }
 0x14e   : > { %v1186_v44 = vsel %vm652_vm6, %v1184_v41, %v1185_v34  ;;  %v1331_v41 = vrot.slane %v3675_v32, 6 }
 0x14f   : > { %1035 = vrot.lane.b32.xlu0 %v1032_v47, %s3179_s8  ;;  %v1124_v47 = vsel %vm582_vm4, %v1121_v4, %v1123_v38  ;;  %v1187_v4 = vrot.slane %v1180_v59, 3  ;;  %v1324_v38 = vmul.f32 %v1323_v29, %v3408_v39  ;;  %v1326_v59 = vmul.f32 %v1323_v29, %v3483_v26 }
 0x150   : > { %973 = vrot.lane.b32.xlu1 %v970_v50, %s3179_s8  ;;  %v1204_v50 = vrot.slane %v1198_v42, 3  ;;  %v3811_v29 = vstv %s3732_s17  ;;  %s3841_s17 = sld [smem:[#allocation10 + $0x35]] }
 0x152   : > { %v1206_v53 = vsel %vm652_vm6, %v1204_v50, %v1205_v45 }
 0x153   : > { %1055 = vrot.lane.b32.xlu0 %v1052_v56, %s3179_s8  ;;  %v1146_v56 = vsel %vm617_vm5, %v1143_v14, %v1145_v48  ;;  %v1207_v14 = vrot.slane %v1200_v5, 3 }
 0x154   : > { %995 = vrot.lane.b32.xlu1 %v992_v60, %s3179_s8  ;;  %v1226_v60 = vrot.slane %v1220_v51, 4  ;;  %v1306_v51 = vmul.f32 %v1303_v19, %v3469_v16 }
 0x156   : > { %v1228_v63 = vsel %vm687_vm7, %v1226_v60, %v1227_v54 }
 0x157   : > { %1105 = vrot.lane.b32.xlu0 %v1102_v3, %s3180_s15  ;;  %v1166_v3 = vsel %vm617_vm5, %v1163_v24, %v1165_v57  ;;  %v1229_v24 = vrot.slane %v1222_v15, 4  ;;  %v1313_v57 = vrot.slane %v1306_v51, 6 }
 0x158   : > { %1015 = vrot.lane.b32.xlu1 %v1012_v6, %s3179_s8  ;;  %v1246_v6 = vrot.slane %v1240_v61, 4 }
 0x15a   : > { %v1248_v9 = vsel %vm687_vm7, %v1246_v6, %v1247_v1 }
 0x15b   : > { %1125 = vrot.lane.b32.xlu0 %v1122_v13, %s3180_s15  ;;  %v1188_v13 = vsel %vm652_vm6, %v1185_v34, %v1187_v4  ;;  %v1249_v34 = vrot.slane %v1242_v25, 4  ;;  %v1333_v4 = vrot.slane %v1326_v59, 6  ;;  %v3801_v25 = vstv %s3728_s28  ;;  %s3824_s28 = sld [smem:[#allocation10 + $0x5e]] }
 0x15c   : > { %1037 = vrot.lane.b32.xlu1 %v1034_v17, %s3179_s8 }
 0x15d   : > { %v1250_v42 = vsel %vm687_vm7, %v1247_v1, %v1249_v34 }
 0x15f   : > { %1147 = vrot.lane.b32.xlu0 %v1144_v23, %s3180_s15  ;;  %v1208_v23 = vsel %vm652_vm6, %v1205_v45, %v1207_v14  ;;  %v1330_v45 = vrot.slane %v1324_v38, 6 }
 0x160   : > { %1057 = vrot.lane.b32.xlu1 %v1054_v27, %s3179_s8  ;;  %s2848_s8 = sld [smem:[#allocation10 + $0x25]]  ;;  %v1288_v27 = vrot.slane %v1282_v18, 5 }
 0x161   : > { %v1332_v46 = vsel %vm757_vm9, %v1330_v45, %v1331_v41 }
 0x162   : > { %v1290_v30 = vsel %vm722_vm8, %v1288_v27, %v1289_v21 }
 0x163   : > { %1167 = vrot.lane.b32.xlu0 %v1164_v33, %s3180_s15  ;;  %v1230_v33 = vsel %vm687_vm7, %v1227_v54, %v1229_v24  ;;  %v1358_v54 = vstv %s3686_s29  ;;  %s3852_s29 = sld [smem:[#allocation10 + $0xb]] }
 0x164   : > { %1107 = vrot.lane.b32.xlu1 %v1104_v37, %s3180_s15  ;;  %v1310_v37 = vrot.slane %v1304_v28, 6 }
 0x166   : > { %v1261_v62 = vstv %s2848_s8  ;;  %v1312_v40 = vsel %vm757_vm9, %v1310_v37, %v1311_v31  ;;  %s3739_s8 = sld [smem:[#allocation10 + $0x3f]]  ;;  %v1360_v37 = vmul.f32 %v1358_v54, %v3460_v11 }
 0x167   : > { %1189 = vrot.lane.b32.xlu0 %v1186_v44, %s3180_s15  ;;  %v1263_v2 = vmul.f32 %v1261_v62, %v3439_v58  ;;  %v1262_v7 = vmul.f32 %v1261_v62, %v3403_v35  ;;  %v1264_v36 = vmul.f32 %v1261_v62, %v3469_v16  ;;  %v1284_v44 = vmul.f32 %v1281_v8, %v3483_v26 }
 0x168   : > { %1127 = vrot.lane.b32.xlu1 %v1124_v47, %s3180_s15  ;;  %v1345_v47 = vstv %s3677_s22  ;;  %v1359_v62 = vmul.f32 %v1358_v54, %v3408_v39  ;;  %s3757_s22 = sld [smem:[#allocation10 + $0x1c]] }
 0x169   : > { %v1269_v10 = vrot.slane %v1263_v2, 5  ;;  %v1268_v17 = vrot.slane %v1262_v7, 5  ;;  %v1271_v43 = vrot.slane %v1264_v36, 5  ;;  %v1291_v50 = vrot.slane %v1284_v44, 5 }
 0x16a   : > { %v1346_v52 = vmul.f32 %v1345_v47, %v3403_v35  ;;  %v3741_v7 = vstv %s2856_s6  ;;  %s3767_s6 = sld [smem:[#allocation10 + $0x54]]  ;;  %v1347_v19 = vmul.f32 %v1345_v47, %v3439_v58 }
 0x16b   : > { %1209 = vrot.lane.b32.xlu0 %v1206_v53, %s3180_s15  ;;  %v1270_v20 = vsel %vm722_vm8, %v1268_v17, %v1269_v10  ;;  %v1272_v49 = vsel %vm722_vm8, %v1269_v10, %v1271_v43  ;;  %v1373_v53 = vstv %s2854_s23  ;;  %v3755_v10 = vmul.f32 %v3741_v7, %v3439_v58  ;;  %s3759_s23 = sld [smem:[#allocation10 + $0x4d]] }
 0x16c   : > { %1149 = vrot.lane.b32.xlu1 %v1146_v56, %s3180_s15  ;;  %v3703_v55 = vmul.f32 %v1373_v53, %v3439_v58  ;;  %v1292_v56 = vsel %vm722_vm8, %v1289_v21, %v1291_v50  ;;  %v1374_v60 = vmul.f32 %v1373_v53, %v3403_v35  ;;  %v1416_v15 = vmul.f32 %v3741_v7, %v3403_v35 }
 0x16d   : > { %v3775_v17 = vstv %s3717_s7  ;;  %s5497_s7 = smov 125  }
 0x16e   : > { %v1381_v1 = vrot.slane %v3703_v55, 1  ;;  %v1380_v5 = vrot.slane %v1374_v60, 1  ;;  %v3788_v21 = vmul.f32 %v3775_v17, %v3460_v11  ;;  %v1422_v27 = vrot.slane %v1416_v15, 2 }
 0x16f   : > { %1231 = vrot.lane.b32.xlu0 %v1228_v63, %s3180_s15  ;;  %v3715_v63 = vstv %s2855_s30  ;;  %s3765_s30 = sld [smem:[#allocation10 + $0x23]]  ;;  %v1436_v28 = vmul.f32 %v3775_v17, %v3408_v39  ;;  %v3855_v45 = vstv %s3757_s22  ;;  %v3922_v15 = vstv %s3808_s11  ;;  %s4409_s11 = sld [smem:[#allocation10 + $0x51]] }
 0x170   : > { %1169 = vrot.lane.b32.xlu1 %v1166_v3, %s3180_s15  ;;  %v3724_v2 = vmul.f32 %v3715_v63, %v3460_v11  ;;  %v1314_v3 = vsel %vm757_vm9, %v1311_v31, %v1313_v57  ;;  %v1394_v6 = vmul.f32 %v3715_v63, %v3408_v39  ;;  %v1382_v8 = vsel %vm582_vm4, %v1380_v5, %v1381_v1  ;;  %s4637_s22 = sld [smem:[#allocation10 + $0x3d]] }
 0x171   : > { %v3817_v31 = vstv %s3739_s8  ;;  %v5460_v38 = vrot.slane %v3788_v21, 2  ;;  %v1396_v44 = vmul.f32 %v3715_v63, %v3483_v26  ;;  %v1442_v47 = vrot.slane %v1436_v28, 2  ;;  %s3865_s8 = sld [smem:[#allocation10 + $0x12]] }
 0x172   : > { %v3694_v48 = vpop.permute.xlu0 %790  ;;  %v1400_v14 = vrot.slane %v1394_v6, 1  ;;  %v3871_v51 = vstv %s3767_s6  ;;  %s2885_s6 = sld [smem:[#allocation10 + $0x44]] }
 0x173   : > { %1251 = vrot.lane.b32.xlu0 %v1248_v9, %s3180_s15  ;;  %v1401_v9 = vrot.slane %v3724_v2, 1  ;;  %v1444_v59 = vsel %vm617_vm5, %v1442_v47, %v5460_v38  ;;  %v3946_v47 = vstv %s3852_s29  ;;  %s4789_s29 = sld [smem:[#allocation10 + $0x28]] }
 0x174   : > { %1191 = vrot.lane.b32.xlu1 %v1188_v13, %s3180_s15  ;;  %v1334_v13 = vsel %vm757_vm9, %v1331_v41, %v1333_v4  ;;  %v3844_v41 = vstv %s3745_s16  ;;  %s3883_s16 = sld [smem:[#allocation10 + $0x19]]  ;;  %v1418_v4 = vmul.f32 %v3741_v7, %v3469_v16  ;;  %v3925_v7 = vstv %s3824_s28 }
 0x175   : > { %v1402_v18 = vsel %vm582_vm4, %v1400_v14, %v1401_v9  ;;  %v3868_v50 = vstv %s3765_s30  ;;  %v3914_v14 = vstv %s3797_s13  ;;  %s4443_s13 = sld [smem:[#allocation10 + $0x27]]  ;;  %s3183_s30 = smov 123  }
 0x176   : > { %v3710_v61 = vpop.permute.xlu0 %803  ;;  %s4738_s28 = sld [smem:[#allocation10 + $0x21]] }
 0x177   : > { %1273 = vrot.lane.b32.xlu0 %v1270_v20, %s3180_s15  ;;  %v1423_v20 = vrot.slane %v3755_v10, 2 }
 0x178   : > { %1211 = vrot.lane.b32.xlu1 %v1208_v23, %s3180_s15  ;;  %v1376_v23 = vmul.f32 %v1373_v53, %v3469_v16 }
 0x179   : > { %v1424_v36 = vsel %vm617_vm5, %v1422_v27, %v1423_v20 }
 0x17a   : > { %v3761_v12 = vpop.permute.xlu0 %1070  ;;  %v1383_v43 = vrot.slane %v1376_v23, 1 }
 0x17b   : > { %1293 = vrot.lane.b32.xlu0 %v1290_v30, %s3180_s15  ;;  %5496 = vst [vmem:[#allocation20_spill] sm:$0xff] %v3761_v12  ;;  %v3814_v30 = vstv %s3734_s19  ;;  %s3863_s19 = sld [smem:[#allocation10 + $0x3c]] }
 0x17c   : > { %1233 = vrot.lane.b32.xlu1 %v1230_v33, %s3180_s15  ;;  %v3822_v33 = vstv %s3743_s24  ;;  %s3881_s24 = sld [smem:[#allocation10 + $0x43]]  ;;  %v1384_v63 = vsel %vm582_vm4, %v1381_v1, %v1383_v43  ;;  %v3919_v1 = vstv %s3806_s5  ;;  %v1425_v43 = vrot.slane %v1418_v4, 2  ;;  %s4509_s5 = sld [smem:[#allocation10 + $0x2e]] }
 0x17d   : > { %v1460_v24 = vmul.f32 %v3822_v33, %v3469_v16 }
 0x17e   : > { %v3819_v32 = vpop.permute.xlu0 %1083 }
 0x17f   : > { %1315 = vrot.lane.b32.xlu0 %v1312_v40, %s3180_s15  ;;  %5498 = vst [vmem:[#allocation21_spill] sm:$0xff] %v3819_v32  ;;  %v3839_v40 = vmul.f32 %v3822_v33, %v3439_v58  ;;  %v1467_v12 = vrot.slane %v1460_v24, 3  ;;  %v4043_v24 = vmul.f32 %v3817_v31, %v3460_v11 }
 0x180   : > { %1253 = vrot.lane.b32.xlu1 %v1250_v42, %s3180_s15  ;;  %v3847_v42 = vstv %s3747_s18  ;;  %s4623_s18 = sld [smem:[#allocation10 + $0x36]] }
 0x181   : > { %v5459_v60 = vrot.slane %v3839_v40, 3  ;;  %v3956_v2 = vstv %s3863_s19  ;;  %s4818_s19 = sld [smem:[#allocation10 + $0x59]] }
 0x182   : > { %v3966_v4 = vstv %s3881_s24  ;;  %s4879_s24 = sld [smem:[#allocation10 + $0x60]] }
 0x183   : > { %1335 = vrot.lane.b32.xlu0 %v1332_v46, %s3180_s15  ;;  %v3858_v46 = vstv %s3759_s23  ;;  %s4657_s23 = sld [smem:[#allocation10 + $0x13]] }
 0x184   : > { %1275 = vrot.lane.b32.xlu1 %v1272_v49, %s3180_s15  ;;  %v1458_v49 = vmul.f32 %v3822_v33, %v3403_v35 }
 0x186   : > { %v1464_v6 = vrot.slane %v1458_v49, 3  ;;  %v3950_v49 = vmul.f32 %v3801_v25, %v3439_v58 }
 0x187   : > { %1350 = vrot.lane.b32.xlu0 %v1346_v52, %s5451_s4  ;;  %v3874_v52 = vstv %s3772_s0  ;;  %s3182_s0 = smov 124  }
 0x188   : > { %1295 = vrot.lane.b32.xlu1 %v1292_v56, %s3180_s15  ;;  %v3886_v56 = vstv %s3779_s1  ;;  %v1466_v23 = vsel %vm652_vm6, %v1464_v6, %v5459_v60  ;;  %v3969_v6 = vstv %s3883_s16  ;;  %v1426_v60 = vsel %vm617_vm5, %v1423_v20, %v1425_v43  ;;  %v4003_v20 = vld [vmem:[#allocation4] sm:$0xff]  ;;  %s4325_s1 = sld [smem:[#allocation10 + $0x4a]]  ;;  %s4941_s16 = sld [smem:[#allocation10 + $0x6]] }
 0x189   : > { %v611_v33 = vmul.f32 %v4003_v20, %v3814_v30  ;;  %v4009_v43 = vmul.f32 %v3814_v30, %v3439_v58 }
 0x18a   : > { %v3828_v34 = vpop.permute.xlu1 %792 }
 0x18b   : > { %1363 = vrot.lane.b32.xlu0 %v1359_v62, %s5451_s4  ;;  %5499 = vst [vmem:[#allocation22_spill] sm:$0xff] %v3828_v34  ;;  %v618_v34 = vrot.slane %v611_v33, 2 }
 0x18c   : > { %1317 = vrot.lane.b32.xlu1 %v1314_v3, %s3180_s15  ;;  %v1403_v3 = vrot.slane %v1396_v44, 1  ;;  %v1438_v44 = vmul.f32 %v3775_v17, %v3483_v26  ;;  %v3963_v17 = vstv %s3865_s8  ;;  %s4847_s8 = sld [smem:[#allocation10 + $0x2f]] }
 0x18d   : > { %v3876_v53 = vpop.permute.xlu0 %825 }
 0x18e   : > { %v1445_v38 = vrot.slane %v1438_v44, 2 }
 0x18f   : > { %1385 = vrot.lane.b32.xlu0 %v1382_v8, %s5451_s4  ;;  %s3777_s4 = sld [smem:[#allocation10 + $0x49]] }
 0x190   : > { %1337 = vrot.lane.b32.xlu1 %v1334_v13, %s3180_s15  ;;  %s3790_s15 = sld [smem:[#allocation10 + $0x1f]]  ;;  %v3911_v13 = vstv %s3795_s26  ;;  %s4478_s26 = sld [smem:[#allocation10 + $0x58]] }
 0x193   : > { %1405 = vrot.lane.b32.xlu0 %v1402_v18, %s5497_s7  ;;  %v564_v18 = vmul.f32 %v5462_v22, %v3403_v35 }
 0x194   : > { %1352 = vrot.lane.b32.xlu1 %v1347_v19, %s5497_s7 }
 0x195   : > { %v3879_v54 = vstv %s3777_s4  ;;  %s4540_s4 = sld [smem:[#allocation10 + $0x5f]] }
 0x196   : > { %v3896_v62 = vmul.f32 %v3879_v54, %v3460_v11  ;;  %v3905_v5 = vstv %s3790_s15  ;;  %v1478_v8 = vmul.f32 %v3879_v54, %v3408_v39  ;;  %s2886_s15 = sld [smem:[#allocation10 + $0x1a]] }
 0x197   : > { %1427 = vrot.lane.b32.xlu0 %v1424_v36, %s5497_s7  ;;  %v3936_v28 = vmul.f32 %v3905_v5, %v3439_v58  ;;  %v3983_v36 = vmul.f32 %v3911_v13, %v3460_v11 }
 0x198   : > { %1365 = vrot.lane.b32.xlu1 %v1360_v37, %s5497_s7  ;;  %v5461_v27 = vrot.slane %v3896_v62, 3  ;;  %v1404_v37 = vsel %vm582_vm4, %v1401_v9, %v1403_v3  ;;  %v576_v9 = vmul.f32 %v3801_v25, %v3403_v35 }
 0x19a   : > { %v3888_v57 = vpop.permute.xlu1 %805  ;;  %v583_v22 = vrot.slane %v576_v9, 1 }
 0x19b   : > { %5500 = vst [vmem:[#allocation23_spill] sm:$0xff] %v3888_v57  ;;  %1447 = vrot.lane.b32.xlu0 %v1444_v59, %s5497_s7  ;;  %v1484_v59 = vrot.slane %v1478_v8, 3  ;;  %v3973_v8 = vmul.f32 %v3811_v29, %v3460_v11  ;;  %v1542_v57 = vmul.f32 %v4003_v20, %v3914_v14 }
 0x19c   : > { %1387 = vrot.lane.b32.xlu1 %v1384_v63, %s5497_s7  ;;  %v1500_v63 = vmul.f32 %v3905_v5, %v3403_v35  ;;  %v1520_v35 = vmul.f32 %v3911_v13, %v3408_v39 }
 0x19d   : > { %v3916_v55 = vpop.permute.xlu0 %845 }
 0x19e   : > { %v3928_v19 = vpop.permute.xlu1 %1072  ;;  %v1506_v0 = vrot.slane %v1500_v63, 4 }
 0x19f   : > { %5501 = vst [vmem:[#allocation24_spill] sm:$0xff] %v3928_v19  ;;  %1469 = vrot.lane.b32.xlu0 %v1466_v23, %s5497_s7 }
 0x1a0   : > { %1407 = vrot.lane.b32.xlu1 %v1404_v37, %s5497_s7  ;;  %v1486_v37 = vsel %vm652_vm6, %v1484_v59, %v5461_v27  ;;  %v593_v27 = vmul.f32 %v3811_v29, %v3408_v39  ;;  %v5505_v59 = vrot.slane %v3936_v28, 4 }
 0x1a1   : > { %v3960_v3 = vpop.permute.xlu0 %867 }
 0x1a2   : > { %v3975_v23 = vpop.permute.xlu1 %1085  ;;  %v599_v9 = vrot.slane %v593_v27, 1 }
 0x1a3   : > { %5502 = vst [vmem:[#allocation25_spill] sm:$0xff] %v3975_v23  ;;  %1489 = vrot.lane.b32.xlu0 %v1486_v37, %s5497_s7  ;;  %v5503_v37 = vstv %s3726_s27  ;;  %v4024_v23 = vld [vmem:[#allocation5] sm:$0xff] }
 0x1a4   : > { %1429 = vrot.lane.b32.xlu1 %v1426_v60, %s5497_s7  ;;  %v569_v10 = vmul.f32 %v5503_v37, %v3408_v39  ;;  %v1508_v39 = vsel %vm687_vm7, %v1506_v0, %v5505_v59  ;;  %v4022_v37 = vmul.f32 %v3914_v14, %v3439_v58  ;;  %v628_v19 = vmul.f32 %v4024_v23, %v3817_v31 }
 0x1a5   : > { %v4011_v44 = vpop.permute.xlu0 %887  ;;  %v5506_v60 = vrot.slane %v3788_v21, 2  ;;  %v1480_v0 = vmul.f32 %v3879_v54, %v3483_v26  ;;  %v5507_v59 = vrot.slane %v3950_v49, 1  ;;  %v5509_v54 = vrot.slane %v3973_v8, 1 }
 0x1a6   : > { %v4014_v63 = vpop.permute.xlu1 %827  ;;  %v634_v21 = vrot.slane %v628_v19, 2 }
 0x1a7   : > { %5504 = vst [vmem:[#allocation26_spill] sm:$0xff] %v4014_v63  ;;  %1511 = vrot.lane.b32.xlu0 %v1508_v39, %s5497_s7  ;;  %v1446_v32 = vsel %vm617_vm5, %v5506_v60, %v1445_v38  ;;  %v585_v58 = vsel %vm582_vm4, %v583_v22, %v5507_v59  ;;  %v1526_v63 = vrot.slane %v1520_v35, 4  ;;  %v571_v39 = vadd.f32 %v569_v10, %v564_v18 }
 0x1a8   : > { %1449 = vrot.lane.b32.xlu1 %v1446_v32, %s5497_s7  ;;  %v601_v22 = vsel %vm582_vm4, %v599_v9, %v5509_v54  ;;  %v5511_v32 = vrot.slane %v3983_v36, 4  ;;  %v5463_v18 = vrot.slane %v4022_v37, 5  ;;  %v4058_v10 = vmul.f32 %v3919_v1, %v3460_v11 }
 0x1a9   : > { %v4045_v38 = vpop.permute.xlu0 %909  ;;  %v590_v33 = vadd.f32 %v585_v58, %v571_v39  ;;  %v5512_v60 = vrot.slane %v3839_v40, 3  ;;  %v1487_v9 = vrot.slane %v1480_v0, 3  ;;  %v1502_v54 = vmul.f32 %v3905_v5, %v3469_v16 }
 0x1aa   : > { %5508 = vst [vmem:[#allocation27_spill] sm:$0xff] %v4045_v38  ;;  %v4050_v27 = vpop.permute.xlu1 %847  ;;  %v1528_v35 = vsel %vm687_vm7, %v1526_v63, %v5511_v32  ;;  %v646_v63 = vmul.f32 %v4003_v20, %v3844_v41  ;;  %v1548_v32 = vrot.slane %v1542_v57, 5  ;;  %v1562_v58 = vmul.f32 %v4024_v23, %v3919_v1 }
 0x1ab   : > { %5510 = vst [vmem:[#allocation28_spill] sm:$0xff] %v4050_v27  ;;  %1531 = vrot.lane.b32.xlu0 %v1528_v35, %s5497_s7  ;;  %v1468_v59 = vsel %vm652_vm6, %v5512_v60, %v1467_v12  ;;  %v606_v39 = vadd.f32 %v601_v22, %v590_v33  ;;  %v4071_v35 = vld [vmem:[#allocation4 + $0x8] sm:$0xff]  ;;  %v4079_v40 = vmul.f32 %v4024_v23, %v3847_v42  ;;  %v5516_v57 = vrot.slane %v3896_v62, 3 }
 0x1ac   : > { %1471 = vrot.lane.b32.xlu1 %v1468_v59, %s5497_s7  ;;  %v4075_v12 = vmul.f32 %v4071_v35, %v3844_v41  ;;  %v4083_v5 = vmul.f32 %v4003_v20, %v3855_v45  ;;  %v1550_v22 = vsel %vm722_vm8, %v1548_v32, %v5463_v18  ;;  %v4096_v60 = vmul.f32 %v4071_v35, %v3922_v15 }
 0x1ad   : > { %v4085_v19 = vpop.permute.xlu0 %929  ;;  %v5515_v59 = vrot.slane %v4009_v43, 2  ;;  %v1522_v32 = vmul.f32 %v3911_v13, %v3483_v26  ;;  %v578_v18 = vmul.f32 %v3801_v25, %v3469_v16  ;;  %v595_v33 = vmul.f32 %v3811_v29, %v3483_v26 }
 0x1ae   : > { %5513 = vst [vmem:[#allocation29_spill] sm:$0xff] %v4085_v19  ;;  %v4088_v0 = vpop.permute.xlu1 %869  ;;  %v1509_v19 = vrot.slane %v1502_v54, 4  ;;  %v4117_v54 = vmul.f32 %v3847_v42, %v3460_v11  ;;  %v5517_v13 = vstv %s3726_s27  ;;  %v5519_v26 = vrot.slane %v4043_v24, 2  ;;  %s2882_s27 = sld [smem:[#allocation10 + $0xc]] }
 0x1af   : > { %5514 = vst [vmem:[#allocation30_spill] sm:$0xff] %v4088_v0  ;;  %v620_v27 = vsel %vm617_vm5, %v618_v34, %v5515_v59  ;;  %1553 = vrot.lane.b32.xlu0 %v1550_v22, %s5497_s7  ;;  %v1488_v0 = vsel %vm652_vm6, %v5516_v57, %v1487_v9  ;;  %v1568_v34 = vrot.slane %v1562_v58, 5  ;;  %v1584_v22 = vmul.f32 %v4003_v20, %v3922_v15 }
 0x1b0   : > { %1491 = vrot.lane.b32.xlu1 %v1488_v0, %s5497_s7  ;;  %v625_v62 = vadd.f32 %v620_v27, %v606_v39  ;;  %v570_v57 = vmul.f32 %v5517_v13, %v3460_v11  ;;  %v636_v29 = vsel %vm617_vm5, %v634_v21, %v5519_v26  ;;  %v5521_v0 = vrot.slane %v4058_v10, 5 }
 0x1b1   : > { %v4122_v25 = vpop.permute.xlu0 %951  ;;  %v4135_v59 = vmul.f32 %v3925_v7, %v3460_v11  ;;  %v5522_v9 = vstv %s3719_s25  ;;  %v1529_v26 = vrot.slane %v1522_v32, 4  ;;  %v1590_v39 = vrot.slane %v1584_v22, 6  ;;  %s4601_s25 = sld [smem:[#allocation10 + $0x5]] }
 0x1b2   : > { %5518 = vst [vmem:[#allocation31_spill] sm:$0xff] %v4122_v25  ;;  %v4127_v58 = vpop.permute.xlu1 %889  ;;  %v1570_v27 = vsel %vm722_vm8, %v1568_v34, %v5521_v0  ;;  %v565_v13 = vmul.f32 %v4071_v35, %v5522_v9  ;;  %v5523_v25 = vrot.slane %v3936_v28, 4  ;;  %v586_v34 = vrot.slane %v578_v18, 1 }
 0x1b3   : > { %5520 = vst [vmem:[#allocation32_spill] sm:$0xff] %v4127_v58  ;;  %1573 = vrot.lane.b32.xlu0 %v1570_v27, %s5497_s7  ;;  %v1544_v58 = vmul.f32 %v3914_v14, %v3469_v16  ;;  %v602_v0 = vrot.slane %v595_v33, 1  ;;  %v1604_v11 = vmul.f32 %v4024_v23, %v3925_v7  ;;  %v641_v38 = vadd.f32 %v636_v29, %v625_v62  ;;  %v4159_v14 = vld [vmem:[#allocation4 + $0x10] sm:$0x3f] }
 0x1b4   : > { %v1510_v21 = vsel %vm687_vm7, %v5523_v25, %v1509_v19  ;;  %v653_v9 = vrot.slane %v646_v63, 3  ;;  %v4151_v27 = vmul.f32 %v4024_v23, %v3858_v46  ;;  %v572_v28 = vadd.f32 %v570_v57, %v565_v13 }
 0x1b5   : > { %1513 = vrot.lane.b32.xlu1 %v1510_v21, %s5497_s7  ;;  %v4153_v19 = vpop.permute.xlu0 %971  ;;  %v4157_v16 = vmul.f32 %v4071_v35, %v3855_v45  ;;  %v613_v18 = vmul.f32 %v4159_v14, %v3814_v30  ;;  %v5524_v63 = vrot.slane %v4096_v60, 6  ;;  %v5525_v62 = vrot.slane %v4075_v12, 3  ;;  %v4176_v30 = vld [vmem:[#allocation5 + $0x10] sm:$0x3f] }
 0x1b6   : > { %v4163_v33 = vpop.permute.xlu1 %911  ;;  %v5526_v25 = vrot.slane %v3983_v36, 4  ;;  %v1551_v13 = vrot.slane %v1544_v58, 5  ;;  %v1564_v21 = vmul.f32 %v4176_v30, %v3919_v1  ;;  %v1610_v36 = vrot.slane %v1604_v11, 6 }
 0x1b7   : > { %v1592_v32 = vsel %vm757_vm9, %v1590_v39, %v5524_v63  ;;  %v655_v57 = vsel %vm652_vm6, %v653_v9, %v5525_v62  ;;  %v5465_v39 = vrot.slane %v4117_v54, 3  ;;  %v5527_v63 = vrot.slane %v3950_v49, 1 }
 0x1b8   : > { %1595 = vrot.lane.b32.xlu0 %v1592_v32, %s5497_s7  ;;  %v1530_v29 = vsel %vm687_vm7, %v5526_v25, %v1529_v26  ;;  %v5528_v9 = vrot.slane %v3973_v8, 1  ;;  %v660_v26 = vadd.f32 %v655_v57, %v641_v38  ;;  %v4190_v58 = vmul.f32 %v4003_v20, %v3868_v50 }
 0x1b9   : > { %v587_v22 = vsel %vm582_vm4, %v5527_v63, %v586_v34  ;;  %1533 = vrot.lane.b32.xlu1 %v1530_v29, %s5497_s7  ;;  %v4194_v1 = vmul.f32 %v4024_v23, %v3871_v51  ;;  %v4196_v49 = vpop.permute.xlu0 %993  ;;  %v669_v34 = vrot.slane %v4079_v40, 3  ;;  %v621_v8 = vrot.slane %v613_v18, 2  ;;  %v4216_v63 = vld [vmem:[#allocation5 + $0x8] sm:$0xff] }
 0x1ba   : > { %v603_v32 = vsel %vm582_vm4, %v5528_v9, %v602_v0  ;;  %v591_v62 = vadd.f32 %v587_v22, %v572_v28  ;;  %v630_v0 = vmul.f32 %v4176_v30, %v3817_v31  ;;  %v4201_v25 = vpop.permute.xlu1 %931  ;;  %v5529_v38 = vrot.slane %v4135_v59, 6 }
 0x1bb   : > { %v5530_v28 = vrot.slane %v4022_v37, 5  ;;  %v1571_v29 = vrot.slane %v1564_v21, 5  ;;  %v1586_v40 = vmul.f32 %v4159_v14, %v3922_v15  ;;  %v671_v31 = vsel %vm652_vm6, %v669_v34, %v5465_v39 }
 0x1bc   : > { %v1612_v11 = vsel %vm757_vm9, %v1610_v36, %v5529_v38  ;;  %v607_v57 = vadd.f32 %v603_v32, %v591_v62  ;;  %v5464_v18 = vrot.slane %v4157_v16, 4  ;;  %v4220_v9 = vmul.f32 %v4216_v63, %v3858_v46 }
 0x1bd   : > { %1615 = vrot.lane.b32.xlu0 %v1612_v11, %s5497_s7  ;;  %v1552_v22 = vsel %vm722_vm8, %v5530_v28, %v1551_v13  ;;  %v4224_v37 = vmul.f32 %v4003_v20, %v3874_v52  ;;  %v676_v13 = vadd.f32 %v671_v31, %v660_v26  ;;  %v688_v15 = vrot.slane %v4083_v5, 4  ;;  %v4232_v32 = vpop.permute.xlu0 %1013 }
 0x1be   : > { %1555 = vrot.lane.b32.xlu1 %v1552_v22, %s5497_s7  ;;  %v4230_v21 = vmul.f32 %v4071_v35, %v3868_v50  ;;  %v5531_v36 = vstv %s3826_s10  ;;  %v5532_v34 = vrot.slane %v4009_v43, 2  ;;  %v637_v11 = vrot.slane %v630_v0, 2  ;;  %v4242_v26 = vpop.permute.xlu1 %953 }
 0x1bf   : > { %v1626_v62 = vmul.f32 %v4003_v20, %v5531_v36  ;;  %v648_v28 = vmul.f32 %v4159_v14, %v3844_v41  ;;  %v4246_v5 = vmul.f32 %v4071_v35, %v3946_v47  ;;  %v5533_v31 = vrot.slane %v4058_v10, 5 }
 0x1c0   : > { %v622_v38 = vsel %vm617_vm5, %v5532_v34, %v621_v8  ;;  %v1593_v8 = vrot.slane %v1586_v40, 6  ;;  %v1606_v0 = vmul.f32 %v4176_v30, %v3925_v7  ;;  %v690_v41 = vsel %vm687_vm7, %v688_v15, %v5464_v18 }
 0x1c1   : > { %v626_v22 = vadd.f32 %v622_v38, %v607_v57  ;;  %1630 = vrot.lane.b32.xlu0 %v1626_v62, %s3182_s0  ;;  %v1572_v43 = vsel %vm722_vm8, %v5533_v31, %v1571_v29  ;;  %v5466_v36 = vrot.slane %v4220_v9, 4  ;;  %v4260_v57 = vmul.f32 %v4024_v23, %v3886_v56  ;;  %v4268_v62 = vpop.permute.xlu0 %1035 }
 0x1c2   : > { %1575 = vrot.lane.b32.xlu1 %v1572_v43, %s5497_s7  ;;  %v1654_v10 = vmul.f32 %v4003_v20, %v3946_v47  ;;  %v695_v29 = vadd.f32 %v690_v41, %v676_v13  ;;  %v704_v40 = vrot.slane %v4151_v27, 4  ;;  %v665_v7 = vmul.f32 %v4176_v30, %v3847_v42  ;;  %v4276_v43 = vpop.permute.xlu1 %973 }
 0x1c3   : > { %v5534_v15 = vstv %s3841_s17  ;;  %v5535_v38 = vrot.slane %v4043_v24, 2  ;;  %v656_v18 = vrot.slane %v648_v28, 3  ;;  %v5471_v39 = vrot.slane %v4246_v5, 1 }
 0x1c4   : > { %v1639_v34 = vmul.f32 %v4024_v23, %v5534_v15  ;;  %v4281_v27 = vmul.f32 %v4216_v63, %v3956_v2  ;;  %v5467_v42 = vrot.slane %v4230_v21, 5  ;;  %v5536_v41 = vrot.slane %v4096_v60, 6 }
 0x1c5   : > { %v638_v31 = vsel %vm617_vm5, %v5535_v38, %v637_v11  ;;  %v1613_v15 = vrot.slane %v1606_v0, 6  ;;  %v706_v11 = vsel %vm687_vm7, %v704_v40, %v5466_v36  ;;  %v4293_v28 = vmul.f32 %v4216_v63, %v3871_v51  ;;  %v4301_v0 = vpop.permute.xlu0 %1055 }
 0x1c6   : > { %v642_v13 = vadd.f32 %v638_v31, %v626_v22  ;;  %1643 = vrot.lane.b32.xlu0 %v1639_v34, %s3182_s0  ;;  %v1594_v24 = vsel %vm757_vm9, %v5536_v41, %v1593_v8  ;;  %v1660_v38 = vrot.slane %v1654_v10, 1  ;;  %v1674_v22 = vmul.f32 %v4024_v23, %v3956_v2  ;;  %v4306_v36 = vpop.permute.xlu1 %995 }
 0x1c7   : > { %1597 = vrot.lane.b32.xlu1 %v1594_v24, %s5497_s7  ;;  %v711_v34 = vadd.f32 %v706_v11, %v695_v29  ;;  %v723_v60 = vrot.slane %v4190_v58, 5  ;;  %v672_v31 = vrot.slane %v665_v7, 3  ;;  %v683_v8 = vmul.f32 %v4159_v14, %v3855_v45 }
 0x1c8   : > { %v5537_v40 = vrot.slane %v4075_v12, 3  ;;  %v1662_v10 = vsel %vm582_vm4, %v1660_v38, %v5471_v39  ;;  %v5469_v29 = vrot.slane %v4281_v27, 1  ;;  %v4314_v58 = vmul.f32 %v4071_v35, %v3963_v17 }
 0x1c9   : > { %v739_v45 = vrot.slane %v4194_v1, 5  ;;  %v4319_v7 = vmul.f32 %v4071_v35, %v3874_v52  ;;  %v725_v11 = vsel %vm722_vm8, %v723_v60, %v5467_v42  ;;  %v5468_v1 = vrot.slane %v4293_v28, 5 }
 0x1ca   : > { %v657_v41 = vsel %vm652_vm6, %v5537_v40, %v656_v18  ;;  %1665 = vrot.lane.b32.xlu0 %v1662_v10, %s3182_s0  ;;  %v5538_v18 = vrot.slane %v4135_v59, 6  ;;  %v1680_v38 = vrot.slane %v1674_v22, 1  ;;  %v730_v40 = vadd.f32 %v725_v11, %v711_v34  ;;  %v4341_v60 = vpop.permute.xlu1 %1015 }
 0x1cb   : > { %v661_v12 = vadd.f32 %v657_v41, %v642_v13  ;;  %v1696_v13 = vmul.f32 %v4003_v20, %v3963_v17  ;;  %v5539_v41 = vrot.slane %v4117_v54, 3  ;;  %v700_v10 = vmul.f32 %v4176_v30, %v3858_v46 }
 0x1cc   : > { %v1614_v24 = vsel %vm757_vm9, %v5538_v18, %v1613_v15  ;;  %v691_v15 = vrot.slane %v683_v8, 4  ;;  %v4339_v18 = vpop.permute.xlu0 %1105  ;;  %v1682_v22 = vsel %vm582_vm4, %v1680_v38, %v5469_v29  ;;  %v5470_v34 = vrot.slane %v4314_v58, 2 }
 0x1cd   : > { %1617 = vrot.lane.b32.xlu1 %v1614_v24, %s5497_s7  ;;  %v673_v59 = vsel %vm652_vm6, %v5539_v41, %v672_v31  ;;  %v5540_v24 = vstv %s3826_s10  ;;  %v4352_v54 = vmul.f32 %v4216_v63, %v3966_v4  ;;  %v758_v31 = vrot.slane %v4224_v37, 6  ;;  %s4376_s10 = sld [smem:[#allocation10 + $0x20]]  ;;  %s4717_s7 = sld [smem:[#allocation10 + $0x4b]] }
 0x1ce   : > { %v1627_v42 = vmul.f32 %v4071_v35, %v5540_v24  ;;  %v5472_v46 = vrot.slane %v4319_v7, 6  ;;  %v677_v8 = vadd.f32 %v673_v59, %v661_v12  ;;  %1685 = vrot.lane.b32.xlu0 %v1682_v22, %s3182_s0  ;;  %v1656_v11 = vmul.f32 %v4159_v14, %v3946_v47  ;;  %v4378_v29 = vpop.permute.xlu1 %1037 }
 0x1cf   : > { %v741_v38 = vsel %vm722_vm8, %v739_v45, %v5468_v1  ;;  %v4364_v41 = vmul.f32 %v4216_v63, %v3886_v56  ;;  %v1702_v37 = vrot.slane %v1696_v13, 2  ;;  %v1716_v12 = vmul.f32 %v4024_v23, %v3966_v4 }
 0x1d0   : > { %v746_v59 = vadd.f32 %v741_v38, %v730_v40  ;;  %v5541_v22 = vrot.slane %v4157_v16, 4  ;;  %v707_v24 = vrot.slane %v700_v10, 4  ;;  %v718_v45 = vmul.f32 %v4159_v14, %v3868_v50  ;;  %v4374_v1 = vpop.permute.xlu0 %1125 }
 0x1d1   : > { %1632 = vrot.lane.b32.xlu1 %v1627_v42, %s3182_s0  ;;  %v1704_v42 = vsel %vm617_vm5, %v1702_v37, %v5470_v34  ;;  %v5542_v13 = vstv %s3841_s17  ;;  %v1723_v16 = vrot.slane %v4352_v54, 2  ;;  %v1663_v10 = vrot.slane %v1656_v11, 1  ;;  %s4761_s17 = sld [smem:[#allocation10 + $0x52]] }
 0x1d2   : > { %v692_v47 = vsel %vm687_vm7, %v5541_v22, %v691_v15  ;;  %v1640_v40 = vmul.f32 %v4216_v63, %v5542_v13  ;;  %v4389_v15 = vmul.f32 %v4071_v35, %v3969_v6  ;;  %1707 = vrot.lane.b32.xlu0 %v1704_v42, %s3182_s0  ;;  %v1676_v38 = vmul.f32 %v4176_v30, %v3956_v2 }
 0x1d3   : > { %v696_v50 = vadd.f32 %v692_v47, %v677_v8  ;;  %v4395_v22 = vstv %s4325_s1  ;;  %v760_v37 = vsel %vm757_vm9, %v758_v31, %v5472_v46  ;;  %v775_v13 = vrot.slane %v4364_v41, 6  ;;  %s4963_s1 = sld [smem:[#allocation10 + $0x37]] }
 0x1d4   : > { %v1722_v34 = vrot.slane %v1716_v12, 2  ;;  %v1738_v8 = vmul.f32 %v4003_v20, %v3969_v6  ;;  %v765_v47 = vadd.f32 %v760_v37, %v746_v59  ;;  %v774_v11 = vrot.slane %v4260_v57, 6  ;;  %v4407_v39 = vpop.permute.xlu0 %1147 }
 0x1d5   : > { %1645 = vrot.lane.b32.xlu1 %v1640_v40, %s3182_s0  ;;  %v726_v42 = vrot.slane %v718_v45, 5  ;;  %v735_v2 = vmul.f32 %v4176_v30, %v3871_v51  ;;  %v5543_v31 = vrot.slane %v4220_v9, 4  ;;  %v4414_v40 = vpop.permute.xlu1 %1057  ;;  %v5473_v57 = vrot.slane %v4389_v15, 3 }
 0x1d6   : > { %v1724_v12 = vsel %vm617_vm5, %v1722_v34, %v1723_v16  ;;  %v4422_v51 = vmul.f32 %v4216_v63, %v4395_v22  ;;  %v5544_v9 = vrot.slane %v4246_v5, 1  ;;  %v1683_v45 = vrot.slane %v1676_v38, 1 }
 0x1d7   : > { %v708_v46 = vsel %vm687_vm7, %v5543_v31, %v707_v24  ;;  %1727 = vrot.lane.b32.xlu0 %v1724_v12, %s3182_s0  ;;  %v1698_v37 = vmul.f32 %v4159_v14, %v3963_v17  ;;  %v776_v34 = vsel %vm757_vm9, %v774_v11, %v775_v13  ;;  %v1744_v31 = vrot.slane %v1738_v8, 3 }
 0x1d8   : > { %v712_v59 = vadd.f32 %v708_v46, %v696_v50  ;;  %v1664_v24 = vsel %vm582_vm4, %v5544_v9, %v1663_v10  ;;  %v1758_v46 = vmul.f32 %v4024_v23, %v4395_v22  ;;  %v781_v50 = vadd.f32 %v776_v34, %v765_v47  ;;  %v4438_v10 = vpop.permute.xlu0 %1167 }
 0x1d9   : > { %1667 = vrot.lane.b32.xlu1 %v1664_v24, %s3182_s0  ;;  %v742_v12 = vrot.slane %v735_v2, 5  ;;  %v753_v5 = vmul.f32 %v4159_v14, %v3874_v52  ;;  %v4441_v38 = vstv %s4376_s10  ;;  %v5545_v17 = vrot.slane %v4230_v21, 5  ;;  %v4448_v9 = vpop.permute.xlu1 %1107  ;;  %s4975_s10 = sld [smem:[#allocation10 + $0x3e]] }
 0x1da   : > { %v1746_v8 = vsel %vm652_vm6, %v1744_v31, %v5473_v57  ;;  %v1765_v47 = vrot.slane %v4422_v51, 3  ;;  %v4456_v52 = vmul.f32 %v4071_v35, %v4441_v38  ;;  %v5546_v21 = vrot.slane %v4281_v27, 1 }
 0x1db   : > { %v727_v11 = vsel %vm722_vm8, %v5545_v17, %v726_v42  ;;  %1749 = vrot.lane.b32.xlu0 %v1746_v8, %s3182_s0  ;;  %v1705_v24 = vrot.slane %v1698_v37, 2  ;;  %v1718_v34 = vmul.f32 %v4176_v30, %v3966_v4  ;;  %v796_v31 = vadd.f32 %v3694_v48, %v781_v50 }
 0x1dc   : > { %v731_v2 = vadd.f32 %v727_v11, %v712_v59  ;;  %v1684_v42 = vsel %vm582_vm4, %v5546_v21, %v1683_v45  ;;  %v1764_v17 = vrot.slane %v1758_v46, 3  ;;  %v1780_v57 = vmul.f32 %v4003_v20, %v4441_v38  ;;  %v4473_v45 = vpop.permute.xlu0 %1189 }
 0x1dd   : > { %1687 = vrot.lane.b32.xlu1 %v1684_v42, %s3182_s0  ;;  %v5547_v59 = vrot.slane %v4293_v28, 5  ;;  %v761_v8 = vrot.slane %v753_v5, 6  ;;  %v770_v27 = vmul.f32 %v4176_v30, %v3886_v56  ;;  %v4476_v37 = vstv %s4409_s11  ;;  %v4481_v4 = vpop.permute.xlu1 %1127  ;;  %s4995_s11 = sld [smem:[#allocation10 + $0x14]] }
 0x1de   : > { %v809_v48 = vadd.f32 %v3710_v61, %v796_v31  ;;  %v1766_v28 = vsel %vm652_vm6, %v1764_v17, %v1765_v47  ;;  %v1787_v46 = vrot.slane %v4456_v52, 4  ;;  %v4489_v56 = vmul.f32 %v4216_v63, %v4476_v37 }
 0x1df   : > { %v743_v11 = vsel %vm722_vm8, %v5547_v59, %v742_v12  ;;  %1769 = vrot.lane.b32.xlu0 %v1766_v28, %s3182_s0  ;;  %v5548_v12 = vrot.slane %v4314_v58, 2  ;;  %v1725_v5 = vrot.slane %v1718_v34, 2  ;;  %v1740_v21 = vmul.f32 %v4159_v14, %v3969_v6 }
 0x1e0   : > { %v747_v50 = vadd.f32 %v743_v11, %v731_v2  ;;  %v831_v42 = vadd.f32 %v3876_v53, %v809_v48  ;;  %v1786_v31 = vrot.slane %v1780_v57, 4  ;;  %v1800_v17 = vmul.f32 %v4024_v23, %v4476_v37  ;;  %v4504_v58 = vpop.permute.xlu0 %1209 }
 0x1e1   : > { %v1706_v61 = vsel %vm617_vm5, %v5548_v12, %v1705_v24  ;;  %v5549_v2 = vrot.slane %v4319_v7, 6  ;;  %v777_v11 = vrot.slane %v770_v27, 6  ;;  %v4507_v24 = vstv %s4443_s13  ;;  %v4512_v53 = vpop.permute.xlu1 %1149  ;;  %s3184_s13 = smov 122  }
 0x1e2   : > { %1709 = vrot.lane.b32.xlu1 %v1706_v61, %s3182_s0  ;;  %v851_v6 = vadd.f32 %v3916_v55, %v831_v42  ;;  %v1788_v57 = vsel %vm687_vm7, %v1786_v31, %v1787_v46  ;;  %v1807_v7 = vrot.slane %v4489_v56, 4  ;;  %v4520_v34 = vmul.f32 %v4071_v35, %v4507_v24 }
 0x1e3   : > { %v762_v59 = vsel %vm757_vm9, %v5549_v2, %v761_v8  ;;  %1791 = vrot.lane.b32.xlu0 %v1788_v57, %s3182_s0  ;;  %v1726_v55 = vsel %vm617_vm5, %v1723_v16, %v1725_v5  ;;  %v1747_v27 = vrot.slane %v1740_v21, 3  ;;  %v1760_v48 = vmul.f32 %v4176_v30, %v4395_v22  ;;  %v5551_v2 = vld [vmem:[#allocation27_spill] sm:$0xff]  ;;  %v5552_v57 = vld [vmem:[#allocation22_spill] sm:$0xff] }
 0x1e4   : > { %v766_v8 = vadd.f32 %v762_v59, %v747_v50  ;;  %v873_v28 = vadd.f32 %v3960_v3, %v851_v6  ;;  %v1806_v12 = vrot.slane %v1800_v17, 4  ;;  %v1822_v61 = vmul.f32 %v4003_v20, %v4507_v24  ;;  %v4535_v42 = vpop.permute.xlu0 %1231 }
 0x1e5   : > { %v778_v50 = vsel %vm757_vm9, %v775_v13, %v777_v11  ;;  %v4538_v54 = vstv %s4478_s26  ;;  %v4543_v3 = vpop.permute.xlu1 %1169  ;;  %v1829_v5 = vrot.slane %v4520_v34, 5  ;;  %v5550_v21 = vrot.slane %v4389_v15, 3  ;;  %v5553_v15 = vld [vmem:[#allocation29_spill] sm:$0xff]  ;;  %s5016_s26 = sld [smem:[#allocation10 + $0x45]] }
 0x1e6   : > { %1729 = vrot.lane.b32.xlu1 %v1726_v55, %s3182_s0  ;;  %v893_v16 = vadd.f32 %v4011_v44, %v873_v28  ;;  %v1808_v22 = vsel %vm687_vm7, %v1806_v12, %v1807_v7  ;;  %v4551_v41 = vmul.f32 %v4216_v63, %v4538_v54  ;;  %v782_v13 = vadd.f32 %v778_v50, %v766_v8  ;;  %v5554_v50 = vld [vmem:[#allocation23_spill] sm:$0xff] }
 0x1e7   : > { %1811 = vrot.lane.b32.xlu0 %v1808_v22, %s3182_s0  ;;  %v1748_v44 = vsel %vm652_vm6, %v5550_v21, %v1747_v27  ;;  %v1767_v31 = vrot.slane %v1760_v48, 3  ;;  %v1782_v17 = vmul.f32 %v4159_v14, %v4441_v38  ;;  %v1828_v11 = vrot.slane %v1822_v61, 5 }
 0x1e8   : > { %v915_v59 = vadd.f32 %v5551_v2, %v893_v16  ;;  %v1842_v6 = vmul.f32 %v4024_v23, %v4538_v54  ;;  %v797_v8 = vadd.f32 %v5552_v57, %v782_v13  ;;  %v4564_v55 = vpop.permute.xlu0 %1251  ;;  %v1863_v28 = vstv %s4509_s5  ;;  %v5556_v57 = vld [vmem:[#allocation26_spill] sm:$0xff]  ;;  %s5033_s5 = sld [smem:[#allocation10 + $0x1b]] }
 0x1e9   : > { %v4568_v27 = vpop.permute.xlu1 %1191  ;;  %v1830_v38 = vsel %vm722_vm8, %v1828_v11, %v1829_v5  ;;  %v1849_v48 = vrot.slane %v4551_v41, 5  ;;  %v4575_v61 = vmul.f32 %v4071_v35, %v1863_v28  ;;  %v1768_v22 = vsel %vm652_vm6, %v1765_v47, %v1767_v31 }
 0x1ea   : > { %1751 = vrot.lane.b32.xlu1 %v1748_v44, %s3182_s0  ;;  %v935_v12 = vadd.f32 %v5553_v15, %v915_v59  ;;  %v810_v16 = vadd.f32 %v5554_v50, %v797_v8  ;;  %v1789_v13 = vrot.slane %v1782_v17, 4  ;;  %v1802_v21 = vmul.f32 %v4176_v30, %v4476_v37  ;;  %v5555_v44 = vld [vmem:[#allocation31_spill] sm:$0xff]  ;;  %v5557_v17 = vld [vmem:[#allocation28_spill] sm:$0xff] }
 0x1eb   : > { %1833 = vrot.lane.b32.xlu0 %v1830_v38, %s3182_s0  ;;  %v1848_v59 = vrot.slane %v1842_v6, 5  ;;  %v1864_v11 = vmul.f32 %v4003_v20, %v1863_v28  ;;  %v1883_v38 = vstv %s4540_s4  ;;  %v1871_v37 = vrot.slane %v4575_v61, 6  ;;  %s5052_s4 = sld [smem:[#allocation10 + $0x4c]] }
 0x1ec   : > { %v957_v2 = vadd.f32 %v5555_v44, %v935_v12  ;;  %v832_v15 = vadd.f32 %v5556_v57, %v810_v16  ;;  %v4588_v8 = vpop.permute.xlu0 %1273  ;;  %v4599_v31 = vmul.f32 %v4216_v63, %v1883_v38  ;;  %v1809_v12 = vrot.slane %v1802_v21, 4 }
 0x1ed   : > { %v4592_v50 = vpop.permute.xlu1 %1211  ;;  %v1850_v47 = vsel %vm722_vm8, %v1848_v59, %v1849_v48  ;;  %v1824_v16 = vmul.f32 %v4159_v14, %v4507_v24  ;;  %v1870_v44 = vrot.slane %v1864_v11, 6  ;;  %v5558_v59 = vld [vmem:[#allocation30_spill] sm:$0xff]  ;;  %v5559_v24 = vld [vmem:[#allocation32_spill] sm:$0xff]  ;;  %v1844_v11 = vmul.f32 %v4176_v30, %v4538_v54 }
 0x1ee   : > { %1771 = vrot.lane.b32.xlu1 %v1768_v22, %s3182_s0  ;;  %v977_v51 = vadd.f32 %v4153_v19, %v957_v2  ;;  %v852_v6 = vadd.f32 %v5557_v17, %v832_v15  ;;  %v1790_v19 = vsel %vm687_vm7, %v1787_v46, %v1789_v13  ;;  %v1884_v2 = vmul.f32 %v4024_v23, %v1883_v38 }
 0x1ef   : > { %1853 = vrot.lane.b32.xlu0 %v1850_v47, %s3182_s0  ;;  %v1872_v46 = vsel %vm757_vm9, %v1870_v44, %v1871_v37  ;;  %v1810_v21 = vsel %vm687_vm7, %v1807_v7, %v1809_v12  ;;  %v1905_v54 = vstv %s4601_s25  ;;  %v1851_v12 = vrot.slane %v1844_v11, 5  ;;  %s5069_s25 = sld [smem:[#allocation10 + $0x22]] }
 0x1f0   : > { %v999_v22 = vadd.f32 %v4196_v49, %v977_v51  ;;  %v874_v57 = vadd.f32 %v5558_v59, %v852_v6  ;;  %v4614_v15 = vpop.permute.xlu0 %1293  ;;  %v1891_v49 = vrot.slane %v4599_v31, 6  ;;  %v1890_v17 = vrot.slane %v1884_v2, 6 }
 0x1f1   : > { %v4617_v47 = vpop.permute.xlu1 %1233  ;;  %v1906_v2 = vmul.f32 %v4003_v20, %v1905_v54  ;;  %v1933_v59 = vstv %s2882_s27  ;;  %v1953_v11 = vstv %s4637_s22  ;;  %s5083_s27 = sld [smem:[#allocation10 + $0x53]]  ;;  %s5117_s22 = sld [smem:[#allocation10 + $0x5a]] }
 0x1f2   : > { %1793 = vrot.lane.b32.xlu1 %v1790_v19, %s3182_s0  ;;  %v1019_v52 = vadd.f32 %v4232_v32, %v999_v22  ;;  %v894_v13 = vadd.f32 %v5559_v24, %v874_v57  ;;  %v1831_v32 = vrot.slane %v1824_v16, 5  ;;  %v1892_v7 = vsel %vm757_vm9, %v1890_v17, %v1891_v49 }
 0x1f3   : > { %1875 = vrot.lane.b32.xlu0 %v1872_v46, %s3182_s0  ;;  %v1866_v16 = vmul.f32 %v4159_v14, %v1863_v28  ;;  %v1886_v24 = vmul.f32 %v4176_v30, %v1883_v38  ;;  %v4684_v38 = vmul.f32 %v4216_v63, %v1953_v11 }
 0x1f4   : > { %v1041_v51 = vadd.f32 %v4268_v62, %v1019_v52  ;;  %v916_v6 = vadd.f32 %v4163_v33, %v894_v13  ;;  %v4635_v19 = vpop.permute.xlu0 %1315  ;;  %v1832_v33 = vsel %vm722_vm8, %v1829_v5, %v1831_v32  ;;  %v1918_v5 = vstv %s4623_s18  ;;  %s5100_s18 = sld [smem:[#allocation10 + $0x29]] }
 0x1f5   : > { %v4640_v56 = vpop.permute.xlu1 %1253  ;;  %v4664_v52 = vmul.f32 %v4071_v35, %v1933_v59  ;;  %v1873_v46 = vrot.slane %v1866_v16, 6  ;;  %v1934_v13 = vmul.f32 %v4003_v20, %v1933_v59  ;;  %v1975_v16 = vstv %s4657_s23  ;;  %s5134_s23 = sld [smem:[#allocation10 + $0x30]] }
 0x1f6   : > { %1813 = vrot.lane.b32.xlu1 %v1810_v21, %s3182_s0  ;;  %v1061_v22 = vadd.f32 %v4301_v0, %v1041_v51  ;;  %v936_v62 = vadd.f32 %v4201_v25, %v916_v6  ;;  %v5560_v25 = vld [vmem:[#allocation20_spill] sm:$0xff]  ;;  %v5561_v51 = vld [vmem:[#allocation21_spill] sm:$0xff] }
 0x1f7   : > { %1895 = vrot.lane.b32.xlu0 %v1892_v7, %s3182_s0  ;;  %v1940_v7 = vrot.slane %v1934_v13, 1 }
 0x1f8   : > { %v958_v0 = vadd.f32 %v4242_v26, %v936_v62  ;;  %v4654_v44 = vpop.permute.xlu0 %1335  ;;  %v1076_v57 = vadd.f32 %v5560_v25, %v1061_v22  ;;  %v1852_v26 = vsel %vm722_vm8, %v1849_v48, %v1851_v12  ;;  %v1941_v48 = vrot.slane %v4664_v52, 1 }
 0x1f9   : > { %v4660_v34 = vpop.permute.xlu1 %1275  ;;  %v1893_v22 = vrot.slane %v1886_v24, 6  ;;  %v1954_v62 = vmul.f32 %v4024_v23, %v1953_v11 }
 0x1fa   : > { %1835 = vrot.lane.b32.xlu1 %v1832_v33, %s3182_s0  ;;  %v978_v28 = vadd.f32 %v4276_v43, %v958_v0  ;;  %v1919_v43 = vmul.f32 %v4024_v23, %v1918_v5  ;;  %v1089_v41 = vadd.f32 %v5561_v51, %v1076_v57  ;;  %v1942_v61 = vsel %vm582_vm4, %v1940_v7, %v1941_v48 }
 0x1fb   : > { %1910 = vrot.lane.b32.xlu0 %v1906_v2, %s3183_s30  ;;  %v4705_v2 = vmul.f32 %v4071_v35, %v1975_v16  ;;  %v1976_v57 = vmul.f32 %v4003_v20, %v1975_v16 }
 0x1fc   : > { %v1000_v21 = vadd.f32 %v4306_v36, %v978_v28  ;;  %v4675_v32 = vpop.permute.xlu0 %1350  ;;  %v1874_v36 = vsel %vm757_vm9, %v1871_v37, %v1873_v46  ;;  %v1961_v37 = vrot.slane %v4684_v38, 1  ;;  %v1995_v46 = vstv %s2885_s6  ;;  %s2775_s6 = sshll.u32 %s3343_s21, 1 }
 0x1fd   : > { %v4680_v17 = vpop.permute.xlu1 %1295  ;;  %v4727_v13 = vmul.f32 %v4216_v63, %v1995_v46 }
 0x1fe   : > { %1855 = vrot.lane.b32.xlu1 %v1852_v26, %s3182_s0  ;;  %v1020_v6 = vadd.f32 %v4341_v60, %v1000_v21  ;;  %v1111_v60 = vadd.f32 %v4339_v18, %v1089_v41  ;;  %v1960_v18 = vrot.slane %v1954_v62, 1  ;;  %v1907_v26 = vmul.f32 %v4071_v35, %v1905_v54  ;;  %v5562_v21 = vld [vmem:[#allocation24_spill] sm:$0xff] }
 0x1ff   : > { %1923 = vrot.lane.b32.xlu0 %v1919_v43, %s3183_s30  ;;  %v1936_v54 = vmul.f32 %v4159_v14, %v1933_v59  ;;  %v1996_v41 = vmul.f32 %v4024_v23, %v1995_v46  ;;  %v2003_v59 = vrot.slane %v4727_v13, 2  ;;  %v4877_v13 = vstv %s4818_s19  ;;  %s3190_s19 = smov 80  }
 0x200   : > { %v1042_v33 = vadd.f32 %v4378_v29, %v1020_v6  ;;  %v4694_v12 = vpop.permute.xlu0 %1363  ;;  %v1894_v29 = vsel %vm757_vm9, %v1891_v49, %v1893_v22  ;;  %v1962_v31 = vsel %vm582_vm4, %v1960_v18, %v1961_v37  ;;  %v1983_v49 = vrot.slane %v4705_v2, 2 }
 0x201   : > { %v4698_v0 = vpop.permute.xlu1 %1317  ;;  %v2017_v22 = vstv %s2886_s15  ;;  %s5210_s15 = scalar_lea.vmem [#allocation11], %s2775_s6 }
 0x202   : > { %1877 = vrot.lane.b32.xlu1 %v1874_v36, %s3182_s0  ;;  %v1062_v25 = vadd.f32 %v4414_v40, %v1042_v33  ;;  %v1131_v40 = vadd.f32 %v4374_v1, %v1111_v60  ;;  %v1982_v1 = vrot.slane %v1976_v57, 2  ;;  %v1920_v36 = vmul.f32 %v4216_v63, %v1918_v5  ;;  %v5563_v60 = vld [vmem:[#allocation25_spill] sm:$0xff] }
 0x203   : > { %1945 = vrot.lane.b32.xlu0 %v1942_v61, %s3183_s30  ;;  %v4748_v33 = vmul.f32 %v4071_v35, %v2017_v22  ;;  %v1943_v5 = vrot.slane %v1936_v54, 1  ;;  %v2018_v18 = vmul.f32 %v4003_v20, %v2017_v22 }
 0x204   : > { %v4714_v28 = vpop.permute.xlu0 %1385  ;;  %v1077_v43 = vadd.f32 %v5562_v21, %v1062_v25  ;;  %v1153_v51 = vadd.f32 %v4407_v39, %v1131_v40  ;;  %v1984_v39 = vsel %vm617_vm5, %v1982_v1, %v1983_v49  ;;  %v1956_v25 = vmul.f32 %v4176_v30, %v1953_v11 }
 0x205   : > { %v4720_v24 = vpop.permute.xlu1 %1337  ;;  %v2025_v11 = vrot.slane %v4748_v33, 3  ;;  %v2143_v33 = vstv %s4847_s8  ;;  %s3191_s8 = smov 96  }
 0x206   : > { %1897 = vrot.lane.b32.xlu1 %v1894_v29, %s3182_s0  ;;  %v1173_v7 = vadd.f32 %v4438_v10, %v1153_v51  ;;  %v1090_v61 = vadd.f32 %v5563_v60, %v1077_v43  ;;  %v2002_v29 = vrot.slane %v1996_v41, 2  ;;  %v1963_v54 = vrot.slane %v1956_v25, 1  ;;  %s4954_s0 = sld [smem:[#allocation10 + $0xd]] }
 0x207   : > { %1965 = vrot.lane.b32.xlu0 %v1962_v31, %s3183_s30  ;;  %v1978_v51 = vmul.f32 %v4159_v14, %v1975_v16  ;;  %v2024_v41 = vrot.slane %v2018_v18, 3 }
 0x208   : > { %v4735_v6 = vpop.permute.xlu0 %1405  ;;  %v1195_v10 = vadd.f32 %v4473_v45, %v1173_v7  ;;  %v2004_v45 = vsel %vm617_vm5, %v2002_v29, %v2003_v59  ;;  %v1112_v43 = vadd.f32 %v4448_v9, %v1090_v61  ;;  %v4787_v9 = vstv %s4738_s28  ;;  %s3187_s28 = smov 32  }
 0x209   : > { %v4741_v62 = vpop.permute.xlu1 %1352  ;;  %v1985_v61 = vrot.slane %v1978_v51, 2  ;;  %v2060_v29 = vmul.f32 %v4003_v20, %v4787_v9 }
 0x20a   : > { %1912 = vrot.lane.b32.xlu1 %v1907_v26, %s3183_s30  ;;  %v4759_v26 = vstv %s4717_s7  ;;  %v1215_v40 = vadd.f32 %v4504_v58, %v1195_v10  ;;  %v1944_v58 = vsel %vm582_vm4, %v1941_v48, %v1943_v5  ;;  %v1132_v60 = vadd.f32 %v4481_v4, %v1112_v43  ;;  %s3186_s7 = smov 16  }
 0x20b   : > { %1987 = vrot.lane.b32.xlu0 %v1984_v39, %s3183_s30  ;;  %v4772_v21 = vmul.f32 %v4216_v63, %v4759_v26  ;;  %v4800_v39 = vmul.f32 %v4071_v35, %v4787_v9  ;;  %v1998_v5 = vmul.f32 %v4176_v30, %v1995_v46  ;;  %v2020_v43 = vmul.f32 %v4159_v14, %v2017_v22 }
 0x20c   : > { %v4756_v57 = vpop.permute.xlu0 %1427  ;;  %v1237_v1 = vadd.f32 %v4535_v42, %v1215_v40  ;;  %v2026_v42 = vsel %vm652_vm6, %v2024_v41, %v2025_v11  ;;  %v1154_v18 = vadd.f32 %v4512_v53, %v1132_v60  ;;  %v4816_v40 = vstv %s4761_s17  ;;  %s3188_s17 = smov 64  }
 0x20d   : > { %v4764_v31 = vpop.permute.xlu1 %1365  ;;  %v2045_v16 = vrot.slane %v4772_v21, 3  ;;  %v2067_v46 = vrot.slane %v4800_v39, 4  ;;  %v4829_v20 = vmul.f32 %v4216_v63, %v4816_v40  ;;  %v2080_v51 = vmul.f32 %v4024_v23, %v4816_v40 }
 0x20e   : > { %1925 = vrot.lane.b32.xlu1 %v1920_v36, %s3183_s30  ;;  %v2038_v36 = vmul.f32 %v4024_v23, %v4759_v26  ;;  %v1257_v52 = vadd.f32 %v4564_v55, %v1237_v1  ;;  %v1964_v55 = vsel %vm582_vm4, %v1961_v37, %v1963_v54  ;;  %v1174_v53 = vadd.f32 %v4543_v3, %v1154_v18 }
 0x20f   : > { %2007 = vrot.lane.b32.xlu0 %v2004_v45, %s3183_s30  ;;  %v2005_v45 = vrot.slane %v1998_v5, 2  ;;  %v2066_v54 = vrot.slane %v2060_v29, 4  ;;  %v4845_v41 = vstv %s4789_s29  ;;  %v2087_v22 = vrot.slane %v4829_v20, 4  ;;  %s3189_s29 = smov 48  }
 0x210   : > { %v4784_v7 = vpop.permute.xlu0 %1447  ;;  %v1279_v25 = vadd.f32 %v4588_v8, %v1257_v52  ;;  %v2044_v10 = vrot.slane %v2038_v36, 3  ;;  %v1196_v1 = vadd.f32 %v4568_v27, %v1174_v53  ;;  %v4858_v23 = vmul.f32 %v4071_v35, %v4845_v41 }
 0x211   : > { %v4792_v48 = vpop.permute.xlu1 %1387  ;;  %v2027_v36 = vrot.slane %v2020_v43, 3  ;;  %v2040_v52 = vmul.f32 %v4176_v30, %v4759_v26  ;;  %v2086_v60 = vrot.slane %v2080_v51, 4  ;;  %v2062_v29 = vmul.f32 %v4159_v14, %v4787_v9  ;;  %v4914_v43 = vld [vmem:[#allocation4 + $0x8] sm:$0xff] }
 0x212   : > { %1947 = vrot.lane.b32.xlu1 %v1944_v58, %s3183_s30  ;;  %v1299_v38 = vadd.f32 %v4614_v15, %v1279_v25  ;;  %v2046_v8 = vsel %vm652_vm6, %v2044_v10, %v2045_v16  ;;  %v1986_v15 = vsel %vm617_vm5, %v1983_v49, %v1985_v61  ;;  %v1216_v27 = vadd.f32 %v4592_v50, %v1196_v1 }
 0x213   : > { %2029 = vrot.lane.b32.xlu0 %v2026_v42, %s3183_s30  ;;  %v2109_v5 = vrot.slane %v4858_v23, 5  ;;  %v2047_v10 = vrot.slane %v2040_v52, 3  ;;  %v2082_v51 = vmul.f32 %v4176_v30, %v4816_v40 }
 0x214   : > { %v4813_v4 = vpop.permute.xlu0 %1469  ;;  %v1321_v58 = vadd.f32 %v4635_v19, %v1299_v38  ;;  %v2068_v19 = vsel %vm687_vm7, %v2066_v54, %v2067_v46  ;;  %v1238_v50 = vadd.f32 %v4617_v47, %v1216_v27  ;;  %v4890_v47 = vmul.f32 %v4216_v63, %v4877_v13 }
 0x215   : > { %v4821_v37 = vpop.permute.xlu1 %1407  ;;  %v2069_v54 = vrot.slane %v2062_v29, 4  ;;  %v2185_v29 = vstv %s4941_s16  ;;  %s2916_s16 = sshll.u32 %s3157_s12, 5  ;;  %s2657_s12 = scalar_lea.sflag [#allocation8], %s3343_s21 }
 0x216   : > { %1967 = vrot.lane.b32.xlu1 %v1964_v55, %s3183_s30  ;;  %v1341_v2 = vadd.f32 %v4654_v44, %v1321_v58  ;;  %v2006_v44 = vsel %vm617_vm5, %v2003_v59, %v2005_v45  ;;  %v4869_v55 = vld [vmem:[#allocation4] sm:$0xff]  ;;  %v1258_v25 = vadd.f32 %v4640_v56, %v1238_v50  ;;  %v2129_v9 = vrot.slane %v4890_v47, 5 }
 0x217   : > { %2049 = vrot.lane.b32.xlu0 %v2046_v8, %s3183_s30  ;;  %v2102_v35 = vmul.f32 %v4869_v55, %v4845_v41  ;;  %v4901_v8 = vld [vmem:[#allocation5] sm:$0xff]  ;;  %v4917_v58 = vmul.f32 %v4914_v43, %v2143_v33 }
 0x218   : > { %v4842_v3 = vpop.permute.xlu0 %1489  ;;  %v1356_v42 = vadd.f32 %v4675_v32, %v1341_v2  ;;  %v2088_v32 = vsel %vm687_vm7, %v2086_v60, %v2087_v22  ;;  %v2122_v56 = vmul.f32 %v4901_v8, %v4877_v13  ;;  %v1280_v53 = vadd.f32 %v4660_v34, %v1258_v25 }
 0x219   : > { %v4850_v49 = vpop.permute.xlu1 %1429  ;;  %v2108_v38 = vrot.slane %v2102_v35, 5  ;;  %v2151_v40 = vrot.slane %v4917_v58, 6 }
 0x21a   : > { %1989 = vrot.lane.b32.xlu1 %v1986_v15, %s3183_s30  ;;  %v1369_v59 = vadd.f32 %v4694_v12, %v1356_v42  ;;  %v2028_v12 = vsel %vm652_vm6, %v2025_v11, %v2027_v36  ;;  %v1300_v34 = vadd.f32 %v4680_v17, %v1280_v53  ;;  %v2128_v2 = vrot.slane %v2122_v56, 5 }
 0x21b   : > { %2071 = vrot.lane.b32.xlu0 %v2068_v19, %s3183_s30  ;;  %v2144_v19 = vmul.f32 %v4869_v55, %v2143_v33  ;;  %v2104_v42 = vmul.f32 %v4159_v14, %v4845_v41  ;;  %v2124_v41 = vmul.f32 %v4176_v30, %v4877_v13  ;;  %v4986_v13 = vld [vmem:[#allocation4 + $0x10] sm:$0x3f] }
 0x21c   : > { %v4874_v61 = vpop.permute.xlu0 %1511  ;;  %v1391_v18 = vadd.f32 %v4714_v28, %v1369_v59  ;;  %v2110_v28 = vsel %vm722_vm8, %v2108_v38, %v2109_v5  ;;  %v1322_v27 = vadd.f32 %v4698_v0, %v1300_v34  ;;  %v2070_v0 = vsel %vm687_vm7, %v2067_v46, %v2069_v54 }
 0x21d   : > { %v4882_v26 = vpop.permute.xlu1 %1449 }
 0x21e   : > { %2009 = vrot.lane.b32.xlu1 %v2006_v44, %s3183_s30  ;;  %v1411_v11 = vadd.f32 %v4735_v6, %v1391_v18  ;;  %v2048_v6 = vsel %vm652_vm6, %v2045_v16, %v2047_v10  ;;  %v2163_v44 = vstv %s4879_s24  ;;  %v2130_v16 = vsel %vm722_vm8, %v2128_v2, %v2129_v9  ;;  %s3192_s24 = smov 112  }
 0x21f   : > { %2091 = vrot.lane.b32.xlu0 %v2088_v32, %s3183_s30  ;;  %v1342_v52 = vadd.f32 %v4720_v24, %v1322_v27  ;;  %v2164_v35 = vmul.f32 %v4901_v8, %v2163_v44  ;;  %v2146_v18 = vmul.f32 %v4986_v13, %v2143_v33  ;;  %v2233_v27 = vstv %s4975_s10 }
 0x220   : > { %v1532_v15 = vpop.permute.xlu0 %1531  ;;  %v1433_v1 = vadd.f32 %v4756_v57, %v1411_v11  ;;  %v4939_v57 = vmul.f32 %v4216_v63, %v2163_v44  ;;  %v2150_v63 = vrot.slane %v2144_v19, 6  ;;  %v2198_v11 = vstv %s4963_s1 }
 0x221   : > { %v4908_v45 = vpop.permute.xlu1 %1471  ;;  %v1357_v50 = vadd.f32 %v4741_v62, %v1342_v52  ;;  %v2170_v25 = vrot.slane %v2164_v35, 6  ;;  %v2153_v34 = vrot.slane %v2146_v18, 6  ;;  %v2199_v19 = vmul.f32 %v4901_v8, %v2198_v11 }
 0x222   : > { %2031 = vrot.lane.b32.xlu1 %v2028_v12, %s3183_s30  ;;  %v1453_v36 = vadd.f32 %v4784_v7, %v1433_v1  ;;  %v2089_v7 = vrot.slane %v2082_v51, 4  ;;  %v2152_v14 = vsel %vm757_vm9, %v2150_v63, %v2151_v40  ;;  %v2255_v35 = vstv %s4995_s11  ;;  %s5394_s11 = scalar_lea.hbm %s5446_s2, %s2916_s16 }
 0x223   : > { %2113 = vrot.lane.b32.xlu0 %v2110_v28, %s3183_s30  ;;  %v1370_v46 = vadd.f32 %v4764_v31, %v1357_v50  ;;  %v2297_v18 = vstv %s5033_s5 }
 0x224   : > { %v1554_v17 = vpop.permute.xlu0 %1553  ;;  %v1475_v60 = vadd.f32 %v4813_v4, %v1453_v36  ;;  %v2171_v4 = vrot.slane %v4939_v57, 6  ;;  %v2090_v62 = vsel %vm687_vm7, %v2087_v22, %v2089_v7 }
 0x225   : > { %v4932_v21 = vpop.permute.xlu1 %1491  ;;  %v1392_v12 = vadd.f32 %v4792_v48, %v1370_v46  ;;  %v2256_v46 = vmul.f32 %v4869_v55, %v2255_v35 }
 0x226   : > { %2051 = vrot.lane.b32.xlu1 %v2048_v6, %s3183_s30  ;;  %v1495_v39 = vadd.f32 %v4842_v3, %v1475_v60  ;;  %v2111_v3 = vrot.slane %v2104_v42, 5  ;;  %v2172_v22 = vsel %vm757_vm9, %v2170_v25, %v2171_v4  ;;  %v5006_v6 = vld [vmem:[#allocation5 + $0x10] sm:$0x3f]  ;;  %v2234_v42 = vmul.f32 %v4901_v8, %v2233_v27 }
 0x227   : > { %2133 = vrot.lane.b32.xlu0 %v2130_v16, %s3183_s30  ;;  %v1412_v30 = vadd.f32 %v4821_v37, %v1392_v12  ;;  %v2186_v37 = vmul.f32 %v4869_v55, %v2185_v29  ;;  %v2166_v54 = vmul.f32 %v5006_v6, %v2163_v44  ;;  %v5019_v44 = vld [vmem:[#allocation5 + $0x8] sm:$0xff] }
 0x228   : > { %v1574_v24 = vpop.permute.xlu0 %1573  ;;  %v1517_v32 = vadd.f32 %v4874_v61, %v1495_v39  ;;  %v2112_v48 = vsel %vm722_vm8, %v2109_v5, %v2111_v3  ;;  %v2131_v61 = vrot.slane %v2124_v41, 5  ;;  %v5022_v36 = vmul.f32 %v5019_v44, %v2233_v27 }
 0x229   : > { %v4957_v59 = vpop.permute.xlu1 %1513  ;;  %v1434_v56 = vadd.f32 %v4850_v49, %v1412_v30  ;;  %v2173_v52 = vrot.slane %v2166_v54, 6  ;;  %v2187_v41 = vmul.f32 %v4914_v43, %v2185_v29 }
 0x22a   : > { %2073 = vrot.lane.b32.xlu1 %v2070_v0, %s3183_s30  ;;  %v1537_v31 = vadd.f32 %v1532_v15, %v1517_v32  ;;  %v2213_v15 = vstv %s4954_s0  ;;  %v2132_v49 = vsel %vm722_vm8, %v2129_v9, %v2131_v61  ;;  %v2275_v32 = vstv %s5016_s26  ;;  %s2671_s0 = sshll.u32 %s5210_s15, 4  ;;  %s3193_s26 = smov [#allocation11]   ;;  %s5396_s0 = int_to_ptr.vmem [resolvable:$true] %s2671_s0 }
 0x22b   : > { %2155 = vrot.lane.b32.xlu0 %v2152_v14, %s3183_s30  ;;  %v4999_v28 = vmul.f32 %v4914_v43, %v2213_v15  ;;  %v1454_v33 = vadd.f32 %v4882_v26, %v1434_v56  ;;  %v2214_v1 = vmul.f32 %v4869_v55, %v2213_v15  ;;  %v2240_v14 = vrot.slane %v2234_v42, 1  ;;  %s3083_s5 = sshll.u32 %s3193_s26, 4  ;;  %s3084_s5 = int_to_ptr.vmem [resolvable:$false] %s3083_s5 }
 0x22c   : > { %v1596_v10 = vpop.permute.xlu0 %1595  ;;  %v1559_v38 = vadd.f32 %v1554_v17, %v1537_v31  ;;  %v2276_v29 = vmul.f32 %v4901_v8, %v2275_v32  ;;  %v2200_v61 = vmul.f32 %v5019_v44, %v2198_v11  ;;  %v2236_v11 = vmul.f32 %v5006_v6, %v2233_v27  ;;  %p3086_p4 = scmp.lt.s32.totalorder %s5396_s0, %s3084_s5 }
 0x22d   : > { %v1534_v20 = vpop.permute.xlu1 %1533  ;;  %v1476_v2 = vadd.f32 %v4908_v45, %v1454_v33  ;;  %v2221_v17 = vrot.slane %v4999_v28, 1  ;;  %v2154_v45 = vsel %vm757_vm9, %v2151_v40, %v2153_v34  ;;  %v2220_v7 = vrot.slane %v2214_v1, 1 }
 0x22e   : > { %2093 = vrot.lane.b32.xlu1 %v2090_v62, %s3183_s30  ;;  %v1579_v23 = vadd.f32 %v1574_v24, %v1559_v38  ;;  %v2241_v40 = vrot.slane %v5022_v36, 1  ;;  %v5040_v24 = vmul.f32 %v4914_v43, %v2255_v35  ;;  %v2282_v33 = vrot.slane %v2276_v29, 2 }
 0x22f   : > { %2175 = vrot.lane.b32.xlu0 %v2172_v22, %s3183_s30  ;;  %v1496_v16 = vadd.f32 %v4932_v21, %v1476_v2  ;;  %v2222_v58 = vsel %vm582_vm4, %v2220_v7, %v2221_v17  ;;  %v2262_v22 = vrot.slane %v2256_v46, 2  ;;  %v2339_v42 = vstv %s5069_s25 }
 0x230   : > { %v1616_v53 = vpop.permute.xlu0 %1615  ;;  %v1601_v51 = vadd.f32 %v1596_v10, %v1579_v23  ;;  %v2242_v57 = vsel %vm582_vm4, %v2240_v14, %v2241_v40  ;;  %v5059_v10 = vmul.f32 %v5019_v44, %v2275_v32  ;;  %v2340_v14 = vmul.f32 %v4869_v55, %v2339_v42 }
 0x231   : > { %v1556_v5 = vpop.permute.xlu1 %1555  ;;  %v1518_v60 = vadd.f32 %v4957_v59, %v1496_v16  ;;  %v2174_v59 = vsel %vm757_vm9, %v2171_v4, %v2173_v52  ;;  %v2263_v4 = vrot.slane %v5040_v24, 2  ;;  %v2243_v16 = vrot.slane %v2236_v11, 1 }
 0x232   : > { %2115 = vrot.lane.b32.xlu1 %v2112_v48, %s3183_s30  ;;  %v1621_v47 = vadd.f32 %v1616_v53, %v1601_v51  ;;  %v2317_v51 = vstv %s5052_s4  ;;  %s3085_s4 = scalar_lea.vmem %s3084_s5, 64 }
 0x233   : > { %2190 = vrot.lane.b32.xlu0 %v2186_v37, %s3184_s13  ;;  %v1538_v39 = vadd.f32 %v1534_v20, %v1518_v60  ;;  %v2216_v20 = vmul.f32 %v4986_v13, %v2213_v15  ;;  %v2264_v53 = vsel %vm617_vm5, %v2262_v22, %v2263_v4  ;;  %v2283_v37 = vrot.slane %v5059_v10, 2 }
 0x234   : > { %v1631_v26 = vpop.permute.xlu0 %1630  ;;  %v5076_v15 = vmul.f32 %v4914_v43, %v2297_v18  ;;  %v5090_v27 = vmul.f32 %v5019_v44, %v2317_v51 }
 0x235   : > { %v1576_v9 = vpop.permute.xlu1 %1575  ;;  %v1636_v0 = vadd.f32 %v1631_v26, %v1621_v47  ;;  %v1560_v62 = vadd.f32 %v1556_v5, %v1538_v39  ;;  %v2223_v5 = vrot.slane %v2216_v20, 1  ;;  %v2284_v26 = vsel %vm617_vm5, %v2282_v33, %v2283_v37 }
 0x236   : > { %2135 = vrot.lane.b32.xlu1 %v2132_v49, %s3183_s30  ;;  %v2298_v49 = vmul.f32 %v4869_v55, %v2297_v18  ;;  %v2278_v39 = vmul.f32 %v5006_v6, %v2275_v32  ;;  %v2346_v20 = vrot.slane %v2340_v14, 4 }
 0x237   : > { %2203 = vrot.lane.b32.xlu0 %v2199_v19, %s3184_s13  ;;  %v1580_v31 = vadd.f32 %v1576_v9, %v1560_v62  ;;  %v2305_v19 = vrot.slane %v5076_v15, 3  ;;  %v2224_v9 = vsel %vm582_vm4, %v2221_v17, %v2223_v5  ;;  %v2325_v17 = vrot.slane %v5090_v27, 3 }
 0x238   : > { %v1644_v63 = vpop.permute.xlu0 %1643  ;;  %v2304_v52 = vrot.slane %v2298_v49, 3  ;;  %v2359_v62 = vstv %s5083_s27  ;;  %v2401_v49 = vstv %s5117_s22 }
 0x239   : > { %v1649_v21 = vadd.f32 %v1644_v63, %v1636_v0  ;;  %v1598_v50 = vpop.permute.xlu1 %1597  ;;  %v2318_v0 = vmul.f32 %v4901_v8, %v2317_v51  ;;  %v5124_v32 = vmul.f32 %v5019_v44, %v2359_v62  ;;  %v2360_v22 = vmul.f32 %v4901_v8, %v2359_v62 }
 0x23a   : > { %2157 = vrot.lane.b32.xlu1 %v2154_v45, %s3183_s30  ;;  %v1602_v30 = vadd.f32 %v1598_v50, %v1580_v31  ;;  %v2258_v45 = vmul.f32 %v4986_v13, %v2255_v35  ;;  %v2306_v28 = vsel %vm652_vm6, %v2304_v52, %v2305_v19  ;;  %v5107_v35 = vmul.f32 %v4914_v43, %v2339_v42 }
 0x23b   : > { %2225 = vrot.lane.b32.xlu0 %v2222_v58, %s3184_s13  ;;  %v2244_v50 = vsel %vm582_vm4, %v2241_v40, %v2243_v16  ;;  %v2300_v31 = vmul.f32 %v4986_v13, %v2297_v18  ;;  %v2366_v5 = vrot.slane %v2360_v22, 4  ;;  %v2402_v16 = vmul.f32 %v4901_v8, %v2401_v49 }
 0x23c   : > { %v1666_v3 = vpop.permute.xlu0 %1665  ;;  %v2265_v58 = vrot.slane %v2258_v45, 2  ;;  %v2347_v40 = vrot.slane %v5107_v35, 4  ;;  %v2423_v52 = vstv %s5134_s23 }
 0x23d   : > { %v1671_v25 = vadd.f32 %v1666_v3, %v1649_v21  ;;  %v2425_v15 = vmul.f32 %v4914_v43, %v2423_v52 }
 0x23e   : > { %2177 = vrot.lane.b32.xlu1 %v2174_v59, %s3183_s30  ;;  %v2324_v59 = vrot.slane %v2318_v0, 3  ;;  %v2348_v24 = vsel %vm687_vm7, %v2346_v20, %v2347_v40  ;;  %s2907_s30 = sld [smem:[#allocation10 + $0x61]] }
 0x23f   : > { %v1618_v12 = vpop.permute.xlu1 %1617  ;;  %2245 = vrot.lane.b32.xlu0 %v2242_v57, %s3184_s13  ;;  %v2285_v57 = vrot.slane %v2278_v39, 2 }
 0x240   : > { %v1686_v48 = vpop.permute.xlu0 %1685  ;;  %v1622_v23 = vadd.f32 %v1618_v12, %v1602_v30  ;;  %v2326_v36 = vsel %vm652_vm6, %v2324_v59, %v2325_v17  ;;  %v2266_v12 = vsel %vm617_vm5, %v2263_v4, %v2265_v58  ;;  %v2381_v30 = vstv %s5100_s18 }
 0x241   : > { %v1691_v38 = vadd.f32 %v1686_v48, %v1671_v25  ;;  %v2367_v4 = vrot.slane %v5124_v32, 4  ;;  %v5141_v18 = vmul.f32 %v4914_v43, %v2381_v30  ;;  %v2382_v11 = vmul.f32 %v4869_v55, %v2381_v30 }
 0x242   : > { %2192 = vrot.lane.b32.xlu1 %v2187_v41, %s3184_s13  ;;  %v2424_v58 = vmul.f32 %v4869_v55, %v2423_v52 }
 0x243   : > { %v1633_v56 = vpop.permute.xlu1 %1632  ;;  %2267 = vrot.lane.b32.xlu0 %v2264_v53, %s3184_s13  ;;  %v2307_v53 = vrot.slane %v2300_v31, 3  ;;  %v2389_v10 = vrot.slane %v5141_v18, 5 }
 0x244   : > { %v1637_v34 = vadd.f32 %v1633_v56, %v1622_v23  ;;  %v1708_v54 = vpop.permute.xlu0 %1707  ;;  %v2286_v56 = vsel %vm617_vm5, %v2283_v37, %v2285_v57  ;;  %v2320_v23 = vmul.f32 %v5006_v6, %v2317_v51  ;;  %v2403_v37 = vmul.f32 %v5019_v44, %v2401_v49 }
 0x245   : > { %v1713_v1 = vadd.f32 %v1708_v54, %v1691_v38  ;;  %v2308_v51 = vsel %vm652_vm6, %v2305_v19, %v2307_v53  ;;  %v2443_v59 = vstv %s2907_s30  ;;  %v2430_v55 = vrot.slane %v2424_v58, 6 }
 0x246   : > { %2205 = vrot.lane.b32.xlu1 %v2200_v61, %s3184_s13  ;;  %v2446_v53 = vmul.f32 %v5006_v6, %v2443_v59 }
 0x247   : > { %v1646_v2 = vpop.permute.xlu1 %1645  ;;  %2287 = vrot.lane.b32.xlu0 %v2284_v26, %s3184_s13  ;;  %v2327_v26 = vrot.slane %v2320_v23, 3 }
 0x248   : > { %v1650_v47 = vadd.f32 %v1646_v2, %v1637_v34 }
 0x249   : > { %v1728_v7 = vpop.permute.xlu0 %1727  ;;  %v2328_v19 = vsel %vm652_vm6, %v2325_v17, %v2327_v26 }
 0x24a   : > { %2227 = vrot.lane.b32.xlu1 %v2224_v9, %s3184_s13  ;;  %v1733_v60 = vadd.f32 %v1728_v7, %v1713_v1  ;;  %v2368_v1 = vsel %vm687_vm7, %v2366_v5, %v2367_v4  ;;  %v2388_v9 = vrot.slane %v2382_v11, 5 }
 0x24b   : > { %v1668_v63 = vpop.permute.xlu1 %1667  ;;  %2309 = vrot.lane.b32.xlu0 %v2306_v28, %s3184_s13 }
 0x24c   : > { %v1672_v21 = vadd.f32 %v1668_v63, %v1650_v47  ;;  %v2342_v47 = vmul.f32 %v4986_v13, %v2339_v42  ;;  %v2409_v63 = vrot.slane %v2403_v37, 5 }
 0x24d   : > { %v1750_v46 = vpop.permute.xlu0 %1749 }
 0x24e   : > { %2247 = vrot.lane.b32.xlu1 %v2244_v50, %s3184_s13  ;;  %v1755_v3 = vadd.f32 %v1750_v46, %v1733_v60  ;;  %v2390_v60 = vsel %vm722_vm8, %v2388_v9, %v2389_v10  ;;  %v2349_v42 = vrot.slane %v2342_v47, 4  ;;  %v2408_v50 = vrot.slane %v2402_v16, 5 }
 0x24f   : > { %v1688_v41 = vpop.permute.xlu1 %1687  ;;  %2329 = vrot.lane.b32.xlu0 %v2326_v36, %s3184_s13  ;;  %v2431_v46 = vrot.slane %v2425_v15, 6  ;;  %v2444_v36 = vmul.f32 %v4901_v8, %v2443_v59 }
 0x250   : > { %v1692_v25 = vadd.f32 %v1688_v41, %v1672_v21  ;;  %v2362_v21 = vmul.f32 %v5006_v6, %v2359_v62  ;;  %v2410_v43 = vsel %vm722_vm8, %v2408_v50, %v2409_v63  ;;  %v2350_v17 = vsel %vm687_vm7, %v2347_v40, %v2349_v42 }
 0x251   : > { %v1770_v29 = vpop.permute.xlu0 %1769  ;;  %v2384_v41 = vmul.f32 %v4986_v13, %v2381_v30  ;;  %v2404_v40 = vmul.f32 %v5006_v6, %v2401_v49  ;;  %v2450_v20 = vrot.slane %v2444_v36, 6 }
 0x252   : > { %2269 = vrot.lane.b32.xlu1 %v2266_v12, %s3184_s13  ;;  %v1775_v48 = vadd.f32 %v1770_v29, %v1755_v3  ;;  %v2445_v3 = vmul.f32 %v5019_v44, %v2443_v59  ;;  %v2369_v62 = vrot.slane %v2362_v21, 4  ;;  %v2432_v12 = vsel %vm757_vm9, %v2430_v55, %v2431_v46 }
 0x253   : > { %2351 = vrot.lane.b32.xlu0 %v2348_v24, %s3184_s13  ;;  %v2391_v31 = vrot.slane %v2384_v41, 5  ;;  %v2426_v24 = vmul.f32 %v4986_v13, %v2423_v52 }
 0x254   : > { %v1710_v61 = vpop.permute.xlu1 %1709  ;;  %v2451_v44 = vrot.slane %v2445_v3, 6  ;;  %v2370_v35 = vsel %vm687_vm7, %v2367_v4, %v2369_v62 }
 0x255   : > { %v1714_v38 = vadd.f32 %v1710_v61, %v1692_v25  ;;  %v1792_v33 = vpop.permute.xlu0 %1791  ;;  %v2411_v61 = vrot.slane %v2404_v40, 5 }
 0x256   : > { %2289 = vrot.lane.b32.xlu1 %v2286_v56, %s3184_s13  ;;  %v1797_v34 = vadd.f32 %v1792_v33, %v1775_v48  ;;  %v2452_v8 = vsel %vm757_vm9, %v2450_v20, %v2451_v44  ;;  %v2392_v48 = vsel %vm722_vm8, %v2389_v10, %v2391_v31  ;;  %v2433_v56 = vrot.slane %v2426_v24, 6 }
 0x257   : > { %2371 = vrot.lane.b32.xlu0 %v2368_v1, %s3184_s13  ;;  %v2453_v33 = vrot.slane %v2446_v53, 6 }
 0x258   : > { %v1730_v54 = vpop.permute.xlu1 %1729  ;;  %v2434_v11 = vsel %vm757_vm9, %v2431_v46, %v2433_v56 }
 0x259   : > { %v1734_v2 = vadd.f32 %v1730_v54, %v1714_v38  ;;  %v1812_v45 = vpop.permute.xlu0 %1811  ;;  %v2412_v38 = vsel %vm722_vm8, %v2409_v63, %v2411_v61 }
 0x25a   : > { %2311 = vrot.lane.b32.xlu1 %v2308_v51, %s3184_s13  ;;  %v5162_v0 = vadd.f32 %v1812_v45, %v1797_v34  ;;  %v2454_v34 = vsel %vm757_vm9, %v2451_v44, %v2453_v33 }
 0x25b   : > { %2393 = vrot.lane.b32.xlu0 %v2390_v60, %s3184_s13 }
 0x25c   : > { %v1752_v7 = vpop.permute.xlu1 %1751 }
 0x25d   : > { %v1756_v28 = vadd.f32 %v1752_v7, %v1734_v2  ;;  %v5173_v39 = vpop.permute.xlu0 %1833 }
 0x25e   : > { %2331 = vrot.lane.b32.xlu1 %v2328_v19, %s3184_s13  ;;  %v1839_v21 = vadd.f32 %v5173_v39, %v5162_v0 }
 0x25f   : > { %2413 = vrot.lane.b32.xlu0 %v2410_v43, %s3184_s13 }
 0x260   : > { %v1772_v14 = vpop.permute.xlu1 %1771 }
 0x261   : > { %v1776_v27 = vadd.f32 %v1772_v14, %v1756_v28  ;;  %v1854_v32 = vpop.permute.xlu0 %1853 }
 0x262   : > { %2353 = vrot.lane.b32.xlu1 %v2350_v17, %s3184_s13  ;;  %v1859_v58 = vadd.f32 %v1854_v32, %v1839_v21 }
 0x263   : > { %2435 = vrot.lane.b32.xlu0 %v2432_v12, %s3184_s13 }
 0x264   : > { %v1794_v25 = vpop.permute.xlu1 %1793 }
 0x265   : > { %v1798_v57 = vadd.f32 %v1794_v25, %v1776_v27  ;;  %v1876_v22 = vpop.permute.xlu0 %1875 }
 0x266   : > { %2373 = vrot.lane.b32.xlu1 %v2370_v35, %s3184_s13  ;;  %v1881_v14 = vadd.f32 %v1876_v22, %v1859_v58 }
 0x267   : > { %2455 = vrot.lane.b32.xlu0 %v2452_v8, %s3184_s13 }
 0x268   : > { %v1814_v29 = vpop.permute.xlu1 %1813 }
 0x269   : > { %v1818_v30 = vadd.f32 %v1814_v29, %v1798_v57  ;;  %v1896_v4 = vpop.permute.xlu0 %1895 }
 0x26a   : > { %2395 = vrot.lane.b32.xlu1 %v2392_v48, %s3184_s13  ;;  %v1901_v46 = vadd.f32 %v1896_v4, %v1881_v14 }
 0x26c   : > { %v1836_v18 = vpop.permute.xlu1 %1835 }
 0x26d   : > { %v1911_v23 = vpop.permute.xlu0 %1910  ;;  %v1840_v36 = vadd.f32 %v1836_v18, %v1818_v30 }
 0x26e   : > { %2415 = vrot.lane.b32.xlu1 %v2412_v38, %s3184_s13  ;;  %v1916_v27 = vadd.f32 %v1911_v23, %v1901_v46 }
 0x270   : > { %v1856_v5 = vpop.permute.xlu1 %1855 }
 0x271   : > { %v1924_v49 = vpop.permute.xlu0 %1923  ;;  %v1860_v57 = vadd.f32 %v1856_v5, %v1840_v36 }
 0x272   : > { %2437 = vrot.lane.b32.xlu1 %v2434_v11, %s3184_s13  ;;  %v1929_v62 = vadd.f32 %v1924_v49, %v1916_v27 }
 0x274   : > { %v1878_v13 = vpop.permute.xlu1 %1877 }
 0x275   : > { %v1946_v54 = vpop.permute.xlu0 %1945  ;;  %v1882_v31 = vadd.f32 %v1878_v13, %v1860_v57 }
 0x276   : > { %2457 = vrot.lane.b32.xlu1 %v2454_v34, %s3184_s13  ;;  %v1951_v55 = vadd.f32 %v1946_v54, %v1929_v62  ;;  %s3079_s13 = scalar_lea.vmem %s5396_s0, 32 }
 0x277   : > { %p3080_p8 = scmp.ne.s32.totalorder %s5396_s0, %s3079_s13  ;;  %p3087_p9 = scmp.lt.s32.totalorder %s3085_s4, %s3079_s13 }
 0x278   : > { %v1898_v1 = vpop.permute.xlu1 %1897 }
 0x279   : > { %v1966_v10 = vpop.permute.xlu0 %1965  ;;  %v1902_v40 = vadd.f32 %v1898_v1, %v1882_v31  ;;  %p3081_p12 = pnand %p3080_p8, %p5596_p2  ;;  %p3088_p13 = por %p3087_p9, %p3086_p4 }
 0x27a   : > { %v1971_v12 = vadd.f32 %v1966_v10, %v1951_v55 }
 0x27b   : > { %p3082_p5 = pneg %p3081_p12 }
 0x27c   : > { %v1913_v37 = vpop.permute.xlu1 %1912 }
 0x27d   : > { %v1988_v6 = vpop.permute.xlu0 %1987  ;;  %v1917_v22 = vadd.f32 %v1913_v37, %v1902_v40  ;;  %p3089_p11 = pnand %p3088_p13, %p3082_p5 }
 0x27e   : > { %v1993_v35 = vadd.f32 %v1988_v6, %v1971_v12 }
 0x280   : > { %v1926_v2 = vpop.permute.xlu1 %1925 }
 0x281   : > { %v2008_v51 = vpop.permute.xlu0 %2007  ;;  %v1930_v61 = vadd.f32 %v1926_v2, %v1917_v22 }
 0x282   : > { %v2013_v39 = vadd.f32 %v2008_v51, %v1993_v35 }
 0x284   : > { %v1948_v26 = vpop.permute.xlu1 %1947 }
 0x285   : > { %v2030_v47 = vpop.permute.xlu0 %2029  ;;  %v1952_v4 = vadd.f32 %v1948_v26, %v1930_v61 }
 0x286   : > { %v2035_v20 = vadd.f32 %v2030_v47, %v2013_v39 }
 0x288   : > { %v1968_v9 = vpop.permute.xlu1 %1967 }
 0x289   : > { %v2050_v16 = vpop.permute.xlu0 %2049  ;;  %v1972_v56 = vadd.f32 %v1968_v9, %v1952_v4 }
 0x28a   : > { %v2055_v8 = vadd.f32 %v2050_v16, %v2035_v20 }
 0x28c   : > { %v1990_v45 = vpop.permute.xlu1 %1989 }
 0x28d   : > { %v2072_v52 = vpop.permute.xlu0 %2071  ;;  %v1994_v23 = vadd.f32 %v1990_v45, %v1972_v56 }
 0x28e   : > { %v2077_v24 = vadd.f32 %v2072_v52, %v2055_v8 }
 0x290   : > { %v2010_v7 = vpop.permute.xlu1 %2009 }
 0x291   : > { %v2092_v60 = vpop.permute.xlu0 %2091  ;;  %v2014_v49 = vadd.f32 %v2010_v7, %v1994_v23 }
 0x292   : > { %v2097_v30 = vadd.f32 %v2092_v60, %v2077_v24 }
 0x294   : > { %v2032_v63 = vpop.permute.xlu1 %2031 }
 0x295   : > { %v2114_v15 = vpop.permute.xlu0 %2113  ;;  %v2036_v34 = vadd.f32 %v2032_v63, %v2014_v49 }
 0x296   : > { %v2119_v53 = vadd.f32 %v2114_v15, %v2097_v30 }
 0x298   : > { %v2052_v28 = vpop.permute.xlu1 %2051 }
 0x299   : > { %v2134_v19 = vpop.permute.xlu0 %2133  ;;  %v2056_v37 = vadd.f32 %v2052_v28, %v2036_v34 }
 0x29a   : > { %v2139_v11 = vadd.f32 %v2134_v19, %v2119_v53 }
 0x29c   : > { %v2074_v42 = vpop.permute.xlu1 %2073 }
 0x29d   : > { %v2156_v50 = vpop.permute.xlu0 %2155  ;;  %v2078_v2 = vadd.f32 %v2074_v42, %v2056_v37 }
 0x29e   : > { %v2161_v13 = vadd.f32 %v2156_v50, %v2139_v11  ;;  %v3185_v11 = vmov 1966171168  }
 0x2a0   : > { %v2094_v59 = vpop.permute.xlu1 %2093 }
 0x2a1   : > { %v2176_v43 = vpop.permute.xlu0 %2175  ;;  %v2098_v16 = vadd.f32 %v2094_v59, %v2078_v2 }
 0x2a2   : > { %v2181_v1 = vadd.f32 %v2176_v43, %v2161_v13  ;;  %v5564_v13 = vlaneseq }
 0x2a4   : > { %v2116_v3 = vpop.permute.xlu1 %2115  ;;  %v2483_v34 = vshrl.u32 %v5564_v13, 7  ;;  %vm5206_vm10 = vcmp.lt.s32.totalorder %v5564_v13, 16  ;;  %vm5219_vm11 = vcmp.ge.s32.totalorder %v5564_v13, 16  ;;  %vm5224_vm12 = vcmp.lt.s32.totalorder %v5564_v13, 32 }
 0x2a5   : > { %v2191_v17 = vpop.permute.xlu0 %2190  ;;  %v2120_v9 = vadd.f32 %v2116_v3, %v2098_v16  ;;  %vm2506_vm13 = vmand %vm5219_vm11, %vm5224_vm12  ;;  %vm5233_vm14 = vcmp.ge.s32.totalorder %v5564_v13, 32  ;;  %vm5238_vm15 = vcmp.lt.s32.totalorder %v5564_v13, 48  ;;  %vm5259_vm1 = vcmp.ge.s32.totalorder %v5564_v13, 48 }
 0x2a6   : > { %v2196_v6 = vadd.f32 %v2191_v17, %v2181_v1  ;;  %vm2514_vm0 = vmand %vm5233_vm14, %vm5238_vm15  ;;  %vm5264_vm2 = vcmp.lt.s32.totalorder %v5564_v13, 64  ;;  %vm5269_vm3 = vcmp.ge.s32.totalorder %v5564_v13, 64  ;;  %vm5274_vm4 = vcmp.lt.s32.totalorder %v5564_v13, 80 }
 0x2a7   : > { %vm5474_vm5 = vmand %vm5259_vm1, %vm5264_vm2  ;;  %vm5287_vm7 = vcmp.ge.s32.totalorder %v5564_v13, 80  ;;  %vm5292_vm8 = vcmp.lt.s32.totalorder %v5564_v13, 96  ;;  %vm5345_vm12 = vcmp.ge.s32.totalorder %v5564_v13, 112 }
 0x2a8   : > { %v2136_v41 = vpop.permute.xlu1 %2135  ;;  %vm2544_vm6 = vmand %vm5269_vm3, %vm5274_vm4 }
 0x2a9   : > { %v2204_v25 = vpop.permute.xlu0 %2203  ;;  %v2140_v19 = vadd.f32 %v2136_v41, %v2120_v9  ;;  %vm2559_vm9 = vmand %vm5287_vm7, %vm5292_vm8 }
 0x2aa   : > { %v2209_v26 = vadd.f32 %v2204_v25, %v2196_v6  ;;  %vm5595_vm15 = vmand %vm5259_vm1, %vm5264_vm2 }
 0x2ac   : > { %v2158_v44 = vpop.permute.xlu1 %2157 }
 0x2ad   : > { %v2226_v0 = vpop.permute.xlu0 %2225  ;;  %v2162_v7 = vadd.f32 %v2158_v44, %v2140_v19 }
 0x2ae   : > { %v2231_v52 = vadd.f32 %v2226_v0, %v2209_v26 }
 0x2b0   : > { %v2178_v32 = vpop.permute.xlu1 %2177 }
 0x2b1   : > { %v2246_v29 = vpop.permute.xlu0 %2245  ;;  %v2182_v14 = vadd.f32 %v2178_v32, %v2162_v7 }
 0x2b2   : > { %v2251_v45 = vadd.f32 %v2246_v29, %v2231_v52 }
 0x2b4   : > { %v2193_v48 = vpop.permute.xlu1 %2192 }
 0x2b5   : > { %v2268_v38 = vpop.permute.xlu0 %2267  ;;  %v2197_v28 = vadd.f32 %v2193_v48, %v2182_v14 }
 0x2b6   : > { %v2273_v21 = vadd.f32 %v2268_v38, %v2251_v45 }
 0x2b8   : > { %v2206_v18 = vpop.permute.xlu1 %2205 }
 0x2b9   : > { %v2288_v5 = vpop.permute.xlu0 %2287  ;;  %v2210_v17 = vadd.f32 %v2206_v18, %v2197_v28 }
 0x2ba   : > { %v2293_v63 = vadd.f32 %v2288_v5, %v2273_v21 }
 0x2bc   : > { %v2228_v33 = vpop.permute.xlu1 %2227 }
 0x2bd   : > { %v2310_v54 = vpop.permute.xlu0 %2309  ;;  %v2232_v59 = vadd.f32 %v2228_v33, %v2210_v17  ;;  %v2480_v33 = vunpack.c.l.s4 %v3185_v11 }
 0x2be   : > { %v2315_v43 = vadd.f32 %v2310_v54, %v2293_v63 }
 0x2bf   : > { %v2481_v49 = vunpack.c.0.s8 %v2480_v33 }
 0x2c0   : > { %v2248_v10 = vpop.permute.xlu1 %2247 }
 0x2c1   : > { %v2330_v51 = vpop.permute.xlu0 %2329  ;;  %v2252_v25 = vadd.f32 %v2248_v10, %v2232_v59  ;;  %v2484_v54 = vsub.s32 %v2481_v49, %v2483_v34 }
 0x2c2   : > { %v2335_v42 = vadd.f32 %v2330_v51, %v2315_v43 }
 0x2c4   : > { %v2270_v47 = vpop.permute.xlu1 %2269 }
 0x2c5   : > { %v2352_v60 = vpop.permute.xlu0 %2351  ;;  %v2274_v41 = vadd.f32 %v2270_v47, %v2252_v25 }
 0x2c6   : > { %v2357_v62 = vadd.f32 %v2352_v60, %v2335_v42 }
 0x2c8   : > { %v2290_v15 = vpop.permute.xlu1 %2289 }
 0x2c9   : > { %v2372_v50 = vpop.permute.xlu0 %2371  ;;  %v2294_v31 = vadd.f32 %v2290_v15, %v2274_v41 }
 0x2ca   : > { %v2377_v3 = vadd.f32 %v2372_v50, %v2357_v62 }
 0x2cc   : > { %v2312_v58 = vpop.permute.xlu1 %2311 }
 0x2cd   : > { %v2394_v46 = vpop.permute.xlu0 %2393  ;;  %v2316_v39 = vadd.f32 %v2312_v58, %v2294_v31 }
 0x2ce   : > { %v2399_v12 = vadd.f32 %v2394_v46, %v2377_v3 }
 0x2d0   : > { %v2332_v27 = vpop.permute.xlu1 %2331 }
 0x2d1   : > { %v2414_v55 = vpop.permute.xlu0 %2413  ;;  %v2336_v22 = vadd.f32 %v2332_v27, %v2316_v39 }
 0x2d2   : > { %v2419_v44 = vadd.f32 %v2414_v55, %v2399_v12 }
 0x2d4   : > { %v2354_v36 = vpop.permute.xlu1 %2353 }
 0x2d5   : > { %v2436_v57 = vpop.permute.xlu0 %2435  ;;  %v2358_v8 = vadd.f32 %v2354_v36, %v2336_v22 }
 0x2d6   : > { %v2441_v0 = vadd.f32 %v2436_v57, %v2419_v44 }
 0x2d8   : > { %v2374_v35 = vpop.permute.xlu1 %2373 }
 0x2d9   : > { %v2456_v32 = vpop.permute.xlu0 %2455  ;;  %v2378_v61 = vadd.f32 %v2374_v35, %v2358_v8 }
 0x2da   : > { %v2461_v40 = vadd.f32 %v2456_v32, %v2441_v0 }
 0x2dc   : > { %v2396_v20 = vpop.permute.xlu1 %2395  ;;  %v2908_v29 = vmul.f32 -1.442695, %v2461_v40 }
 0x2dd   : > { %v2400_v24 = vadd.f32 %v2396_v20, %v2378_v61 }
 0x2de   : > { %3014 = vpow2.f32 %v2908_v29 }
 0x2e0   : > { %v2416_v48 = vpop.permute.xlu1 %2415 }
 0x2e1   : > { %v2420_v38 = vadd.f32 %v2416_v48, %v2400_v24 }
 0x2e4   : > { %v2438_v4 = vpop.permute.xlu1 %2437 }
 0x2e5   : > { %v2442_v30 = vadd.f32 %v2438_v4, %v2420_v38 }
 0x2e8   : > { %v2458_v18 = vpop.permute.xlu1 %2457  ;;  %v3015_v53 = vpop.eup %3014 }
 0x2e9   : > { %v2462_v56 = vadd.f32 %v2458_v18, %v2442_v30  ;;  %v2469_v23 = vadd.f32 1.0, %v3015_v53 }
 0x2eb   : > { %v2909_v5 = vmul.f32 -1.442695, %v2462_v56  ;;  %3016 = vrcp.f32 %v2469_v23 }
 0x2ed   : > { %3018 = vpow2.f32 %v2909_v5 }
 0x2f5   : > { %v3017_v10 = vpop.eup %3016 }
 0x2f6   : > { %v2485_v6 = vrot.slane %v3017_v10, %v2484_v54  ;;  %2477 = vst.msk [vmem:[%s5210_s15] sm:$0x1] %vm5206_vm10, %v3017_v10  ;;  %v2524_v16 = vcombine.high %v3017_v10, %v3017_v10 }
 0x2f7   : > { %v3019_v37 = vpop.eup %3018 }
 0x2f8   : > { %v2470_v2 = vadd.f32 1.0, %v3019_v37  ;;  %v2486_v51 = vcombine.high %v2485_v6, %v2485_v6  ;;  %v2493_v47 = vrot.slane %v2485_v6, %v2484_v54  ;;  %v2531_v9 = vrot.slane %v2524_v16, %v2484_v54 }
 0x2fa   : > { %3020 = vrcp.f32 %v2470_v2  ;;  %v2500_v26 = vrot.slane %v2486_v51, %v2484_v54  ;;  %v2508_v52 = vcombine.high %v2493_v47, %v2493_v47  ;;  %v2538_v60 = vrot.slane %v2531_v9, %v2484_v54 }
 0x2fb   : > { %v2546_v7 = vcombine.high %v2531_v9, %v2531_v9 }
 0x2fc   : > { %2501 = vrot.lane.b32.xlu0 %v2500_v26, %s3186_s7  ;;  %v2516_v19 = vcombine.high %v2500_v26, %v2500_v26  ;;  %v2561_v46 = vcombine.high %v2538_v60, %v2538_v60 }
 0x2fd   : > { %v2553_v14 = vrot.slane %v2546_v7, %v2484_v54 }
 0x2ff   : > { %v2569_v27 = vcombine.high %v2553_v14, %v2553_v14 }
 0x300   : > { %2509 = vrot.lane.b32.xlu0 %v2508_v52, %s3187_s28 }
 0x304   : > { %v3021_v45 = vpop.eup %3020  ;;  %2539 = vrot.lane.b32.xlu0 %v2538_v60, %s3188_s17 }
 0x305   : > { %v2585_v15 = vrot.slane %v3021_v45, %v2484_v54  ;;  %2577 = vst.msk [vmem:[%s5210_s15 + $0x1] sm:$0x1] %vm5206_vm10, %v3021_v45  ;;  %v2615_v58 = vcombine.high %v3021_v45, %v3021_v45  ;;  %vm5319_vm10 = vcmp.ge.s32.totalorder %v5564_v13, 96 }
 0x307   : > { %v2586_v21 = vcombine.high %v2585_v15, %v2585_v15  ;;  %v2593_v63 = vrot.slane %v2585_v15, %v2484_v54  ;;  %v2622_v28 = vrot.slane %v2615_v58, %v2484_v54 }
 0x308   : > { %2517 = vrot.lane.b32.xlu0 %v2516_v19, %s3189_s29 }
 0x309   : > { %v2600_v50 = vrot.slane %v2586_v21, %v2484_v54  ;;  %v2605_v43 = vcombine.high %v2593_v63, %v2593_v63  ;;  %v2629_v42 = vrot.slane %v2622_v28, %v2484_v54  ;;  %v2634_v62 = vcombine.high %v2622_v28, %v2622_v28 }
 0x30b   : > { %2601 = vrot.lane.b32.xlu1 %v2600_v50, %s3186_s7  ;;  %v2610_v17 = vcombine.high %v2600_v50, %v2600_v50  ;;  %v2641_v59 = vrot.slane %v2634_v62, %v2484_v54  ;;  %v2646_v55 = vcombine.high %v2629_v42, %v2629_v42 }
 0x30c   : > { %2554 = vrot.lane.b32.xlu0 %v2553_v14, %s3190_s19 }
 0x30d   : > { %v2651_v3 = vcombine.high %v2641_v59, %v2641_v59 }
 0x30f   : > { %2606 = vrot.lane.b32.xlu1 %v2605_v43, %s3187_s28 }
 0x310   : > { %2562 = vrot.lane.b32.xlu0 %v2561_v46, %s3191_s8 }
 0x313   : > { %2630 = vrot.lane.b32.xlu1 %v2629_v42, %s3188_s17 }
 0x314   : > { %2570 = vrot.lane.b32.xlu0 %v2569_v27, %s3192_s24 }
 0x317   : > { %2611 = vrot.lane.b32.xlu1 %v2610_v17, %s3189_s29 }
 0x31b   : > { %2642 = vrot.lane.b32.xlu1 %v2641_v59, %s3190_s19 }
 0x31f   : > { %2647 = vrot.lane.b32.xlu1 %v2646_v55, %s3191_s8 }
 0x323   : > { %2652 = vrot.lane.b32.xlu1 %v2651_v3, %s3192_s24 }
 0x36e   : > { %v2502_v57 = vpop.permute.xlu0 %2501 }
 0x36f   : > { %2507 = vst.msk [vmem:[%s5210_s15] sm:$0x1] %vm2506_vm13, %v2502_v57 }
 0x372   : > { %v2510_v44 = vpop.permute.xlu0 %2509 }
 0x373   : > { %2515 = vst.msk [vmem:[%s5210_s15] sm:$0x1] %vm2514_vm0, %v2510_v44 }
 0x376   : > { %v2540_v0 = vpop.permute.xlu0 %2539 }
 0x37a   : > { %v2518_v22 = vpop.permute.xlu0 %2517 }
 0x37b   : > { %2523 = vst.msk [vmem:[%s5210_s15] sm:$0x1] %vm5474_vm5, %v2518_v22  ;;  %vm5324_vm5 = vcmp.lt.s32.totalorder %v5564_v13, 112 }
 0x37c   : > { %2545 = vst.msk [vmem:[%s5210_s15] sm:$0x1] %vm2544_vm6, %v2540_v0  ;;  %vm2567_vm11 = vmand %vm5319_vm10, %vm5324_vm5 }
 0x37d   : > { %v2602_v29 = vpop.permute.xlu1 %2601 }
 0x37e   : > { %2604 = vst.msk [vmem:[%s5210_s15 + $0x1] sm:$0x1] %vm2506_vm13, %v2602_v29  ;;  %v2555_v61 = vpop.permute.xlu0 %2554  ;;  %vm5350_vm13 = vcmp.lt.s32.totalorder %v5564_v13, 128 }
 0x37f   : > { %2560 = vst.msk [vmem:[%s5210_s15] sm:$0x1] %vm2559_vm9, %v2555_v61  ;;  %vm2575_vm14 = vmand %vm5345_vm12, %vm5350_vm13 }
 0x381   : > { %v2607_v24 = vpop.permute.xlu1 %2606 }
 0x382   : > { %2609 = vst.msk [vmem:[%s5210_s15 + $0x1] sm:$0x1] %vm2514_vm0, %v2607_v24  ;;  %v2563_v30 = vpop.permute.xlu0 %2562 }
 0x383   : > { %2568 = vst.msk [vmem:[%s5210_s15] sm:$0x1] %vm2567_vm11, %v2563_v30 }
 0x385   : > { %v2631_v18 = vpop.permute.xlu1 %2630 }
 0x386   : > { %v2571_v56 = vpop.permute.xlu0 %2570 }
 0x387   : > { %2576 = vst.msk [vmem:[%s5210_s15] sm:$0x1] %vm2575_vm14, %v2571_v56 }
 0x389   : > { %v2612_v53 = vpop.permute.xlu1 %2611 }
 0x38a   : > { %2614 = vst.msk [vmem:[%s5210_s15 + $0x1] sm:$0x1] %vm5595_vm15, %v2612_v53 }
 0x38b   : > { %2633 = vst.msk [vmem:[%s5210_s15 + $0x1] sm:$0x1] %vm2544_vm6, %v2631_v18 }
 0x38d   : > { %v2643_v23 = vpop.permute.xlu1 %2642 }
 0x38e   : > { %2645 = vst.msk [vmem:[%s5210_s15 + $0x1] sm:$0x1] %vm2559_vm9, %v2643_v23 }
 0x391   : > { %v2648_v5 = vpop.permute.xlu1 %2647 }
 0x392   : > { %2650 = vst.msk [vmem:[%s5210_s15 + $0x1] sm:$0x1] %vm2567_vm11, %v2648_v5 }
 0x395   : > { %v2653_v11 = vpop.permute.xlu1 %2652 }
 0x396   : > { %2655 = vst.msk [vmem:[%s5210_s15 + $0x1] sm:$0x1] %vm2575_vm14, %v2653_v11 }
 0x397   : > { %3092 = shalt.err (!%p3089_p11)
}
 0x398   : > { %s3093_s21 = scalar_lea.hbm %s5394_s11, 32  ;;  %s3097_s18 = scalar_lea.hbm %s5446_s2, 64 }
 0x399   : > { %p3094_p3 = scmp.ne.s32.totalorder %s5394_s11, %s3093_s21  ;;  %p3098_p6 = scmp.lt.u32.totalorder %s5394_s11, %s5446_s2 }
 0x39a   : > { %p3099_p1 = scmp.lt.u32.totalorder %s3097_s18, %s3093_s21  ;;  %p3101_p8 = scmp.lt.u32.totalorder %s3093_s21, %s5394_s11 }
 0x39b   : > { %p3095_p7 = pnand %p3094_p3, %p5596_p2 }
 0x39c   : > { %p3100_p0 = por %p3099_p1, %p3098_p6 }
 0x39d   : > { %p3096_p10 = pneg %p3095_p7 }
 0x39e   : > { %p3102_p12 = por %p3101_p8, %p3100_p0 }
 0x3a0   : > { %p3103_p5 = pnand %p3102_p12, %p3096_p10 }
 0x3a2   : > { %3106 = shalt.err (!%p3103_p5)
}
 0x3a3   : > { %2923 = dma.vmem_to_hbm [thread:$0]  (%p5596_p2), %s5396_s0, 32, %s5394_s11, %s2657_s12  }
 0x3a4 PF: > { %s2683_s30 = sand.u32 1, %s3145_s9   ;;  %p5597_p4 = scmp.ne.s32.totalorder %s5483_s20, 0 }
 0x3a5   : > { %p5598_p9 = scmp.ge.s32.totalorder %s3165_s14, 2  ;;  %s2684_s6 = scalar_lea.sflag [#allocation8], %s2683_s30 }
 0x3a7   : > { %p2934_p13 = pnand %p5598_p9, %p5597_p4 }
 0x3a9   : > { %3140 = dma.done.wait (!%p2934_p13), %s2684_s6, 32  }
 0x3aa   : > { %3142 = vsyncadd (!%p2934_p13), %s2684_s6, 4294967264  ;;  %s19_s14 = sadd.s32 1, %s3165_s14   ;;  %s5599_s9 = sld [smem:[#allocation15_spill]] }
 0x3ab   : > { %p16_p11 = scmp.ge.s32.totalorder %s19_s14, 4   ;;  %s5600_s10 = sld [smem:[#allocation16_spill]] }
 0x3ac   : > { %s5601_s11 = sld [smem:[#allocation19_spill]]  ;;  %s5602_s12 = sld [smem:[#allocation17_spill]] }
 0x3ad   : > { %s5603_s13 = sld [smem:[#allocation18_spill]]  ;;  %18 = sbr.rel (!%p16_p11) target bundleno = 10 (0xa), region = 89 }
 0x3b4   :  { %2689 = vsyncpa [#allocation7], 1 }
 0x3b5   :  { %2691 = vsyncpa [#allocation7 + $0x1], 1 }
 0x3b6   :  { %2692 = vsyncpa [#allocation8], 1 }
 0x3b7   :  { %2694 = vsyncpa [#allocation8 + $0x1], 1 }
 0x3b8   :  { %2695 = vsyncpa [#allocation9], 1 }
 0x3b9   :  { %2697 = vsyncpa [#allocation9 + $0x1], 1 }

</bundles_post_ra>
